<compile_context>
chip_gen: v5e
topology: v5e:2x2
jax: 0.10.0
libtpu: 0.0.40
codegen_flags: <defaults>
</compile_context>

<pallas_src>
import jax
import jax.numpy as jnp
from jax import lax
from jax.experimental import pallas as pl
from jax.experimental.pallas import tpu as pltpu

# ----------------------------- model sizes ---------------------------------
BATCH = 256          # total batch (streamed through the grid)
INPUT_SIZE = 128     # D
HIDDEN_SIZES = (128, 128)
NUM_CLASSES = 8      # C
TILE_B = 128         # rows per grid step (keeps >=2 tiles -> both v7x TCs busy)


def _make_kernel(tile_b, input_size, num_classes):
    D, C = input_size, num_classes

    def kernel(x_ref, w0_ref, b0_ref, w1_ref, b1_ref, w2_ref, b2_ref, lb_ref,
               probs_ref, exp_ref):
        x = x_ref[...]                                    # [TB, D] f32 (epilogue needs f32)
        xb = x.astype(jnp.bfloat16)

        # ---- iffnnpart1: MLP (bf16 on the MXU, f32 accumulation) ----
        h = jnp.dot(xb, w0_ref[...], preferred_element_type=jnp.float32) + b0_ref[...]
        h = jnp.maximum(h, 0.0)
        h = jnp.dot(h.astype(jnp.bfloat16), w1_ref[...],
                    preferred_element_type=jnp.float32) + b1_ref[...]
        h = jnp.maximum(h, 0.0)
        # last_weight already folded into w2/b2 at parameter-prep time.
        out = jnp.dot(h.astype(jnp.bfloat16), w2_ref[...],
                      preferred_element_type=jnp.float32) + b2_ref[...]   # [TB, C*D] f32

        # ---- per-class chunked epilogue: logits[:, c] = sum_d out_c * x ----
        # Live working set per step is one [TB, D] chunk; no x.repeat, no flat
        # w3, no selector matmul.  Reduce uses the XLU slot, muls the VPU.
        col = lax.broadcasted_iota(jnp.int32, (tile_b, C), 1)     # [TB, C]
        logits = jnp.zeros((tile_b, C), jnp.float32)
        for c in range(C):                                        # unrolled (C small)
            w3_c = out[:, c * D:(c + 1) * D] * x                  # [TB, D]
            s_c = jnp.sum(w3_c, axis=1, keepdims=True)            # [TB, 1]
            logits = logits + jnp.where(col == c, s_c, 0.0)
        logits = logits + lb_ref[...]                             # [TB, C] f32

        # ---- softmax (approx reciprocal on the EUP slot) ----
        m = jnp.max(logits, axis=1, keepdims=True)
        e = jnp.exp(logits - m)
        denom = jnp.sum(e, axis=1, keepdims=True)
        probs_ref[...] = (e * pl.reciprocal(denom, approx=True)).astype(probs_ref.dtype)

        # ---- explanation weights for the argmax class ----
        # first-max index per row (matches torch.max tie-breaking)
        cls = jnp.min(jnp.where(logits == m, col, C), axis=1, keepdims=True)  # [TB, 1]
        acc = jnp.zeros((tile_b, D), jnp.float32)
        for c in range(C):                                        # unrolled masked accumulate
            mask = (cls == c).astype(jnp.float32)                 # [TB, 1]
            acc = acc + mask * (out[:, c * D:(c + 1) * D] * x)
        exp_ref[...] = acc.astype(exp_ref.dtype)

    return kernel


def prepare_params(params):
    """One-time parameter prep: bf16 MXU weights + fold last_weight into layer 2."""
    w0, b0, w1, b1, w2, b2, lw, lb = params
    w2f = (w2 * lw).astype(jnp.bfloat16)          # fold last_weight into W2 (bf16 MXU operand)
    b2f = (b2 * lw).astype(jnp.float32)           # fold into bias, keep f32
    return (w0.astype(jnp.bfloat16), b0.astype(jnp.float32),
            w1.astype(jnp.bfloat16), b1.astype(jnp.float32),
            w2f, b2f, lb.astype(jnp.float32))


def iffnn_mulcls_forward(x, prepared, *, input_size, num_classes, tile_b=TILE_B):
    """IFFNN_MulCls forward (with_explain=True). Returns (probs [B,C], exp_w [B,D])."""
    B = x.shape[0]
    D, C = input_size, num_classes
    w0b, b0, w1b, b1, w2b, b2f, lb = prepared
    H0, H1 = w0b.shape[1], w1b.shape[1]

    # pad batch up to a multiple of the tile, slice outputs back afterwards
    n_tiles = pl.cdiv(B, tile_b)
    Bp = n_tiles * tile_b
    if Bp != B:
        x = jnp.pad(x, ((0, Bp - B), (0, 0)))

    kernel = _make_kernel(tile_b, D, C)
    const = lambda a: pl.BlockSpec(a.shape, lambda i: (0, 0))     # VMEM-resident params

    flops = 2 * Bp * (D * H0 + H0 * H1 + H1 * C * D) + 6 * Bp * C * D
    bytes_accessed = (x.size * 4
                      + (w0b.size + w1b.size + w2b.size) * 2
                      + (b0.size + b1.size + b2f.size + lb.size) * 4
                      + Bp * (C + D) * 4)
    cost = pl.CostEstimate(flops=int(flops), transcendentals=int(Bp * C),
                           bytes_accessed=int(bytes_accessed))

    probs, expw = pl.pallas_call(
        kernel,
        out_shape=(jax.ShapeDtypeStruct((Bp, C), jnp.float32),
                   jax.ShapeDtypeStruct((Bp, D), jnp.float32)),
        grid=(n_tiles,),
        in_specs=[
            pl.BlockSpec((tile_b, D), lambda i: (i, 0)),          # x: streamed per batch tile
            const(w0b), const(b0),
            const(w1b), const(b1),
            const(w2b), const(b2f),
            const(lb),
        ],
        out_specs=(pl.BlockSpec((tile_b, C), lambda i: (i, 0)),   # block last dim == full C
                   pl.BlockSpec((tile_b, D), lambda i: (i, 0))),
        compiler_params=pltpu.CompilerParams(
            dimension_semantics=("parallel",)),                   # shards tiles across TCs on v7x
        cost_estimate=cost,
    )(x, w0b, b0, w1b, b1, w2b, b2f, lb)

    return probs[:B], expw[:B]


def init_params(key, input_size, hidden_sizes, num_classes):
    """Deterministic init mirroring the PyTorch module (weights stored [in, out])."""
    dims = [input_size] + list(hidden_sizes) + [input_size * num_classes]
    keys = jax.random.split(key, 2 * (len(dims) - 1) + 1)
    params = []
    for i in range(len(dims) - 1):
        fan_in, fan_out = dims[i], dims[i + 1]
        bound = 1.0 / (fan_in ** 0.5)
        w = jax.random.uniform(keys[2 * i], (fan_in, fan_out),
                               minval=-bound, maxval=bound, dtype=jnp.float32)
        b = jax.random.uniform(keys[2 * i + 1], (1, fan_out),
                               minval=-bound, maxval=bound, dtype=jnp.float32)
        params += [w, b]
    lw = jax.random.uniform(keys[-1], (1, input_size * num_classes),
                            minval=0.0, maxval=1.0, dtype=jnp.float32)   # torch.rand
    lb = jnp.zeros((1, num_classes), dtype=jnp.float32)                  # torch.zeros
    return tuple(params) + (lw, lb)


def reference_forward(x, prepared, *, input_size, num_classes):
    """Pure-JAX reference mirroring the kernel's bf16-on-MXU / folded-lw numerics."""
    w0b, b0, w1b, b1, w2b, b2f, lb = prepared
    bdot = lambda a, w: jnp.dot(a.astype(jnp.bfloat16), w,
                                preferred_element_type=jnp.float32)
    h = jnp.maximum(bdot(x, w0b) + b0, 0.0)
    h = jnp.maximum(bdot(h, w1b) + b1, 0.0)
    out = bdot(h, w2b) + b2f                           # last_weight already folded
    full_features = jnp.tile(x, (1, num_classes))
    w3 = (full_features * out).reshape(-1, num_classes, input_size)
    logits = w3.sum(axis=2) + lb
    probs = jax.nn.softmax(logits, axis=1)
    return probs, w3


if __name__ == "__main__":
    key = jax.random.PRNGKey(0)
    kp, kx = jax.random.split(key)
    params = init_params(kp, INPUT_SIZE, HIDDEN_SIZES, NUM_CLASSES)
    prepared = prepare_params(params)
    x = jax.random.normal(kx, (BATCH, INPUT_SIZE), dtype=jnp.float32)

    probs, expw = iffnn_mulcls_forward(
        x, prepared, input_size=INPUT_SIZE, num_classes=NUM_CLASSES)
    jax.block_until_ready((probs, expw))

    ref_probs, ref_w3 = reference_forward(
        x, prepared, input_size=INPUT_SIZE, num_classes=NUM_CLASSES)

    # probs: bf16 MXU + approx-reciprocal softmax -> loose tolerances
    # (approx reciprocal means rows sum to 1 only to ~2^-12 relative error)
    assert jnp.allclose(probs, ref_probs, atol=2e-3, rtol=2e-2)

    # explanation weights: gather reference w3 at the class the kernel chose
    # (robust to near-tie argmax differences between f32 reduction orders)
    cls = jnp.argmax(probs, axis=1)
    ref_expw = jnp.take_along_axis(ref_w3, cls[:, None, None], axis=1)[:, 0, :]
    assert jnp.allclose(expw, ref_expw, atol=1e-3, rtol=1e-2)

    print("KERNEL_OK")
</pallas_src>

<mosaic_0001>
module attributes {stable_mosaic.version = 11 : i64} {
  func.func @kernel(%arg0: i32, %arg1: memref<128x128xf32, #tpu.memory_space<vmem>>, %arg2: memref<128x128xbf16, #tpu.memory_space<vmem>>, %arg3: memref<1x128xf32, #tpu.memory_space<vmem>>, %arg4: memref<128x128xbf16, #tpu.memory_space<vmem>>, %arg5: memref<1x128xf32, #tpu.memory_space<vmem>>, %arg6: memref<128x1024xbf16, #tpu.memory_space<vmem>>, %arg7: memref<1x1024xf32, #tpu.memory_space<vmem>>, %arg8: memref<1x8xf32, #tpu.memory_space<vmem>>, %arg9: memref<128x8xf32, #tpu.memory_space<vmem>>, %arg10: memref<128x128xf32, #tpu.memory_space<vmem>>) attributes {dimension_semantics = [#tpu.dimension_semantics<parallel>], iteration_bounds = array<i64: 2>, scalar_prefetch = 0 : i64, scratch_operands = 0 : i64, tpu.core_type = #tpu.core_type<tc>, window_params = [{transform_indices = @transform_0, window_bounds = array<i64: 128, 128>}, {pipeline_mode = #tpu.pipeline_mode<synchronous>, transform_indices = @transform_1, window_bounds = array<i64: 128, 128>}, {pipeline_mode = #tpu.pipeline_mode<synchronous>, transform_indices = @transform_2, window_bounds = array<i64: 1, 128>}, {pipeline_mode = #tpu.pipeline_mode<synchronous>, transform_indices = @transform_3, window_bounds = array<i64: 128, 128>}, {pipeline_mode = #tpu.pipeline_mode<synchronous>, transform_indices = @transform_4, window_bounds = array<i64: 1, 128>}, {pipeline_mode = #tpu.pipeline_mode<synchronous>, transform_indices = @transform_5, window_bounds = array<i64: 128, 1024>}, {pipeline_mode = #tpu.pipeline_mode<synchronous>, transform_indices = @transform_6, window_bounds = array<i64: 1, 1024>}, {pipeline_mode = #tpu.pipeline_mode<synchronous>, transform_indices = @transform_7, window_bounds = array<i64: 1, 8>}, {transform_indices = @transform_8, window_bounds = array<i64: 128, 8>}, {transform_indices = @transform_9, window_bounds = array<i64: 128, 128>}]} {
    %c0 = arith.constant 0 : index
    %c0_0 = arith.constant 0 : index
    %0 = vector.load %arg1[%c0, %c0_0] : memref<128x128xf32, #tpu.memory_space<vmem>>, vector<128x128xf32>
    %1 = arith.truncf %0 : vector<128x128xf32> to vector<128x128xbf16>
    %c0_1 = arith.constant 0 : index
    %c0_2 = arith.constant 0 : index
    %2 = vector.load %arg2[%c0_1, %c0_2] : memref<128x128xbf16, #tpu.memory_space<vmem>>, vector<128x128xbf16>
    %cst = arith.constant dense<0.000000e+00> : vector<128x128xf32>
    %3 = tpu.matmul %1, %2, %cst {dimension_numbers = #tpu.dot_dimension_numbers<[1], [0], [0], [1], [0, 0, 1, 1], [], []>} : vector<128x128xbf16>, vector<128x128xbf16>, vector<128x128xf32> -> vector<128x128xf32>
    %c0_3 = arith.constant 0 : index
    %c0_4 = arith.constant 0 : index
    %4 = vector.load %arg3[%c0_3, %c0_4] : memref<1x128xf32, #tpu.memory_space<vmem>>, vector<1x128xf32>
    %5 = vector.broadcast %4 : vector<1x128xf32> to vector<128x128xf32>
    %6 = arith.addf %3, %5 : vector<128x128xf32>
    %cst_5 = arith.constant 0.000000e+00 : f32
    %7 = vector.broadcast %cst_5 : f32 to vector<128x128xf32>
    %8 = arith.maximumf %6, %7 : vector<128x128xf32>
    %9 = arith.truncf %8 : vector<128x128xf32> to vector<128x128xbf16>
    %c0_6 = arith.constant 0 : index
    %c0_7 = arith.constant 0 : index
    %10 = vector.load %arg4[%c0_6, %c0_7] : memref<128x128xbf16, #tpu.memory_space<vmem>>, vector<128x128xbf16>
    %cst_8 = arith.constant dense<0.000000e+00> : vector<128x128xf32>
    %11 = tpu.matmul %9, %10, %cst_8 {dimension_numbers = #tpu.dot_dimension_numbers<[1], [0], [0], [1], [0, 0, 1, 1], [], []>} : vector<128x128xbf16>, vector<128x128xbf16>, vector<128x128xf32> -> vector<128x128xf32>
    %c0_9 = arith.constant 0 : index
    %c0_10 = arith.constant 0 : index
    %12 = vector.load %arg5[%c0_9, %c0_10] : memref<1x128xf32, #tpu.memory_space<vmem>>, vector<1x128xf32>
    %13 = vector.broadcast %12 : vector<1x128xf32> to vector<128x128xf32>
    %14 = arith.addf %11, %13 : vector<128x128xf32>
    %cst_11 = arith.constant 0.000000e+00 : f32
    %15 = vector.broadcast %cst_11 : f32 to vector<128x128xf32>
    %16 = arith.maximumf %14, %15 : vector<128x128xf32>
    %17 = arith.truncf %16 : vector<128x128xf32> to vector<128x128xbf16>
    %c0_12 = arith.constant 0 : index
    %c0_13 = arith.constant 0 : index
    %18 = vector.load %arg6[%c0_12, %c0_13] : memref<128x1024xbf16, #tpu.memory_space<vmem>>, vector<128x1024xbf16>
    %cst_14 = arith.constant dense<0.000000e+00> : vector<128x1024xf32>
    %19 = tpu.matmul %17, %18, %cst_14 {dimension_numbers = #tpu.dot_dimension_numbers<[1], [0], [0], [1], [0, 0, 1, 1], [], []>} : vector<128x128xbf16>, vector<128x1024xbf16>, vector<128x1024xf32> -> vector<128x1024xf32>
    %c0_15 = arith.constant 0 : index
    %c0_16 = arith.constant 0 : index
    %20 = vector.load %arg7[%c0_15, %c0_16] : memref<1x1024xf32, #tpu.memory_space<vmem>>, vector<1x1024xf32>
    %21 = vector.broadcast %20 : vector<1x1024xf32> to vector<128x1024xf32>
    %22 = arith.addf %19, %21 : vector<128x1024xf32>
    %23 = tpu.iota {dimensions = array<i32: 1>} : vector<128x8xi32>
    %cst_17 = arith.constant 0.000000e+00 : f32
    %24 = vector.broadcast %cst_17 : f32 to vector<128x8xf32>
    %25 = vector.extract_strided_slice %22 {offsets = [0, 0], sizes = [128, 128], strides = [1, 1]} : vector<128x1024xf32> to vector<128x128xf32>
    %26 = arith.mulf %25, %0 : vector<128x128xf32>
    %cst_18 = arith.constant dense<0.000000e+00> : vector<128xf32>
    %27 = vector.multi_reduction <add>, %26, %cst_18 [1] : vector<128x128xf32> to vector<128xf32>
    %28 = vector.shape_cast %27 : vector<128xf32> to vector<128x1xf32>
    %c0_i32 = arith.constant 0 : i32
    %29 = vector.broadcast %c0_i32 : i32 to vector<128x8xi32>
    %30 = arith.cmpi eq, %23, %29 : vector<128x8xi32>
    %cst_19 = arith.constant 0.000000e+00 : f32
    %31 = vector.shape_cast %28 : vector<128x1xf32> to vector<128x1xf32>
    %32 = vector.broadcast %31 : vector<128x1xf32> to vector<128x8xf32>
    %33 = vector.broadcast %cst_19 : f32 to vector<128x8xf32>
    %34 = arith.select %30, %32, %33 : vector<128x8xi1>, vector<128x8xf32>
    %35 = arith.addf %24, %34 : vector<128x8xf32>
    %36 = vector.extract_strided_slice %22 {offsets = [0, 128], sizes = [128, 128], strides = [1, 1]} : vector<128x1024xf32> to vector<128x128xf32>
    %37 = arith.mulf %36, %0 : vector<128x128xf32>
    %cst_20 = arith.constant dense<0.000000e+00> : vector<128xf32>
    %38 = vector.multi_reduction <add>, %37, %cst_20 [1] : vector<128x128xf32> to vector<128xf32>
    %39 = vector.shape_cast %38 : vector<128xf32> to vector<128x1xf32>
    %c1_i32 = arith.constant 1 : i32
    %40 = vector.broadcast %c1_i32 : i32 to vector<128x8xi32>
    %41 = arith.cmpi eq, %23, %40 : vector<128x8xi32>
    %cst_21 = arith.constant 0.000000e+00 : f32
    %42 = vector.shape_cast %39 : vector<128x1xf32> to vector<128x1xf32>
    %43 = vector.broadcast %42 : vector<128x1xf32> to vector<128x8xf32>
    %44 = vector.broadcast %cst_21 : f32 to vector<128x8xf32>
    %45 = arith.select %41, %43, %44 : vector<128x8xi1>, vector<128x8xf32>
    %46 = arith.addf %35, %45 : vector<128x8xf32>
    %47 = vector.extract_strided_slice %22 {offsets = [0, 256], sizes = [128, 128], strides = [1, 1]} : vector<128x1024xf32> to vector<128x128xf32>
    %48 = arith.mulf %47, %0 : vector<128x128xf32>
    %cst_22 = arith.constant dense<0.000000e+00> : vector<128xf32>
    %49 = vector.multi_reduction <add>, %48, %cst_22 [1] : vector<128x128xf32> to vector<128xf32>
    %50 = vector.shape_cast %49 : vector<128xf32> to vector<128x1xf32>
    %c2_i32 = arith.constant 2 : i32
    %51 = vector.broadcast %c2_i32 : i32 to vector<128x8xi32>
    %52 = arith.cmpi eq, %23, %51 : vector<128x8xi32>
    %cst_23 = arith.constant 0.000000e+00 : f32
    %53 = vector.shape_cast %50 : vector<128x1xf32> to vector<128x1xf32>
    %54 = vector.broadcast %53 : vector<128x1xf32> to vector<128x8xf32>
    %55 = vector.broadcast %cst_23 : f32 to vector<128x8xf32>
    %56 = arith.select %52, %54, %55 : vector<128x8xi1>, vector<128x8xf32>
    %57 = arith.addf %46, %56 : vector<128x8xf32>
    %58 = vector.extract_strided_slice %22 {offsets = [0, 384], sizes = [128, 128], strides = [1, 1]} : vector<128x1024xf32> to vector<128x128xf32>
    %59 = arith.mulf %58, %0 : vector<128x128xf32>
    %cst_24 = arith.constant dense<0.000000e+00> : vector<128xf32>
    %60 = vector.multi_reduction <add>, %59, %cst_24 [1] : vector<128x128xf32> to vector<128xf32>
    %61 = vector.shape_cast %60 : vector<128xf32> to vector<128x1xf32>
    %c3_i32 = arith.constant 3 : i32
    %62 = vector.broadcast %c3_i32 : i32 to vector<128x8xi32>
    %63 = arith.cmpi eq, %23, %62 : vector<128x8xi32>
    %cst_25 = arith.constant 0.000000e+00 : f32
    %64 = vector.shape_cast %61 : vector<128x1xf32> to vector<128x1xf32>
    %65 = vector.broadcast %64 : vector<128x1xf32> to vector<128x8xf32>
    %66 = vector.broadcast %cst_25 : f32 to vector<128x8xf32>
    %67 = arith.select %63, %65, %66 : vector<128x8xi1>, vector<128x8xf32>
    %68 = arith.addf %57, %67 : vector<128x8xf32>
    %69 = vector.extract_strided_slice %22 {offsets = [0, 512], sizes = [128, 128], strides = [1, 1]} : vector<128x1024xf32> to vector<128x128xf32>
    %70 = arith.mulf %69, %0 : vector<128x128xf32>
    %cst_26 = arith.constant dense<0.000000e+00> : vector<128xf32>
    %71 = vector.multi_reduction <add>, %70, %cst_26 [1] : vector<128x128xf32> to vector<128xf32>
    %72 = vector.shape_cast %71 : vector<128xf32> to vector<128x1xf32>
    %c4_i32 = arith.constant 4 : i32
    %73 = vector.broadcast %c4_i32 : i32 to vector<128x8xi32>
    %74 = arith.cmpi eq, %23, %73 : vector<128x8xi32>
    %cst_27 = arith.constant 0.000000e+00 : f32
    %75 = vector.shape_cast %72 : vector<128x1xf32> to vector<128x1xf32>
    %76 = vector.broadcast %75 : vector<128x1xf32> to vector<128x8xf32>
    %77 = vector.broadcast %cst_27 : f32 to vector<128x8xf32>
    %78 = arith.select %74, %76, %77 : vector<128x8xi1>, vector<128x8xf32>
    %79 = arith.addf %68, %78 : vector<128x8xf32>
    %80 = vector.extract_strided_slice %22 {offsets = [0, 640], sizes = [128, 128], strides = [1, 1]} : vector<128x1024xf32> to vector<128x128xf32>
    %81 = arith.mulf %80, %0 : vector<128x128xf32>
    %cst_28 = arith.constant dense<0.000000e+00> : vector<128xf32>
    %82 = vector.multi_reduction <add>, %81, %cst_28 [1] : vector<128x128xf32> to vector<128xf32>
    %83 = vector.shape_cast %82 : vector<128xf32> to vector<128x1xf32>
    %c5_i32 = arith.constant 5 : i32
    %84 = vector.broadcast %c5_i32 : i32 to vector<128x8xi32>
    %85 = arith.cmpi eq, %23, %84 : vector<128x8xi32>
    %cst_29 = arith.constant 0.000000e+00 : f32
    %86 = vector.shape_cast %83 : vector<128x1xf32> to vector<128x1xf32>
    %87 = vector.broadcast %86 : vector<128x1xf32> to vector<128x8xf32>
    %88 = vector.broadcast %cst_29 : f32 to vector<128x8xf32>
    %89 = arith.select %85, %87, %88 : vector<128x8xi1>, vector<128x8xf32>
    %90 = arith.addf %79, %89 : vector<128x8xf32>
    %91 = vector.extract_strided_slice %22 {offsets = [0, 768], sizes = [128, 128], strides = [1, 1]} : vector<128x1024xf32> to vector<128x128xf32>
    %92 = arith.mulf %91, %0 : vector<128x128xf32>
    %cst_30 = arith.constant dense<0.000000e+00> : vector<128xf32>
    %93 = vector.multi_reduction <add>, %92, %cst_30 [1] : vector<128x128xf32> to vector<128xf32>
    %94 = vector.shape_cast %93 : vector<128xf32> to vector<128x1xf32>
    %c6_i32 = arith.constant 6 : i32
    %95 = vector.broadcast %c6_i32 : i32 to vector<128x8xi32>
    %96 = arith.cmpi eq, %23, %95 : vector<128x8xi32>
    %cst_31 = arith.constant 0.000000e+00 : f32
    %97 = vector.shape_cast %94 : vector<128x1xf32> to vector<128x1xf32>
    %98 = vector.broadcast %97 : vector<128x1xf32> to vector<128x8xf32>
    %99 = vector.broadcast %cst_31 : f32 to vector<128x8xf32>
    %100 = arith.select %96, %98, %99 : vector<128x8xi1>, vector<128x8xf32>
    %101 = arith.addf %90, %100 : vector<128x8xf32>
    %102 = vector.extract_strided_slice %22 {offsets = [0, 896], sizes = [128, 128], strides = [1, 1]} : vector<128x1024xf32> to vector<128x128xf32>
    %103 = arith.mulf %102, %0 : vector<128x128xf32>
    %cst_32 = arith.constant dense<0.000000e+00> : vector<128xf32>
    %104 = vector.multi_reduction <add>, %103, %cst_32 [1] : vector<128x128xf32> to vector<128xf32>
    %105 = vector.shape_cast %104 : vector<128xf32> to vector<128x1xf32>
    %c7_i32 = arith.constant 7 : i32
    %106 = vector.broadcast %c7_i32 : i32 to vector<128x8xi32>
    %107 = arith.cmpi eq, %23, %106 : vector<128x8xi32>
    %cst_33 = arith.constant 0.000000e+00 : f32
    %108 = vector.shape_cast %105 : vector<128x1xf32> to vector<128x1xf32>
    %109 = vector.broadcast %108 : vector<128x1xf32> to vector<128x8xf32>
    %110 = vector.broadcast %cst_33 : f32 to vector<128x8xf32>
    %111 = arith.select %107, %109, %110 : vector<128x8xi1>, vector<128x8xf32>
    %112 = arith.addf %101, %111 : vector<128x8xf32>
    %c0_34 = arith.constant 0 : index
    %c0_35 = arith.constant 0 : index
    %113 = vector.load %arg8[%c0_34, %c0_35] : memref<1x8xf32, #tpu.memory_space<vmem>>, vector<1x8xf32>
    %114 = vector.broadcast %113 : vector<1x8xf32> to vector<128x8xf32>
    %115 = arith.addf %112, %114 : vector<128x8xf32>
    %cst_36 = arith.constant dense<0xFF800000> : vector<128xf32>
    %116 = vector.multi_reduction <maximumf>, %115, %cst_36 [1] : vector<128x8xf32> to vector<128xf32>
    %117 = vector.shape_cast %116 : vector<128xf32> to vector<128x1xf32>
    %118 = vector.broadcast %117 : vector<128x1xf32> to vector<128x8xf32>
    %119 = arith.subf %115, %118 : vector<128x8xf32>
    %120 = math.exp %119 : vector<128x8xf32>
    %cst_37 = arith.constant dense<0.000000e+00> : vector<128xf32>
    %121 = vector.multi_reduction <add>, %120, %cst_37 [1] : vector<128x8xf32> to vector<128xf32>
    %122 = vector.shape_cast %121 : vector<128xf32> to vector<128x1xf32>
    %123 = tpu.reciprocal %122 {approx = true} : vector<128x1xf32> -> vector<128x1xf32>
    %124 = vector.broadcast %123 : vector<128x1xf32> to vector<128x8xf32>
    %125 = arith.mulf %120, %124 : vector<128x8xf32>
    %c0_38 = arith.constant 0 : index
    %c0_39 = arith.constant 0 : index
    %126 = vector.load %arg9[%c0_38, %c0_39] : memref<128x8xf32, #tpu.memory_space<vmem>>, vector<128x8xf32>
    tpu.vector_store %arg9[%c0_38, %c0_39], %125 {strides = array<i32>} : memref<128x8xf32, #tpu.memory_space<vmem>>, vector<128x8xf32>,
    %127 = vector.broadcast %117 : vector<128x1xf32> to vector<128x8xf32>
    %128 = arith.cmpf oeq, %115, %127 : vector<128x8xf32>
    %c8_i32 = arith.constant 8 : i32
    %129 = vector.broadcast %c8_i32 : i32 to vector<128x8xi32>
    %130 = arith.select %128, %23, %129 : vector<128x8xi1>, vector<128x8xi32>
    %cst_40 = arith.constant dense<2147483647> : vector<128xi32>
    %131 = vector.multi_reduction <minsi>, %130, %cst_40 [1] : vector<128x8xi32> to vector<128xi32>
    %132 = vector.shape_cast %131 : vector<128xi32> to vector<128x1xi32>
    %cst_41 = arith.constant 0.000000e+00 : f32
    %133 = vector.broadcast %cst_41 : f32 to vector<128x128xf32>
    %c0_i32_42 = arith.constant 0 : i32
    %134 = vector.broadcast %c0_i32_42 : i32 to vector<128x1xi32>
    %135 = arith.cmpi eq, %132, %134 : vector<128x1xi32>
    %136 = arith.extui %135 : vector<128x1xi1> to vector<128x1xi32>
    %137 = arith.sitofp %136 : vector<128x1xi32> to vector<128x1xf32>
    %138 = vector.extract_strided_slice %22 {offsets = [0, 0], sizes = [128, 128], strides = [1, 1]} : vector<128x1024xf32> to vector<128x128xf32>
    %139 = arith.mulf %138, %0 : vector<128x128xf32>
    %140 = vector.broadcast %137 : vector<128x1xf32> to vector<128x128xf32>
    %141 = arith.mulf %140, %139 : vector<128x128xf32>
    %142 = arith.addf %133, %141 : vector<128x128xf32>
    %c1_i32_43 = arith.constant 1 : i32
    %143 = vector.broadcast %c1_i32_43 : i32 to vector<128x1xi32>
    %144 = arith.cmpi eq, %132, %143 : vector<128x1xi32>
    %145 = arith.extui %144 : vector<128x1xi1> to vector<128x1xi32>
    %146 = arith.sitofp %145 : vector<128x1xi32> to vector<128x1xf32>
    %147 = vector.extract_strided_slice %22 {offsets = [0, 128], sizes = [128, 128], strides = [1, 1]} : vector<128x1024xf32> to vector<128x128xf32>
    %148 = arith.mulf %147, %0 : vector<128x128xf32>
    %149 = vector.broadcast %146 : vector<128x1xf32> to vector<128x128xf32>
    %150 = arith.mulf %149, %148 : vector<128x128xf32>
    %151 = arith.addf %142, %150 : vector<128x128xf32>
    %c2_i32_44 = arith.constant 2 : i32
    %152 = vector.broadcast %c2_i32_44 : i32 to vector<128x1xi32>
    %153 = arith.cmpi eq, %132, %152 : vector<128x1xi32>
    %154 = arith.extui %153 : vector<128x1xi1> to vector<128x1xi32>
    %155 = arith.sitofp %154 : vector<128x1xi32> to vector<128x1xf32>
    %156 = vector.extract_strided_slice %22 {offsets = [0, 256], sizes = [128, 128], strides = [1, 1]} : vector<128x1024xf32> to vector<128x128xf32>
    %157 = arith.mulf %156, %0 : vector<128x128xf32>
    %158 = vector.broadcast %155 : vector<128x1xf32> to vector<128x128xf32>
    %159 = arith.mulf %158, %157 : vector<128x128xf32>
    %160 = arith.addf %151, %159 : vector<128x128xf32>
    %c3_i32_45 = arith.constant 3 : i32
    %161 = vector.broadcast %c3_i32_45 : i32 to vector<128x1xi32>
    %162 = arith.cmpi eq, %132, %161 : vector<128x1xi32>
    %163 = arith.extui %162 : vector<128x1xi1> to vector<128x1xi32>
    %164 = arith.sitofp %163 : vector<128x1xi32> to vector<128x1xf32>
    %165 = vector.extract_strided_slice %22 {offsets = [0, 384], sizes = [128, 128], strides = [1, 1]} : vector<128x1024xf32> to vector<128x128xf32>
    %166 = arith.mulf %165, %0 : vector<128x128xf32>
    %167 = vector.broadcast %164 : vector<128x1xf32> to vector<128x128xf32>
    %168 = arith.mulf %167, %166 : vector<128x128xf32>
    %169 = arith.addf %160, %168 : vector<128x128xf32>
    %c4_i32_46 = arith.constant 4 : i32
    %170 = vector.broadcast %c4_i32_46 : i32 to vector<128x1xi32>
    %171 = arith.cmpi eq, %132, %170 : vector<128x1xi32>
    %172 = arith.extui %171 : vector<128x1xi1> to vector<128x1xi32>
    %173 = arith.sitofp %172 : vector<128x1xi32> to vector<128x1xf32>
    %174 = vector.extract_strided_slice %22 {offsets = [0, 512], sizes = [128, 128], strides = [1, 1]} : vector<128x1024xf32> to vector<128x128xf32>
    %175 = arith.mulf %174, %0 : vector<128x128xf32>
    %176 = vector.broadcast %173 : vector<128x1xf32> to vector<128x128xf32>
    %177 = arith.mulf %176, %175 : vector<128x128xf32>
    %178 = arith.addf %169, %177 : vector<128x128xf32>
    %c5_i32_47 = arith.constant 5 : i32
    %179 = vector.broadcast %c5_i32_47 : i32 to vector<128x1xi32>
    %180 = arith.cmpi eq, %132, %179 : vector<128x1xi32>
    %181 = arith.extui %180 : vector<128x1xi1> to vector<128x1xi32>
    %182 = arith.sitofp %181 : vector<128x1xi32> to vector<128x1xf32>
    %183 = vector.extract_strided_slice %22 {offsets = [0, 640], sizes = [128, 128], strides = [1, 1]} : vector<128x1024xf32> to vector<128x128xf32>
    %184 = arith.mulf %183, %0 : vector<128x128xf32>
    %185 = vector.broadcast %182 : vector<128x1xf32> to vector<128x128xf32>
    %186 = arith.mulf %185, %184 : vector<128x128xf32>
    %187 = arith.addf %178, %186 : vector<128x128xf32>
    %c6_i32_48 = arith.constant 6 : i32
    %188 = vector.broadcast %c6_i32_48 : i32 to vector<128x1xi32>
    %189 = arith.cmpi eq, %132, %188 : vector<128x1xi32>
    %190 = arith.extui %189 : vector<128x1xi1> to vector<128x1xi32>
    %191 = arith.sitofp %190 : vector<128x1xi32> to vector<128x1xf32>
    %192 = vector.extract_strided_slice %22 {offsets = [0, 768], sizes = [128, 128], strides = [1, 1]} : vector<128x1024xf32> to vector<128x128xf32>
    %193 = arith.mulf %192, %0 : vector<128x128xf32>
    %194 = vector.broadcast %191 : vector<128x1xf32> to vector<128x128xf32>
    %195 = arith.mulf %194, %193 : vector<128x128xf32>
    %196 = arith.addf %187, %195 : vector<128x128xf32>
    %c7_i32_49 = arith.constant 7 : i32
    %197 = vector.broadcast %c7_i32_49 : i32 to vector<128x1xi32>
    %198 = arith.cmpi eq, %132, %197 : vector<128x1xi32>
    %199 = arith.extui %198 : vector<128x1xi1> to vector<128x1xi32>
    %200 = arith.sitofp %199 : vector<128x1xi32> to vector<128x1xf32>
    %201 = vector.extract_strided_slice %22 {offsets = [0, 896], sizes = [128, 128], strides = [1, 1]} : vector<128x1024xf32> to vector<128x128xf32>
    %202 = arith.mulf %201, %0 : vector<128x128xf32>
    %203 = vector.broadcast %200 : vector<128x1xf32> to vector<128x128xf32>
    %204 = arith.mulf %203, %202 : vector<128x128xf32>
    %205 = arith.addf %196, %204 : vector<128x128xf32>
    %c0_50 = arith.constant 0 : index
    %c0_51 = arith.constant 0 : index
    %206 = vector.load %arg10[%c0_50, %c0_51] : memref<128x128xf32, #tpu.memory_space<vmem>>, vector<128x128xf32>
    tpu.vector_store %arg10[%c0_50, %c0_51], %205 {strides = array<i32>} : memref<128x128xf32, #tpu.memory_space<vmem>>, vector<128x128xf32>,
    return
  }
  func.func @transform_0(%arg0: i32) -> (i32, i32) {
    %c0_i32 = arith.constant 0 : i32
    %c0_i32_0 = arith.constant 0 : i32
    return %arg0, %c0_i32 : i32, i32
  }
  func.func @transform_1(%arg0: i32) -> (i32, i32) {
    %c0_i32 = arith.constant 0 : i32
    %c0_i32_0 = arith.constant 0 : i32
    %c0_i32_1 = arith.constant 0 : i32
    return %c0_i32, %c0_i32_0 : i32, i32
  }
  func.func @transform_2(%arg0: i32) -> (i32, i32) {
    %c0_i32 = arith.constant 0 : i32
    %c0_i32_0 = arith.constant 0 : i32
    %c0_i32_1 = arith.constant 0 : i32
    return %c0_i32, %c0_i32_0 : i32, i32
  }
  func.func @transform_3(%arg0: i32) -> (i32, i32) {
    %c0_i32 = arith.constant 0 : i32
    %c0_i32_0 = arith.constant 0 : i32
    %c0_i32_1 = arith.constant 0 : i32
    return %c0_i32, %c0_i32_0 : i32, i32
  }
  func.func @transform_4(%arg0: i32) -> (i32, i32) {
    %c0_i32 = arith.constant 0 : i32
    %c0_i32_0 = arith.constant 0 : i32
    %c0_i32_1 = arith.constant 0 : i32
    return %c0_i32, %c0_i32_0 : i32, i32
  }
  func.func @transform_5(%arg0: i32) -> (i32, i32) {
    %c0_i32 = arith.constant 0 : i32
    %c0_i32_0 = arith.constant 0 : i32
    %c0_i32_1 = arith.constant 0 : i32
    return %c0_i32, %c0_i32_0 : i32, i32
  }
  func.func @transform_6(%arg0: i32) -> (i32, i32) {
    %c0_i32 = arith.constant 0 : i32
    %c0_i32_0 = arith.constant 0 : i32
    %c0_i32_1 = arith.constant 0 : i32
    return %c0_i32, %c0_i32_0 : i32, i32
  }
  func.func @transform_7(%arg0: i32) -> (i32, i32) {
    %c0_i32 = arith.constant 0 : i32
    %c0_i32_0 = arith.constant 0 : i32
    %c0_i32_1 = arith.constant 0 : i32
    return %c0_i32, %c0_i32_0 : i32, i32
  }
  func.func @transform_8(%arg0: i32) -> (i32, i32) {
    %c0_i32 = arith.constant 0 : i32
    %c0_i32_0 = arith.constant 0 : i32
    return %arg0, %c0_i32 : i32, i32
  }
  func.func @transform_9(%arg0: i32) -> (i32, i32) {
    %c0_i32 = arith.constant 0 : i32
    %c0_i32_0 = arith.constant 0 : i32
    return %arg0, %c0_i32 : i32, i32
  }
}

</mosaic_0001>

<bundles_post_ra>
// kernel: tpu_custom_call.1
= control target key start
LH: loop header
LB: loop body
LE: loop exit
PB: predicated region body
PF: predicated region fallthrough
CT: control target
= control target key end

     0   :  { %s6813_s0 = inlined_call_operand.hbm [shape: f32[256,128], index: 0, kind: input, shape index: {}]   ;;  %s6814_s1 = inlined_call_operand.hbm [shape: bf16[128,128], index: 1, kind: input, shape index: {}]   ;;  %s6815_s2 = inlined_call_operand.vmem [shape: f32[1,128], index: 2, kind: input, shape index: {}]   ;;  %s6816_s3 = inlined_call_operand.hbm [shape: bf16[128,128], index: 3, kind: input, shape index: {}]   ;;  %s6817_s4 = inlined_call_operand.vmem [shape: f32[1,128], index: 4, kind: input, shape index: {}]   ;;  %s6818_s5 = inlined_call_operand.hbm [shape: bf16[128,1024], index: 5, kind: input, shape index: {}]   ;;  %s6819_s6 = inlined_call_operand.hbm [shape: f32[1,1024], index: 6, kind: input, shape index: {}]   ;;  %s6820_s7 = inlined_call_operand.vmem [shape: f32[1,8], index: 7, kind: input, shape index: {}]   ;;  %s6821_s8 = inlined_call_operand.vmem [shape: f32[256,8], index: 8, kind: output, shape index: {0}]   ;;  %s6822_s9 = inlined_call_operand.hbm [shape: f32[256,128], index: 9, kind: output, shape index: {1}]  }
   0x1   :  { %6946 = sst [smem:[#allocation155_spill]] %s6814_s1 }
   0x2   :  { %6947 = sst [smem:[#allocation156_spill]] %s6816_s3 }
   0x3   :  { %6948 = sst [smem:[#allocation157_spill]] %s6818_s5 }
   0x4   :  { %15 = vsyncpa [#allocation3], 0 }
   0x5   :  { %17 = vsyncpa [#allocation3 + $0x1], 0 }
   0x6   :  { %18 = vsyncpa [#allocation6], 0 }
   0x7   :  { %19 = vsyncpa [#allocation9], 0 }
   0x8   :  { %20 = vsyncpa [#allocation4], 0 }
   0x9   :  { %22 = vsyncpa [#allocation4 + $0x1], 0  ;;  %s4523_s30 = smov 0   ;;  %s4525_s10 = smov 0  }
   0xa   :  { %s4527_s11 = smov 0   ;;  %s4529_s12 = smov 0  }
   0xb LB: > { %s4544_s13 = sadd.s32 4294967295, %s4458_s12   ;;  %s3485_s14 = sadd.s32 4294967294, %s4458_s12   ;;  %s4458_s12 = sphi %s4529_s12, %s7240_s12   ;;  %s4454_s11 = sphi %s4527_s11, %s7239_s11   ;;  %s4450_s10 = sphi %s4525_s10, %s7238_s10   ;;  %s4446_s30 = sphi %s4523_s30, %s7237_s30  }
   0xc   : > { %p48_p0 = scmp.ne.s32.totalorder %s4450_s10, %s4446_s30  ;;  %p49_p1 = scmp.eq.s32.totalorder %s4544_s13, 0 }
   0xd   : > { %p245_p2 = scmp.eq.s32.totalorder %s4544_s13, 1  ;;  %p251_p3 = scmp.eq.s32.totalorder %s3485_s14, 1 }
   0xe   : > { %p4553_p4 = por %p49_p1, %p48_p0  ;;  %p3486_p5 = scmp.ge.s32.totalorder %s4458_s12, 1 }
   0xf   : > { %p4558_p6 = por %p251_p3, %p48_p0  ;;  %p258_p7 = scmp.lt.s32.totalorder %s4458_s12, 3 }
  0x10   : > { %s6951_s1 = sld [smem:[#allocation155_spill]]  ;;  %s4460_s21 = smov [#allocation5]  }
  0x11   : > { %p4566_p8 = pnand %p3486_p5, %p258_p7  ;;  %s271_s22 = sshll.u32 %s4460_s21, 4  ;;  %s272_s22 = int_to_ptr.vmem [resolvable:$true] %s271_s22 }
  0x12   : > { %s6954_s5 = sld [smem:[#allocation157_spill]]  ;;  %s4461_s27 = smov 64  }
  0x13   : > { %p4075_p9 = pneg %p4566_p8  ;;  %s4462_s28 = smov 4  }
  0x14   : > { %s4463_s29 = smov [#allocation8]   ;;  %s4464_s17 = smov 512  }
  0x15   : > { %p4574_p10 = pnand %p4075_p9, %p49_p1  ;;  %s305_s14 = sshll.u32 %s4463_s29, 4  ;;  %s306_s14 = int_to_ptr.vmem [resolvable:$true] %s305_s14 }
  0x16   : > { %s269_s19 = sshll.u32 %s6951_s1, 4  ;;  %s4465_s18 = smov 32   ;;  %s270_s19 = int_to_ptr.hbm [resolvable:$true] %s269_s19 }
  0x17   : > { %4078 = dma.hbm_to_vmem [thread:$0]  (!%p4574_p10), %s270_s19, 1024, %s272_s22, [#allocation6], %s4461_s27, %s4461_s27, %s4462_s28  }
  0x18   : > { %s303_s26 = sshll.u32 %s6954_s5, 4  ;;  %s6955_s3 = sld [smem:[#allocation156_spill]]  ;;  %s304_s26 = int_to_ptr.hbm [resolvable:$true] %s303_s26 }
  0x19   : > { %4084 = dma.hbm_to_vmem [thread:$0]  (!%p4574_p10), %s304_s26, 8192, %s306_s14, [#allocation9], %s4464_s17, %s4464_s17, %s4465_s18  }
  0x1a   : > { %s4466_s19 = smov [#allocation7]   ;;  %s318_s5 = sshll.u32 %s6819_s6, 4  ;;  %s319_s5 = int_to_ptr.hbm [resolvable:$true] %s318_s5 }
  0x1b   : > { %s288_s22 = sshll.u32 %s4466_s19, 4  ;;  %s4467_s26 = smov [#allocation10]   ;;  %s289_s22 = int_to_ptr.vmem [resolvable:$true] %s288_s22 }
  0x1c   : > { %s320_s14 = sshll.u32 %s4467_s26, 4  ;;  %s4597_s17 = sadd.s32 1, %s4458_s12   ;;  %s321_s14 = int_to_ptr.vmem [resolvable:$true] %s320_s14 }
  0x1d   : > { %4087 = dma.hbm_to_vmem [thread:$0]  (!%p4574_p10), %s319_s5, 128, %s321_s14, [#allocation9]  }
  0x1e   : > { %s286_s25 = sshll.u32 %s6955_s3, 4  ;;  %s35_s18 = sadd.s32 1, %s4454_s11  ;;  %s287_s25 = int_to_ptr.hbm [resolvable:$true] %s286_s25 }
  0x1f   : > { %4081 = dma.hbm_to_vmem [thread:$0]  (!%p4574_p10), %s287_s25, 1024, %s289_s22, [#allocation6], %s4461_s27, %s4461_s27, %s4462_s28  }
  0x20   : > { %s32_s21 = ssub.s32 %s4458_s12, %s4597_s17  ;;  %p42_p12 = scmp.ne.s32.totalorder %s4454_s11, %s4450_s10 }
  0x21   : > { %p33_p13 = scmp.eq.s32.totalorder %s32_s21, 0  ;;  %p43_p0 = scmp.eq.s32.totalorder %s4458_s12, 0 }
  0x22   : > { %p4607_p3 = por %p245_p2, %p42_p12  ;;  %p4100_p5 = scmp.lt.s32.totalorder %s4458_s12, 2 }
  0x23   : > { %s4613_s27 = scalar_select %p33_p13, %s4454_s11, %s35_s18  }
  0x24   : > { %p44_p7 = por %p43_p0, %p42_p12  ;;  %s334_s28 = sand.u32 1, %s4454_s11  }
  0x25   : > { %s3492_s23 = sshll.u32 %s334_s28, 7  ;;  %s3957_s5 = sshll.u32 %s4458_s12, 7 }
  0x26   : > { %s343_s19 = scalar_lea.hbm %s6813_s0, %s3957_s5  ;;  %s338_s22 = scalar_lea.vmem [#allocation2], %s3492_s23 }
  0x27   : > { %s346_s29 = sshll.u32 %s338_s22, 4  ;;  %s344_s26 = sshll.u32 %s343_s19, 4  ;;  %s347_s29 = int_to_ptr.vmem [resolvable:$true] %s346_s29  ;;  %s345_s26 = int_to_ptr.hbm [resolvable:$true] %s344_s26 }
  0x28   : > { %p4620_p2 = pnand %p4100_p5, %p44_p7  ;;  %s335_s18 = scalar_lea.sflag [#allocation3], %s334_s28 }
  0x29   : > { %s4354_s21 = sshra.s32 %s345_s26, 4  ;;  %s4361_s24 = scalar_lea.hbm %s6813_s0, 256  ;;  %s4355_s21 = int_to_ptr.hbm [resolvable:$true] %s4354_s21 }
  0x2a   : > { %s4356_s3 = scalar_lea.hbm %s4355_s21, 128  ;;  %p4358_p10 = pneg %p4620_p2 }
  0x2b   : > { %p4357_p9 = scmp.ne.s32.totalorder %s4355_s21, %s4356_s3  ;;  %p4362_p0 = scmp.lt.s32.totalorder %s4355_s21, %s6813_s0 }
  0x2c   : > { %p4363_p5 = scmp.lt.s32.totalorder %s4361_s24, %s4356_s3 }
  0x2d   : > { %p4359_p12 = pnand %p4358_p10, %p4357_p9 }
  0x2e   : > { %p4364_p7 = por %p4363_p5, %p4362_p0 }
  0x2f   : > { %p4360_p13 = pneg %p4359_p12 }
  0x31   : > { %p4365_p11 = pnand %p4364_p7, %p4360_p13 }
  0x33   : > { %4368 = shalt.err (!%p4365_p11)
}
  0x34   : > { %s4468_s28 = smov 128   ;;  %s4469_s22 = smov 8  }
  0x35   : > { %4091 = dma.hbm_to_vmem [thread:$0]  (!%p4620_p2), %s345_s26, 2048, %s347_s29, %s335_s18, %s4468_s28, %s4468_s28, %s4469_s22  }
  0x36   : > { %358 = sbr.rel (%p4566_p8) target bundleno = 1369 (0x559), region = 52 }
  0x3b   : > { %s4637_s5 = sand.u32 1, %s4450_s10  }
  0x3c   : > { %s3496_s21 = sshll.u32 %s4637_s5, 7  ;;  %s361_s3 = scalar_lea.sflag [#allocation3], %s4637_s5 }
  0x3d   : > { %s4643_s23 = scalar_lea.vmem [#allocation2], %s3496_s21 }
  0x3e   : > { %4429 = dma.done.wait (%p4553_p4), %s361_s3, 2048  }
  0x3f   : > { %4431 = vsyncadd (%p4553_p4), %s361_s3, 4294965248 }
  0x40   : > { %4433 = dma.done.wait (%p49_p1), [#allocation6], 2048  }
  0x41   : > { %4435 = vsyncadd (%p49_p1), [#allocation6], 4294965248 }
  0x42   : > { %4437 = dma.done.wait (%p49_p1), [#allocation9], 8320  }
  0x43   : > { %4439 = vsyncadd (%p49_p1), [#allocation9], 4294958976  ;;  %v3965_v0 = vld [vmem:[#allocation5 + $0x38] sm:$0xff]  ;;  %v3964_v1 = vld [vmem:[#allocation5 + $0x30] sm:$0xff]  ;;  %vm2203_vm8 = vcmask 64512   ;;  %s3502_s24 = sshll.u32 %s4544_s13, 4 }
  0x44   : > { %525 = vmatpush.bf16.msra.mxu0 %v3965_v0  ;;  %4039 = vmatpush.bf16.msra.mxu2 %v3965_v0  ;;  %v3963_v2 = vld [vmem:[#allocation5 + $0x28] sm:$0xff]  ;;  %v3962_v3 = vld [vmem:[#allocation5 + $0x20] sm:$0xff]  ;;  %v3961_v4 = vld [vmem:[#allocation5 + $0x18] sm:$0xff]  ;;  %p427_p1 = scmp.lt.s32.totalorder %s3502_s24, 31  ;;  %s6447_s3 = scalar_lea.vmem [#allocation11], %s3496_s21 }
  0x45   : > { %v3960_v5 = vld [vmem:[#allocation5 + $0x10] sm:$0xff]  ;;  %v3959_v6 = vld [vmem:[#allocation5 + $0x8] sm:$0xff]  ;;  %v3958_v7 = vld [vmem:[#allocation5] sm:$0xff]  ;;  %s4038_s21 = sshll.u32 %s4544_s13, 7  ;;  %s3346_s13 = sshll.u32 %s6447_s3, 4  ;;  %s3347_s13 = int_to_ptr.vmem [resolvable:$true] %s3346_s13 }
  0x46   : > { %v4658_v8 = vld [vmem:[%s4643_s23] sm:$0xff]  ;;  %v4661_v9 = vld [vmem:[%s4643_s23 + $0x8] sm:$0xff]  ;;  %v4666_v11 = vld [vmem:[%s4643_s23 + $0x10] sm:$0xff]  ;;  %s7242_s24 = smov (!%p427_p1, %s3502_s24), 31  ;;  %s3345_s20 = scalar_lea.hbm %s6822_s9, %s4038_s21 }
  0x47   : > { %v449_v10 = vpack.c.bf16 %v4661_v9, %v4658_v8  ;;  %v436_v12 = vld [vmem:[%s4643_s23 + $0x18] sm:$0xff]  ;;  %v441_v14 = vld [vmem:[%s4643_s23 + $0x40] sm:$0xff]  ;;  %v442_v15 = vld [vmem:[%s4643_s23 + $0x48] sm:$0xff]  ;;  %s3503_s25 = sshll.u32 %s7242_s24, 3  ;;  %s3348_s29 = sshll.u32 %s3345_s20, 4  ;;  %s3349_s29 = int_to_ptr.hbm [resolvable:$true] %s3348_s29 }
  0x48   : > { %526 = vmatpush.bf16.msra.mxu0 %v3964_v1  ;;  %4040 = vmatpush.bf16.msra.mxu2 %v3964_v1  ;;  %v450_v13 = vpack.c.bf16 %v436_v12, %v4666_v11  ;;  %v453_v16 = vpack.c.bf16 %v442_v15, %v441_v14  ;;  %v437_v17 = vld [vmem:[%s4643_s23 + $0x20] sm:$0xff]  ;;  %v438_v18 = vld [vmem:[%s4643_s23 + $0x28] sm:$0xff]  ;;  %v443_v20 = vld [vmem:[%s4643_s23 + $0x50] sm:$0xff]  ;;  %s6266_s22 = scalar_lea.vmem %s6821_s8, %s3503_s25  ;;  %s3330_s26 = scalar_lea.sflag [#allocation4], %s4637_s5 }
  0x49   : > { %v451_v19 = vpack.c.bf16 %v438_v18, %v437_v17  ;;  %v444_v21 = vld [vmem:[%s4643_s23 + $0x58] sm:$0xff]  ;;  %v3972_v24 = vld [vmem:[#allocation7 + $0x30] sm:$0xff]  ;;  %v3971_v27 = vld [vmem:[#allocation7 + $0x28] sm:$0xff]  ;;  %s4398_s14 = sshra.s32 %s3349_s29, 4  ;;  %s4404_s19 = scalar_lea.hbm %s6822_s9, 256  ;;  %s4399_s14 = int_to_ptr.hbm [resolvable:$true] %s4398_s14 }
  0x4a   : > { %v454_v22 = vpack.c.bf16 %v444_v21, %v443_v20  ;;  %v3973_v23 = vld [vmem:[#allocation7 + $0x38] sm:$0xff]  ;;  %v439_v25 = vld [vmem:[%s4643_s23 + $0x30] sm:$0xff]  ;;  %v445_v29 = vld [vmem:[%s4643_s23 + $0x60] sm:$0xff]  ;;  %s4400_s18 = scalar_lea.hbm %s4399_s14, 128  ;;  %p4405_p2 = scmp.lt.s32.totalorder %s4399_s14, %s6822_s9 }
  0x4b   : > { %666 = vmatpush.bf16.msra.mxu1 %v3973_v23  ;;  %4047 = vmatpush.bf16.msra.mxu3 %v3973_v23  ;;  %v440_v26 = vld [vmem:[%s4643_s23 + $0x38] sm:$0xff]  ;;  %v446_v30 = vld [vmem:[%s4643_s23 + $0x68] sm:$0xff]  ;;  %v3970_v31 = vld [vmem:[#allocation7 + $0x20] sm:$0xff]  ;;  %p4401_p4 = scmp.ne.s32.totalorder %s4399_s14, %s4400_s18  ;;  %p4406_p9 = scmp.lt.s32.totalorder %s4404_s19, %s4400_s18 }
  0x4c   : > { %527 = vmatpush.bf16.msra.mxu0 %v3963_v2  ;;  %4041 = vmatpush.bf16.msra.mxu2 %v3963_v2  ;;  %v452_v28 = vpack.c.bf16 %v440_v26, %v439_v25  ;;  %v455_v32 = vpack.c.bf16 %v446_v30, %v445_v29  ;;  %v447_v33 = vld [vmem:[%s4643_s23 + $0x70] sm:$0xff]  ;;  %v448_v34 = vld [vmem:[%s4643_s23 + $0x78] sm:$0xff]  ;;  %v3967_v38 = vld [vmem:[#allocation7 + $0x8] sm:$0xff] }
  0x4d   : > { %v456_v35 = vpack.c.bf16 %v448_v34, %v447_v33  ;;  %v3969_v36 = vld [vmem:[#allocation7 + $0x18] sm:$0xff]  ;;  %v3968_v37 = vld [vmem:[#allocation7 + $0x10] sm:$0xff]  ;;  %v3966_v39 = vld [vmem:[#allocation7] sm:$0xff]  ;;  %p4402_p8 = pnand %p4401_p4, %p4607_p3  ;;  %p4407_p10 = por %p4406_p9, %p4405_p2 }
  0x4e   : > { %v4685_v41 = vld [vmem:[%s6815_s2] ss:$0 sm:$0xff]  ;;  %v4030_v57 = vld [vmem:[#allocation8 + $0x1c4] sm:$0xf]  ;;  %v3802_v59 = vld [vmem:[#allocation8 + $0x1c8] sm:$0xf] }
  0x4f   : > { %667 = vmatpush.bf16.msra.mxu1 %v3972_v24  ;;  %4048 = vmatpush.bf16.msra.mxu3 %v3972_v24  ;;  %v3796_v58 = vld [vmem:[#allocation8 + $0x1e0] sm:$0xf0]  ;;  %v4035_v62 = vld [vmem:[#allocation8 + $0x1e4] sm:$0xf0]  ;;  %v4031_v63 = vld [vmem:[#allocation8 + $0x1cc] sm:$0xf]  ;;  %p4403_p11 = pneg %p4402_p8 }
  0x50   : > { %528 = vmatpush.bf16.msra.mxu0 %v3962_v3  ;;  %4042 = vmatpush.bf16.msra.mxu2 %v3962_v3  ;;  %v3799_v61 = vor.u32 %v4030_v57, %v3796_v58  ;;  %v3804_v0 = vld [vmem:[#allocation8 + $0x1e8] sm:$0xf0]  ;;  %v3803_v1 = vor.u32 %v4035_v62, %v3802_v59  ;;  %v4034_v12 = vld [vmem:[#allocation8 + $0x1dc] sm:$0xf0]  ;;  %v4022_v14 = vld [vmem:[#allocation8 + $0x184] sm:$0xf] }
  0x51   : > { %v3807_v2 = vor.u32 %v4031_v63, %v3804_v0  ;;  %v3764_v15 = vld [vmem:[#allocation8 + $0x1a0] sm:$0xf0]  ;;  %v3770_v21 = vld [vmem:[#allocation8 + $0x188] sm:$0xf]  ;;  %v4023_v23 = vld [vmem:[#allocation8 + $0x18c] sm:$0xf]  ;;  %p4408_p12 = pnand %p4407_p10, %p4403_p11 }
  0x52   : > { %v3767_v17 = vor.u32 %v4022_v14, %v3764_v15  ;;  %v3772_v26 = vld [vmem:[#allocation8 + $0x1a8] sm:$0xf0]  ;;  %v3762_v30 = vld [vmem:[#allocation8 + $0x180] sm:$0xf]  ;;  %v4014_v33 = vld [vmem:[#allocation8 + $0x144] sm:$0xf] }
  0x53   : > { %668 = vmatpush.bf16.msra.mxu1 %v3971_v27  ;;  %4049 = vmatpush.bf16.msra.mxu3 %v3971_v27  ;;  %v3732_v34 = vld [vmem:[#allocation8 + $0x160] sm:$0xf0]  ;;  %v4007_v62 = vld [vmem:[#allocation8 + $0x10c] sm:$0xf]  ;;  %v4003_v14 = vld [vmem:[#allocation8 + $0xe4] sm:$0xf0] }
  0x54   : > { %529 = vmatpush.bf16.msra.mxu0 %v3961_v4  ;;  %4043 = vmatpush.bf16.msra.mxu2 %v3961_v4  ;;  %v3999_v15 = vld [vmem:[#allocation8 + $0xcc] sm:$0xf] }
  0x57   : > { %669 = vmatpush.bf16.msra.mxu1 %v3970_v31  ;;  %4050 = vmatpush.bf16.msra.mxu3 %v3970_v31  ;;  %v4026_v31 = vld [vmem:[#allocation8 + $0x19c] sm:$0xf0] }
  0x58   : > { %530 = vmatpush.bf16.msra.mxu0 %v3960_v5  ;;  %4044 = vmatpush.bf16.msra.mxu2 %v3960_v5 }
  0x5b   : > { %670 = vmatpush.bf16.msra.mxu1 %v3969_v36  ;;  %4051 = vmatpush.bf16.msra.mxu3 %v3969_v36 }
  0x5c   : > { %531 = vmatpush.bf16.msra.mxu0 %v3959_v6  ;;  %4045 = vmatpush.bf16.msra.mxu2 %v3959_v6 }
  0x5f   : > { %671 = vmatpush.bf16.msra.mxu1 %v3968_v37  ;;  %4052 = vmatpush.bf16.msra.mxu3 %v3968_v37  ;;  %v3735_v37 = vor.u32 %v4014_v33, %v3732_v34  ;;  %v3994_v33 = vld [vmem:[#allocation8 + $0x9c] sm:$0xf0] }
  0x60   : > { %532 = vmatpush.bf16.msra.mxu0 %v3958_v7  ;;  %4046 = vmatpush.bf16.msra.mxu2 %v3958_v7 }
  0x63   : > { %533 = vmatmul.bf16.vlgmr.msra.gmra.mxu0 %v449_v10  ;;  %553 = vmatmul.bf16.vlgmr.msra.gmra.mxu2 %v453_v16  ;;  %v3794_v10 = vld [vmem:[#allocation8 + $0x1c0] sm:$0xf] }
  0x64   : > { %672 = vmatpush.bf16.msra.mxu1 %v3967_v38  ;;  %4053 = vmatpush.bf16.msra.mxu3 %v3967_v38  ;;  %v4019_v38 = vld [vmem:[#allocation8 + $0x164] sm:$0xf0] }
  0x65   : > { %1239 = vmatpush.bf16.msrb.mxu0 %v3803_v1  ;;  %v3708_v1 = vld [vmem:[#allocation8 + $0x128] sm:$0xf0] }
  0x68   : > { %673 = vmatpush.bf16.msra.mxu1 %v3966_v39  ;;  %4054 = vmatpush.bf16.msra.mxu3 %v3966_v39  ;;  %v4015_v39 = vld [vmem:[#allocation8 + $0x14c] sm:$0xf] }
  0x6c   : > { %1190 = vmatpush.bf16.msrb.mxu3 %v3799_v61  ;;  %1288 = vmatpush.bf16.msrb.mxu1 %v3807_v2  ;;  %v4011_v61 = vld [vmem:[#allocation8 + $0x124] sm:$0xf0]  ;;  %v3698_v2 = vld [vmem:[#allocation8 + $0x100] sm:$0xf] }
  0x70   : > { %1191 = vmatpush.bf16.msrb.mxu3 %v3767_v17 }
  0x73   : > { %538 = vmatmul.bf16.gmra.mxu0 %v450_v13  ;;  %558 = vmatmul.bf16.gmra.mxu2 %v454_v22  ;;  %v3795_v13 = vor.u32 %v4034_v12, %v3794_v10  ;;  %v4027_v22 = vld [vmem:[#allocation8 + $0x1a4] sm:$0xf0]  ;;  %v3668_v10 = vld [vmem:[#allocation8 + $0xe0] sm:$0xf0] }
  0x74   : > { %v3771_v25 = vor.u32 %v4027_v22, %v3770_v21  ;;  %1192 = vmatpush.bf16.msrb.mxu3 %v3735_v37  ;;  %v4002_v21 = vld [vmem:[#allocation8 + $0xdc] sm:$0xf0]  ;;  %v3990_v22 = vld [vmem:[#allocation8 + $0x84] sm:$0xf] }
  0x75   : > { %1141 = vmatpush.bf16.msrb.mxu2 %v3795_v13  ;;  %v3674_v13 = vld [vmem:[#allocation8 + $0xc8] sm:$0xf]  ;;  %v3604_v37 = vld [vmem:[#allocation8 + $0x60] sm:$0xf0] }
  0x76   : > { %1240 = vmatpush.bf16.msrb.mxu0 %v3771_v25  ;;  %v3675_v17 = vor.u32 %v4003_v14, %v3674_v13 }
  0x83   : > { %543 = vmatmul.bf16.gmra.mxu0 %v451_v19  ;;  %563 = vmatmul.bf16.gmra.mxu2 %v455_v32  ;;  %v3763_v32 = vor.u32 %v4026_v31, %v3762_v30  ;;  %v3644_v31 = vld [vmem:[#allocation8 + $0xa8] sm:$0xf0] }
  0x85   : > { %1142 = vmatpush.bf16.msrb.mxu2 %v3763_v32  ;;  %v3634_v32 = vld [vmem:[#allocation8 + $0x80] sm:$0xf] }
  0x93   : > { %548 = vmatmul.bf16.gmra.mxu0 %v452_v28  ;;  %568 = vmatmul.bf16.gmra.mxu2 %v456_v35  ;;  %v3775_v28 = vor.u32 %v4023_v23, %v3772_v26  ;;  %v3738_v35 = vld [vmem:[#allocation8 + $0x148] sm:$0xf]  ;;  %v3636_v23 = vld [vmem:[#allocation8 + $0xa0] sm:$0xf0] }
  0x94   : > { %v3639_v26 = vor.u32 %v3990_v22, %v3636_v23 }
  0x95   : > { %1289 = vmatpush.bf16.msrb.mxu1 %v3775_v28  ;;  %v3995_v28 = vld [vmem:[#allocation8 + $0xa4] sm:$0xf0] }
  0xe0   : > { %v534_v40 = vpop.f32.mrf.mxu0 }
  0xe1   : > { %v535_v42 = vadd.f32 %v4685_v41, %v534_v40  ;;  %v3740_v40 = vld [vmem:[#allocation8 + $0x168] sm:$0xf0] }
  0xe3   : > { %v574_v45 = vmax.f32 %v535_v42, 0.0 }
  0xe6   : > { %v554_v52 = vpop.f32.mrf.mxu2 }
  0xe7   : > { %v555_v56 = vadd.f32 %v4685_v41, %v554_v52 }
  0xe8   : > { %v536_v43 = vpop.f32.mrf.mxu0 }
  0xe9   : > { %v537_v44 = vadd.f32 %v4685_v41, %v536_v43  ;;  %v582_v4 = vmax.f32 %v555_v56, 0.0  ;;  %v3739_v43 = vor.u32 %v4019_v38, %v3738_v35  ;;  %v3635_v35 = vor.u32 %v3994_v33, %v3634_v32  ;;  %v4032_v32 = vld [vmem:[#allocation8 + $0x1d4] sm:$0xf] }
  0xeb   : > { %v575_v46 = vmax.f32 %v537_v44, 0.0  ;;  %v3743_v44 = vor.u32 %v4015_v39, %v3740_v40  ;;  %1241 = vmatpush.bf16.msrb.mxu0 %v3739_v43 }
  0xed   : > { %v590_v47 = vpack.c.bf16 %v575_v46, %v574_v45  ;;  %1290 = vmatpush.bf16.msrb.mxu1 %v3743_v44 }
  0xee   : > { %v556_v3 = vpop.f32.mrf.mxu2 }
  0xef   : > { %674 = vmatmul.bf16.vlgmr.msra.gmra.mxu1 %v590_v47  ;;  %v557_v5 = vadd.f32 %v4685_v41, %v556_v3  ;;  %v4010_v3 = vld [vmem:[#allocation8 + $0x11c] sm:$0xf0] }
  0xf0   : > { %v539_v48 = vpop.f32.mrf.mxu0 }
  0xf1   : > { %v540_v49 = vadd.f32 %v4685_v41, %v539_v48  ;;  %v583_v7 = vmax.f32 %v557_v5, 0.0  ;;  %v3711_v5 = vor.u32 %v4007_v62, %v3708_v1  ;;  %v3572_v62 = vld [vmem:[#allocation8 + $0x20] sm:$0xf0]  ;;  %v3578_v1 = vld [vmem:[#allocation8 + $0x8] sm:$0xf] }
  0xf3   : > { %v576_v53 = vmax.f32 %v540_v49, 0.0  ;;  %v594_v16 = vpack.c.bf16 %v583_v7, %v582_v4  ;;  %v3998_v7 = vld [vmem:[#allocation8 + $0xc4] sm:$0xf]  ;;  %1291 = vmatpush.bf16.msrb.mxu1 %v3711_v5  ;;  %v3580_v5 = vld [vmem:[#allocation8 + $0x28] sm:$0xf0] }
  0xf4   : > { %v3671_v12 = vor.u32 %v3998_v7, %v3668_v10 }
  0xf5   : > { %694 = vmatmul.bf16.vlgmr.msra.gmra.mxu3 %v594_v16 }
  0xf6   : > { %v559_v24 = vpop.f32.mrf.mxu2 }
  0xf7   : > { %v560_v36 = vadd.f32 %v4685_v41, %v559_v24 }
  0xf8   : > { %v541_v50 = vpop.f32.mrf.mxu0 }
  0xf9   : > { %v542_v51 = vadd.f32 %v4685_v41, %v541_v50  ;;  %v584_v46 = vmax.f32 %v560_v36, 0.0  ;;  %v3730_v50 = vld [vmem:[#allocation8 + $0x140] sm:$0xf]  ;;  %v3982_v36 = vld [vmem:[#allocation8 + $0x44] sm:$0xf] }
  0xfa   : > { %v3607_v39 = vor.u32 %v3982_v36, %v3604_v37  ;;  %v4037_v36 = vld [vmem:[#allocation8 + $0x1f4] sm:$0xf0] }
  0xfb   : > { %v577_v54 = vmax.f32 %v542_v51, 0.0  ;;  %v4018_v51 = vld [vmem:[#allocation8 + $0x15c] sm:$0xf0] }
  0xfc   : > { %v3731_v52 = vor.u32 %v4018_v51, %v3730_v50 }
  0xfd   : > { %v591_v55 = vpack.c.bf16 %v577_v54, %v576_v53  ;;  %v4006_v53 = vld [vmem:[#allocation8 + $0x104] sm:$0xf] }
  0xfe   : > { %v561_v45 = vpop.f32.mrf.mxu2  ;;  %v3700_v54 = vld [vmem:[#allocation8 + $0x120] sm:$0xf0]  ;;  %1143 = vmatpush.bf16.msrb.mxu2 %v3731_v52  ;;  %v3610_v52 = vld [vmem:[#allocation8 + $0x48] sm:$0xf] }
  0xff   : > { %679 = vmatmul.bf16.gmra.mxu1 %v591_v55  ;;  %v562_v47 = vadd.f32 %v4685_v41, %v561_v45  ;;  %v3703_v56 = vor.u32 %v4006_v53, %v3700_v54  ;;  %v3987_v53 = vld [vmem:[#allocation8 + $0x64] sm:$0xf0]  ;;  %v3983_v54 = vld [vmem:[#allocation8 + $0x4c] sm:$0xf] }
 0x100   : > { %v544_v60 = vpop.f32.mrf.mxu0 }
 0x101   : > { %v545_v6 = vadd.f32 %v4685_v41, %v544_v60  ;;  %v585_v49 = vmax.f32 %v562_v47, 0.0  ;;  %v3706_v60 = vld [vmem:[#allocation8 + $0x108] sm:$0xf]  ;;  %1193 = vmatpush.bf16.msrb.mxu3 %v3703_v56  ;;  %v3612_v56 = vld [vmem:[#allocation8 + $0x68] sm:$0xf0] }
 0x102   : > { %v3707_v0 = vor.u32 %v4011_v61, %v3706_v60  ;;  %v3974_v61 = vld [vmem:[#allocation8 + $0x4] sm:$0xf] }
 0x103   : > { %v578_v18 = vmax.f32 %v545_v6, 0.0  ;;  %v595_v55 = vpack.c.bf16 %v585_v49, %v584_v46  ;;  %v3699_v6 = vor.u32 %v4010_v3, %v3698_v2  ;;  %v3979_v3 = vld [vmem:[#allocation8 + $0x24] sm:$0xf0] }
 0x104   : > { %1242 = vmatpush.bf16.msrb.mxu0 %v3707_v0  ;;  %v3978_v0 = vld [vmem:[#allocation8 + $0x1c] sm:$0xf0] }
 0x105   : > { %699 = vmatmul.bf16.gmra.mxu3 %v595_v55  ;;  %1144 = vmatpush.bf16.msrb.mxu2 %v3699_v6  ;;  %v3611_v55 = vor.u32 %v3987_v53, %v3610_v52  ;;  %v3579_v6 = vor.u32 %v3979_v3, %v3578_v1  ;;  %v4028_v52 = vld [vmem:[#allocation8 + $0x1ac] sm:$0xf0]  ;;  %v4024_v53 = vld [vmem:[#allocation8 + $0x194] sm:$0xf] }
 0x106   : > { %v564_v63 = vpop.f32.mrf.mxu2  ;;  %1194 = vmatpush.bf16.msrb.mxu3 %v3671_v12  ;;  %v4706_v12 = vld [vmem:[%s6817_s4] ss:$0 sm:$0xff] }
 0x107   : > { %v565_v24 = vadd.f32 %v4685_v41, %v564_v63  ;;  %v3575_v63 = vor.u32 %v3974_v61, %v3572_v62  ;;  %v3756_v61 = vld [vmem:[#allocation8 + $0x178] sm:$0xf0] }
 0x108   : > { %v546_v19 = vpop.f32.mrf.mxu0  ;;  %1243 = vmatpush.bf16.msrb.mxu0 %v3675_v17 }
 0x109   : > { %v547_v20 = vadd.f32 %v4685_v41, %v546_v19  ;;  %v3666_v19 = vld [vmem:[#allocation8 + $0xc0] sm:$0xf]  ;;  %v586_v40 = vmax.f32 %v565_v24, 0.0 }
 0x10a   : > { %v3667_v25 = vor.u32 %v4002_v21, %v3666_v19  ;;  %1195 = vmatpush.bf16.msrb.mxu3 %v3639_v26  ;;  %v4033_v26 = vld [vmem:[#allocation8 + $0x1dc] sm:$0xf] }
 0x10b   : > { %v579_v27 = vmax.f32 %v547_v20, 0.0 }
 0x10c   : > { %1145 = vmatpush.bf16.msrb.mxu2 %v3667_v25 }
 0x10d   : > { %v592_v29 = vpack.c.bf16 %v579_v27, %v578_v18  ;;  %v3676_v18 = vld [vmem:[#allocation8 + $0xe8] sm:$0xf0]  ;;  %v3642_v27 = vld [vmem:[#allocation8 + $0x88] sm:$0xf] }
 0x10e   : > { %v3679_v20 = vor.u32 %v3999_v15, %v3676_v18  ;;  %v3643_v30 = vor.u32 %v3995_v28, %v3642_v27  ;;  %v566_v38 = vpop.f32.mrf.mxu2  ;;  %1196 = vmatpush.bf16.msrb.mxu3 %v3607_v39  ;;  %v3820_v27 = vld [vmem:[#allocation8 + $0x1f8] sm:$0xf0] }
 0x10f   : > { %684 = vmatmul.bf16.gmra.mxu1 %v592_v29  ;;  %v3991_v29 = vld [vmem:[#allocation8 + $0x8c] sm:$0xf]  ;;  %v3823_v28 = vor.u32 %v4033_v26, %v3820_v27  ;;  %v4025_v39 = vld [vmem:[#allocation8 + $0x19c] sm:$0xf] }
 0x110   : > { %v549_v42 = vpop.f32.mrf.mxu0  ;;  %1292 = vmatpush.bf16.msrb.mxu1 %v3679_v20  ;;  %v3647_v34 = vor.u32 %v3991_v29, %v3644_v31  ;;  %1244 = vmatpush.bf16.msrb.mxu0 %v3643_v30  ;;  %v3810_v30 = vld [vmem:[#allocation8 + $0x1d0] sm:$0xf] }
 0x111   : > { %v550_v48 = vadd.f32 %v4685_v41, %v549_v42  ;;  %v567_v42 = vadd.f32 %v4685_v41, %v566_v38  ;;  %1146 = vmatpush.bf16.msrb.mxu2 %v3635_v35  ;;  %v4036_v31 = vld [vmem:[#allocation8 + $0x1ec] sm:$0xf0]  ;;  %v3818_v35 = vld [vmem:[#allocation8 + $0x1d8] sm:$0xf] }
 0x112   : > { %1197 = vmatpush.bf16.msrb.mxu3 %v3575_v63  ;;  %v3811_v33 = vor.u32 %v4036_v31, %v3810_v30  ;;  %v3819_v38 = vor.u32 %v4037_v36, %v3818_v35  ;;  %v3714_v30 = vld [vmem:[#allocation8 + $0x110] sm:$0xf]  ;;  %v3722_v35 = vld [vmem:[#allocation8 + $0x118] sm:$0xf] }
 0x113   : > { %v580_v57 = vmax.f32 %v550_v48, 0.0  ;;  %v587_v43 = vmax.f32 %v567_v42, 0.0  ;;  %v4012_v31 = vld [vmem:[#allocation8 + $0x12c] sm:$0xf0]  ;;  %v4013_v36 = vld [vmem:[#allocation8 + $0x134] sm:$0xf0] }
 0x114   : > { %1293 = vmatpush.bf16.msrb.mxu1 %v3647_v34  ;;  %1245 = vmatpush.bf16.msrb.mxu0 %v3611_v55  ;;  %v3812_v34 = vld [vmem:[#allocation8 + $0x1f0] sm:$0xf0] }
 0x115   : > { %v596_v44 = vpack.c.bf16 %v587_v43, %v586_v40  ;;  %v3815_v37 = vor.u32 %v4032_v32, %v3812_v34  ;;  %v3788_v40 = vld [vmem:[#allocation8 + $0x1b8] sm:$0xf0]  ;;  %v3780_v55 = vld [vmem:[#allocation8 + $0x1b0] sm:$0xf0] }
 0x116   : > { %v569_v45 = vpop.f32.mrf.mxu2  ;;  %v3791_v42 = vor.u32 %v4025_v39, %v3788_v40  ;;  %v4008_v32 = vld [vmem:[#allocation8 + $0x114] sm:$0xf]  ;;  %v3723_v39 = vor.u32 %v4013_v36, %v3722_v35  ;;  %v4001_v40 = vld [vmem:[#allocation8 + $0xdc] sm:$0xf] }
 0x117   : > { %704 = vmatmul.bf16.gmra.mxu3 %v596_v44  ;;  %v570_v46 = vadd.f32 %v4685_v41, %v569_v45  ;;  %v3716_v34 = vld [vmem:[#allocation8 + $0x130] sm:$0xf0] }
 0x118   : > { %v551_v58 = vpop.f32.mrf.mxu0  ;;  %1246 = vmatpush.bf16.msrb.mxu0 %v3579_v6  ;;  %1386 = vmatpush.bf16.msra.mxu3 %v3815_v37  ;;  %v3746_v6 = vld [vmem:[#allocation8 + $0x150] sm:$0xf] }
 0x119   : > { %v552_v59 = vadd.f32 %v4685_v41, %v551_v58  ;;  %v588_v48 = vmax.f32 %v570_v46, 0.0  ;;  %v3986_v58 = vld [vmem:[#allocation8 + $0x5c] sm:$0xf0] }
 0x11b   : > { %v581_v4 = vmax.f32 %v552_v59, 0.0  ;;  %v3615_v59 = vor.u32 %v3983_v54, %v3612_v56  ;;  %v3786_v56 = vld [vmem:[#allocation8 + $0x198] sm:$0xf] }
 0x11c   : > { %1435 = vmatpush.bf16.msra.mxu0 %v3819_v38  ;;  %v3719_v38 = vor.u32 %v4008_v32, %v3716_v34  ;;  %v3586_v32 = vld [vmem:[#allocation8 + $0x10] sm:$0xf]  ;;  %v3976_v34 = vld [vmem:[#allocation8 + $0x14] sm:$0xf] }
 0x11d   : > { %v593_v16 = vpack.c.bf16 %v581_v4, %v580_v57  ;;  %v3602_v57 = vld [vmem:[#allocation8 + $0x40] sm:$0xf]  ;;  %1294 = vmatpush.bf16.msrb.mxu1 %v3615_v59  ;;  %v3975_v4 = vld [vmem:[#allocation8 + $0xc] sm:$0xf] }
 0x11e   : > { %v571_v47 = vpop.f32.mrf.mxu2  ;;  %v3603_v60 = vor.u32 %v3986_v58, %v3602_v57  ;;  %v3583_v7 = vor.u32 %v3975_v4, %v3580_v5  ;;  %v4029_v57 = vld [vmem:[#allocation8 + $0x1b4] sm:$0xf0]  ;;  %v3783_v58 = vor.u32 %v4024_v53, %v3780_v55  ;;  %v4000_v53 = vld [vmem:[#allocation8 + $0xd4] sm:$0xf] }
 0x11f   : > { %689 = vmatmul.bf16.gmra.mxu1 %v593_v16  ;;  %v572_v49 = vadd.f32 %v4685_v41, %v571_v47  ;;  %v3570_v41 = vld [vmem:[#allocation8] sm:$0xf]  ;;  %v3787_v59 = vor.u32 %v4029_v57, %v3786_v56  ;;  %v3684_v55 = vld [vmem:[#allocation8 + $0xf0] sm:$0xf0]  ;;  %v3690_v56 = vld [vmem:[#allocation8 + $0xd8] sm:$0xf] }
 0x120   : > { %1147 = vmatpush.bf16.msrb.mxu2 %v3603_v60  ;;  %v3571_v2 = vor.u32 %v3978_v0, %v3570_v41  ;;  %v4017_v60 = vld [vmem:[#allocation8 + $0x15c] sm:$0xf]  ;;  %1387 = vmatpush.bf16.msra.mxu3 %v3783_v58  ;;  %v4005_v57 = vld [vmem:[#allocation8 + $0xf4] sm:$0xf0]  ;;  %v3687_v58 = vor.u32 %v4000_v53, %v3684_v55 }
 0x121   : > { %v589_v50 = vmax.f32 %v572_v49, 0.0  ;;  %1295 = vmatpush.bf16.msrb.mxu1 %v3583_v7  ;;  %v3759_v62 = vor.u32 %v4017_v60, %v3756_v61  ;;  %1436 = vmatpush.bf16.msra.mxu0 %v3787_v59  ;;  %v4020_v7 = vld [vmem:[#allocation8 + $0x16c] sm:$0xf0]  ;;  %v3691_v59 = vor.u32 %v4005_v57, %v3690_v56 }
 0x122   : > { %v3650_v60 = vld [vmem:[#allocation8 + $0x90] sm:$0xf] }
 0x123   : > { %v597_v51 = vpack.c.bf16 %v589_v50, %v588_v48  ;;  %v3996_v61 = vld [vmem:[#allocation8 + $0xac] sm:$0xf0] }
 0x124   : > { %1148 = vmatpush.bf16.msrb.mxu2 %v3571_v2 }
 0x125   : > { %1484 = vmatpush.bf16.msra.mxu1 %v3823_v28 }
 0x127   : > { %709 = vmatmul.bf16.gmra.mxu3 %v597_v51  ;;  %v3778_v51 = vld [vmem:[#allocation8 + $0x190] sm:$0xf] }
 0x128   : > { %1337 = vmatpush.bf16.msra.mxu2 %v3811_v33  ;;  %v3779_v54 = vor.u32 %v4028_v52, %v3778_v51  ;;  %v3715_v33 = vor.u32 %v4012_v31, %v3714_v30  ;;  %v3682_v51 = vld [vmem:[#allocation8 + $0xd0] sm:$0xf] }
 0x129   : > { %1485 = vmatpush.bf16.msra.mxu1 %v3791_v42  ;;  %v3692_v42 = vld [vmem:[#allocation8 + $0xf8] sm:$0xf0]  ;;  %v4004_v52 = vld [vmem:[#allocation8 + $0xec] sm:$0xf0] }
 0x12c   : > { %1338 = vmatpush.bf16.msra.mxu2 %v3779_v54  ;;  %v3683_v54 = vor.u32 %v4004_v52, %v3682_v51 }
 0x12d   : > { %1486 = vmatpush.bf16.msra.mxu1 %v3759_v62  ;;  %v3992_v62 = vld [vmem:[#allocation8 + $0x94] sm:$0xf] }
 0x16c   : > { %v675_v10 = vpop.f32.mrf.mxu1 }
 0x16d   : > { %v676_v13 = vadd.f32 %v4706_v12, %v675_v10  ;;  %v4016_v10 = vld [vmem:[#allocation8 + $0x154] sm:$0xf] }
 0x16f   : > { %v715_v16 = vmax.f32 %v676_v13, 0.0  ;;  %v3747_v13 = vor.u32 %v4020_v7, %v3746_v6  ;;  %v3660_v6 = vld [vmem:[#allocation8 + $0xb8] sm:$0xf0]  ;;  %v3618_v7 = vld [vmem:[#allocation8 + $0x50] sm:$0xf] }
 0x171   : > { %1339 = vmatpush.bf16.msra.mxu2 %v3747_v13 }
 0x174   : > { %v677_v14 = vpop.f32.mrf.mxu1 }
 0x175   : > { %v678_v15 = vadd.f32 %v4706_v12, %v677_v14  ;;  %v3748_v14 = vld [vmem:[#allocation8 + $0x170] sm:$0xf0]  ;;  %1340 = vmatpush.bf16.msra.mxu2 %v3715_v33  ;;  %v3980_v33 = vld [vmem:[#allocation8 + $0x2c] sm:$0xf0] }
 0x176   : > { %v3587_v36 = vor.u32 %v3980_v33, %v3586_v32 }
 0x177   : > { %v716_v17 = vmax.f32 %v678_v15, 0.0  ;;  %v3754_v15 = vld [vmem:[#allocation8 + $0x158] sm:$0xf] }
 0x178   : > { %v695_v46 = vpop.f32.mrf.mxu3 }
 0x179   : > { %v4710_v18 = vpack.c.bf16 %v716_v17, %v715_v16  ;;  %v4021_v16 = vld [vmem:[#allocation8 + $0x174] sm:$0xf0]  ;;  %v3751_v17 = vor.u32 %v4016_v10, %v3748_v14  ;;  %1341 = vmatpush.bf16.msra.mxu2 %v3683_v54  ;;  %v4772_v54 = vld [vmem:[#allocation10] sm:$0xff] }
 0x17a   : > { %v4775_v55 = vperm.slane %v4772_v54, 2  ;;  %v4778_v56 = vperm.slane %v4772_v54, 3 }
 0x17b   : > { %1149 = vmatmul.bf16.vlgmr.msrb.gmra.mxu2 %v4710_v18  ;;  %1198 = vmatmul.bf16.vlgmr.msrb.gmra.mxu3 %v4710_v18 }
 0x17c   : > { %1247 = vmatmul.bf16.vlgmr.msrb.gmra.mxu0 %v4710_v18  ;;  %1296 = vmatmul.bf16.vlgmr.msrb.gmra.mxu1 %v4710_v18  ;;  %v680_v19 = vpop.f32.mrf.mxu1 }
 0x17d   : > { %v681_v20 = vadd.f32 %v4706_v12, %v680_v19  ;;  %v3755_v19 = vor.u32 %v4021_v16, %v3754_v15  ;;  %1388 = vmatpush.bf16.msra.mxu3 %v3751_v17  ;;  %v3988_v15 = vld [vmem:[#allocation8 + $0x6c] sm:$0xf0]  ;;  %v3984_v16 = vld [vmem:[#allocation8 + $0x54] sm:$0xf] }
 0x17e   : > { %v3620_v17 = vld [vmem:[#allocation8 + $0x70] sm:$0xf0] }
 0x17f   : > { %v717_v23 = vmax.f32 %v681_v20, 0.0  ;;  %v4009_v20 = vld [vmem:[#allocation8 + $0x11c] sm:$0xf]  ;;  %1437 = vmatpush.bf16.msra.mxu0 %v3755_v19  ;;  %v3626_v19 = vld [vmem:[#allocation8 + $0x58] sm:$0xf] }
 0x180   : > { %v697_v63 = vpop.f32.mrf.mxu3 }
 0x181   : > { %1389 = vmatpush.bf16.msra.mxu3 %v3719_v38  ;;  %v3594_v38 = vld [vmem:[#allocation8 + $0x18] sm:$0xf] }
 0x183   : > { %1438 = vmatpush.bf16.msra.mxu0 %v3723_v39  ;;  %v3981_v39 = vld [vmem:[#allocation8 + $0x34] sm:$0xf0] }
 0x184   : > { %v682_v21 = vpop.f32.mrf.mxu1 }
 0x185   : > { %v683_v22 = vadd.f32 %v4706_v12, %v682_v21  ;;  %v3724_v21 = vld [vmem:[#allocation8 + $0x138] sm:$0xf0]  ;;  %1390 = vmatpush.bf16.msra.mxu3 %v3687_v58 }
 0x187   : > { %v718_v24 = vmax.f32 %v683_v22, 0.0  ;;  %v696_v22 = vadd.f32 %v4706_v12, %v695_v46  ;;  %1439 = vmatpush.bf16.msra.mxu0 %v3691_v59 }
 0x188   : > { %v700_v5 = vpop.f32.mrf.mxu3 }
 0x189   : > { %v4718_v25 = vpack.c.bf16 %v718_v24, %v717_v23  ;;  %v698_v23 = vadd.f32 %v4706_v12, %v697_v63  ;;  %v3727_v24 = vor.u32 %v4009_v20, %v3724_v21  ;;  %v723_v26 = vmax.f32 %v696_v22, 0.0  ;;  %v3989_v20 = vld [vmem:[#allocation8 + $0x74] sm:$0xf0]  ;;  %v3985_v21 = vld [vmem:[#allocation8 + $0x5c] sm:$0xf] }
 0x18a   : > { %v3651_v63 = vor.u32 %v3996_v61, %v3650_v60  ;;  %v3619_v22 = vor.u32 %v3988_v15, %v3618_v7  ;;  %v4785_v60 = vperm.slane %v4772_v54, 1 }
 0x18b   : > { %1154 = vmatmul.bf16.gmra.mxu2 %v4718_v25  ;;  %1203 = vmatmul.bf16.gmra.mxu3 %v4718_v25  ;;  %v724_v27 = vmax.f32 %v698_v23, 0.0  ;;  %v3628_v23 = vld [vmem:[#allocation8 + $0x78] sm:$0xf0] }
 0x18c   : > { %1252 = vmatmul.bf16.gmra.mxu0 %v4718_v25  ;;  %1301 = vmatmul.bf16.gmra.mxu1 %v4718_v25  ;;  %v685_v29 = vpop.f32.mrf.mxu1 }
 0x18d   : > { %v686_v43 = vadd.f32 %v4706_v12, %v685_v29  ;;  %1487 = vmatpush.bf16.msra.mxu1 %v3727_v24  ;;  %v4742_v29 = vpack.c.bf16 %v724_v27, %v723_v26  ;;  %1342 = vmatpush.bf16.msra.mxu2 %v3651_v63  ;;  %v3623_v26 = vor.u32 %v3984_v16, %v3620_v17  ;;  %v4796_v63 = vperm.slane %v4772_v54, 0 }
 0x18e   : > { %v3627_v27 = vor.u32 %v3989_v20, %v3626_v19 }
 0x18f   : > { %v719_v47 = vmax.f32 %v686_v43, 0.0  ;;  %v701_v43 = vadd.f32 %v4706_v12, %v700_v5  ;;  %v3993_v5 = vld [vmem:[#allocation8 + $0x9c] sm:$0xf] }
 0x190   : > { %v702_v28 = vpop.f32.mrf.mxu3  ;;  %v3663_v14 = vor.u32 %v3993_v5, %v3660_v6 }
 0x191   : > { %v725_v46 = vmax.f32 %v701_v43, 0.0  ;;  %1343 = vmatpush.bf16.msra.mxu2 %v3619_v22  ;;  %v3977_v43 = vld [vmem:[#allocation8 + $0x1c] sm:$0xf] }
 0x194   : > { %v687_v44 = vpop.f32.mrf.mxu1 }
 0x195   : > { %v688_v45 = vadd.f32 %v4706_v12, %v687_v44  ;;  %v703_v44 = vadd.f32 %v4706_v12, %v702_v28  ;;  %v3631_v28 = vor.u32 %v3985_v21, %v3628_v23  ;;  %1344 = vmatpush.bf16.msra.mxu2 %v3587_v36 }
 0x197   : > { %v720_v48 = vmax.f32 %v688_v45, 0.0  ;;  %v3695_v45 = vor.u32 %v4001_v40, %v3692_v42  ;;  %v3595_v42 = vor.u32 %v3981_v39, %v3594_v38  ;;  %v4854_v38 = vld [vmem:[%s4643_s23 + $0x18] sm:$0xff] }
 0x199   : > { %v4726_v49 = vpack.c.bf16 %v720_v48, %v719_v47  ;;  %1488 = vmatpush.bf16.msra.mxu1 %v3695_v45  ;;  %v726_v47 = vmax.f32 %v703_v44, 0.0  ;;  %v3596_v44 = vld [vmem:[#allocation8 + $0x38] sm:$0xf0] }
 0x19a   : > { %v705_v37 = vpop.f32.mrf.mxu3  ;;  %v3599_v45 = vor.u32 %v3977_v43, %v3596_v44 }
 0x19b   : > { %1159 = vmatmul.bf16.gmra.mxu2 %v4726_v49  ;;  %1208 = vmatmul.bf16.gmra.mxu3 %v4726_v49  ;;  %v4750_v48 = vpack.c.bf16 %v726_v47, %v725_v46  ;;  %v706_v10 = vadd.f32 %v4706_v12, %v705_v37  ;;  %v3588_v37 = vld [vmem:[#allocation8 + $0x30] sm:$0xf0] }
 0x19c   : > { %1257 = vmatmul.bf16.gmra.mxu0 %v4726_v49  ;;  %1306 = vmatmul.bf16.gmra.mxu1 %v4726_v49  ;;  %v690_v50 = vpop.f32.mrf.mxu1  ;;  %v3591_v40 = vor.u32 %v3976_v34, %v3588_v37 }
 0x19d   : > { %v691_v41 = vadd.f32 %v4706_v12, %v690_v50  ;;  %1489 = vmatpush.bf16.msra.mxu1 %v3663_v14  ;;  %v727_v30 = vmax.f32 %v706_v10, 0.0 }
 0x19f   : > { %v721_v1 = vmax.f32 %v691_v41, 0.0  ;;  %v3652_v41 = vld [vmem:[#allocation8 + $0xb0] sm:$0xf0] }
 0x1a1   : > { %1490 = vmatpush.bf16.msra.mxu1 %v3631_v28  ;;  %v4837_v28 = vld [vmem:[%s4643_s23 + $0x10] sm:$0xff] }
 0x1a2   : > { %v707_v50 = vpop.f32.mrf.mxu3 }
 0x1a3   : > { %v708_v13 = vadd.f32 %v4706_v12, %v707_v50 }
 0x1a4   : > { %v692_v0 = vpop.f32.mrf.mxu1 }
 0x1a5   : > { %v693_v2 = vadd.f32 %v4706_v12, %v692_v0  ;;  %v3658_v0 = vld [vmem:[#allocation8 + $0x98] sm:$0xf]  ;;  %v728_v31 = vmax.f32 %v708_v13, 0.0  ;;  %1491 = vmatpush.bf16.msra.mxu1 %v3599_v45 }
 0x1a7   : > { %v722_v3 = vmax.f32 %v693_v2, 0.0  ;;  %v3655_v2 = vor.u32 %v3992_v62, %v3652_v41  ;;  %v4758_v35 = vpack.c.bf16 %v728_v31, %v727_v30 }
 0x1a9   : > { %v4734_v4 = vpack.c.bf16 %v722_v3, %v721_v1  ;;  %v3997_v1 = vld [vmem:[#allocation8 + $0xb4] sm:$0xf0]  ;;  %1391 = vmatpush.bf16.msra.mxu3 %v3655_v2 }
 0x1aa   : > { %v3659_v3 = vor.u32 %v3997_v1, %v3658_v0  ;;  %v710_v24 = vpop.f32.mrf.mxu3 }
 0x1ab   : > { %1164 = vmatmul.bf16.gmra.mxu2 %v4734_v4  ;;  %1213 = vmatmul.bf16.gmra.mxu3 %v4734_v4  ;;  %v711_v47 = vadd.f32 %v4706_v12, %v710_v24 }
 0x1ac   : > { %1262 = vmatmul.bf16.gmra.mxu0 %v4734_v4  ;;  %1311 = vmatmul.bf16.gmra.mxu1 %v4734_v4 }
 0x1ad   : > { %1440 = vmatpush.bf16.msra.mxu0 %v3659_v3  ;;  %1392 = vmatpush.bf16.msra.mxu3 %v3623_v26  ;;  %v729_v51 = vmax.f32 %v711_v47, 0.0 }
 0x1b1   : > { %1441 = vmatpush.bf16.msra.mxu0 %v3627_v27  ;;  %1393 = vmatpush.bf16.msra.mxu3 %v3591_v40 }
 0x1b2   : > { %v712_v46 = vpop.f32.mrf.mxu3 }
 0x1b3   : > { %v713_v50 = vadd.f32 %v4706_v12, %v712_v46 }
 0x1b5   : > { %1442 = vmatpush.bf16.msra.mxu0 %v3595_v42  ;;  %v730_v52 = vmax.f32 %v713_v50, 0.0  ;;  %v4876_v50 = vld [vmem:[%s4643_s23 + $0x20] sm:$0xff] }
 0x1b7   : > { %v4766_v53 = vpack.c.bf16 %v730_v52, %v729_v51 }
 0x1bb   : > { %1169 = vmatmul.bf16.gmra.mxu2 %v4742_v29  ;;  %1218 = vmatmul.bf16.gmra.mxu3 %v4742_v29 }
 0x1bc   : > { %1267 = vmatmul.bf16.gmra.mxu0 %v4742_v29  ;;  %1316 = vmatmul.bf16.gmra.mxu1 %v4742_v29 }
 0x1cb   : > { %1174 = vmatmul.bf16.gmra.mxu2 %v4750_v48  ;;  %1223 = vmatmul.bf16.gmra.mxu3 %v4750_v48 }
 0x1cc   : > { %1272 = vmatmul.bf16.gmra.mxu0 %v4750_v48  ;;  %1321 = vmatmul.bf16.gmra.mxu1 %v4750_v48 }
 0x1db   : > { %1179 = vmatmul.bf16.gmra.mxu2 %v4758_v35  ;;  %1228 = vmatmul.bf16.gmra.mxu3 %v4758_v35 }
 0x1dc   : > { %1277 = vmatmul.bf16.gmra.mxu0 %v4758_v35  ;;  %1326 = vmatmul.bf16.gmra.mxu1 %v4758_v35 }
 0x1eb   : > { %1184 = vmatmul.bf16.gmra.mxu2 %v4766_v53  ;;  %1233 = vmatmul.bf16.gmra.mxu3 %v4766_v53 }
 0x1ec   : > { %1282 = vmatmul.bf16.gmra.mxu0 %v4766_v53  ;;  %1331 = vmatmul.bf16.gmra.mxu1 %v4766_v53 }
 0x1f9   : > { %v1248_v12 = vpop.f32.mrf.mxu0  ;;  %v1297_v57 = vpop.f32.mrf.mxu1 }
 0x1fa   : > { %v1249_v58 = vadd.f32 %v1248_v12, %v4775_v55  ;;  %v1298_v59 = vadd.f32 %v1297_v57, %v4778_v56 }
 0x1fb   : > { %1345 = vmatmul.bf16.vlgmr.msra.gmra.mxu2 %v4710_v18  ;;  %1394 = vmatmul.bf16.vlgmr.msra.gmra.mxu3 %v4710_v18 }
 0x1fc   : > { %1443 = vmatmul.bf16.vlgmr.msra.gmra.mxu0 %v4710_v18  ;;  %1492 = vmatmul.bf16.vlgmr.msra.gmra.mxu1 %v4710_v18  ;;  %v4790_v61 = vmul.f32 %v1298_v59, %v4658_v8  ;;  %v4793_v62 = vmul.f32 %v1249_v58, %v4658_v8 }
 0x1fe   : > { %6958 = vst [vmem:[#allocation16_spill] sm:$0xff] %v4790_v61  ;;  %1794 = vadd.xlane.f32.xlu0 %v4790_v61  ;;  %1713 = vadd.xlane.f32.xlu2 %v4793_v62  ;;  %v1150_v41 = vpop.f32.mrf.mxu2  ;;  %v1199_v0 = vpop.f32.mrf.mxu3 }
 0x1ff   : > { %6959 = vst [vmem:[#allocation17_spill] sm:$0xff] %v4793_v62  ;;  %v1200_v1 = vadd.f32 %v1199_v0, %v4785_v60  ;;  %v1151_v2 = vadd.f32 %v1150_v41, %v4796_v63 }
 0x201   : > { %v1250_v18 = vpop.f32.mrf.mxu0  ;;  %v1299_v3 = vpop.f32.mrf.mxu1  ;;  %v4803_v5 = vmul.f32 %v1200_v1, %v4658_v8  ;;  %v4807_v6 = vmul.f32 %v1151_v2, %v4658_v8 }
 0x202   : > { %v1300_v13 = vadd.f32 %v1299_v3, %v4778_v56  ;;  %v1251_v15 = vadd.f32 %v1250_v18, %v4775_v55 }
 0x203   : > { %6960 = vst [vmem:[#allocation18_spill] sm:$0xff] %v4803_v5  ;;  %1632 = vadd.xlane.f32.xlu1 %v4803_v5 }
 0x204   : > { %6961 = vst [vmem:[#allocation19_spill] sm:$0xff] %v4807_v6  ;;  %v4819_v8 = vmul.f32 %v1300_v13, %v4661_v9  ;;  %v4824_v20 = vmul.f32 %v1251_v15, %v4661_v9  ;;  %v4913_v15 = vld [vmem:[%s4643_s23 + $0x28] sm:$0xff] }
 0x206   : > { %1551 = vadd.xlane.f32.xlu0 %v4807_v6  ;;  %v1152_v7 = vpop.f32.mrf.mxu2  ;;  %v1201_v10 = vpop.f32.mrf.mxu3  ;;  %6963 = vst [vmem:[#allocation21_spill] sm:$0xff] %v4819_v8 }
 0x207   : > { %v1202_v14 = vadd.f32 %v1201_v10, %v4785_v60  ;;  %6964 = vst [vmem:[#allocation22_spill] sm:$0xff] %v4824_v20  ;;  %v1153_v26 = vadd.f32 %v1152_v7, %v4796_v63 }
 0x209   : > { %v1253_v16 = vpop.f32.mrf.mxu0  ;;  %v4814_v17 = vmul.f32 %v1202_v14, %v4661_v9  ;;  %v1302_v19 = vpop.f32.mrf.mxu1 }
 0x20a   : > { %v1303_v21 = vadd.f32 %v1302_v19, %v4778_v56  ;;  %v1254_v24 = vadd.f32 %v1253_v16, %v4775_v55 }
 0x20b   : > { %6962 = vst [vmem:[#allocation20_spill] sm:$0xff] %v4814_v17  ;;  %1399 = vmatmul.bf16.gmra.mxu3 %v4718_v25  ;;  %1634 = vadd.xlane.f32.xlu2 %v4814_v17 }
 0x20c   : > { %1448 = vmatmul.bf16.gmra.mxu0 %v4718_v25  ;;  %1497 = vmatmul.bf16.gmra.mxu1 %v4718_v25  ;;  %v4833_v27 = vmul.f32 %v1303_v21, %v4666_v11  ;;  %v4840_v30 = vmul.f32 %v4837_v28, %v1254_v24 }
 0x20d   : > { %1796 = vadd.xlane.f32.xlu1 %v4819_v8  ;;  %1350 = vmatmul.bf16.gmra.mxu2 %v4718_v25  ;;  %v4843_v25 = vld [vmem:[%s4643_s23 + $0x8] sm:$0xff] }
 0x20e   : > { %1715 = vadd.xlane.f32.xlu0 %v4824_v20  ;;  %v1155_v22 = vpop.f32.mrf.mxu2  ;;  %v1204_v23 = vpop.f32.mrf.mxu3  ;;  %6965 = vst [vmem:[#allocation23_spill] sm:$0xff] %v4833_v27  ;;  %v4846_v31 = vmul.f32 %v4843_v25, %v1153_v26 }
 0x20f   : > { %6966 = vst [vmem:[#allocation24_spill] sm:$0xff] %v4840_v30  ;;  %v1156_v34 = vadd.f32 %v1155_v22, %v4796_v63  ;;  %v1205_v36 = vadd.f32 %v1204_v23, %v4785_v60 }
 0x210   : > { %6967 = vst [vmem:[#allocation25_spill] sm:$0xff] %v4846_v31 }
 0x211   : > { %v1255_v9 = vpop.f32.mrf.mxu0  ;;  %v1304_v33 = vpop.f32.mrf.mxu1  ;;  %v4862_v40 = vmul.f32 %v4837_v28, %v1156_v34  ;;  %v4867_v42 = vmul.f32 %v4837_v28, %v1205_v36  ;;  %v4941_v34 = vld [vmem:[%s4643_s23 + $0x30] sm:$0xff] }
 0x212   : > { %v1256_v32 = vadd.f32 %v1255_v9, %v4775_v55  ;;  %v1305_v46 = vadd.f32 %v1304_v33, %v4778_v56 }
 0x213   : > { %1798 = vadd.xlane.f32.xlu2 %v4833_v27  ;;  %6969 = vst [vmem:[#allocation27_spill] sm:$0xff] %v4862_v40 }
 0x214   : > { %v4857_v39 = vmul.f32 %v4854_v38, %v1256_v32  ;;  %6970 = vst [vmem:[#allocation28_spill] sm:$0xff] %v4867_v42  ;;  %v4886_v12 = vmul.f32 %v4854_v38, %v1305_v46 }
 0x215   : > { %1717 = vadd.xlane.f32.xlu1 %v4840_v30 }
 0x216   : > { %1553 = vadd.xlane.f32.xlu0 %v4846_v31  ;;  %v1157_v11 = vpop.f32.mrf.mxu2  ;;  %v1206_v37 = vpop.f32.mrf.mxu3  ;;  %6968 = vst [vmem:[#allocation26_spill] sm:$0xff] %v4857_v39 }
 0x217   : > { %v1158_v44 = vadd.f32 %v1157_v11, %v4796_v63  ;;  %6973 = vst [vmem:[#allocation31_spill] sm:$0xff] %v4886_v12  ;;  %v1207_v59 = vadd.f32 %v1206_v37, %v4785_v60 }
 0x219   : > { %v1307_v47 = vpop.f32.mrf.mxu1  ;;  %v1258_v57 = vpop.f32.mrf.mxu0  ;;  %v4899_v2 = vmul.f32 %v4854_v38, %v1207_v59 }
 0x21a   : > { %v1259_v41 = vadd.f32 %v1258_v57, %v4775_v55  ;;  %v1308_v10 = vadd.f32 %v1307_v47, %v4778_v56 }
 0x21b   : > { %1404 = vmatmul.bf16.gmra.mxu3 %v4726_v49  ;;  %1719 = vadd.xlane.f32.xlu2 %v4857_v39  ;;  %6975 = vst [vmem:[#allocation33_spill] sm:$0xff] %v4899_v2 }
 0x21c   : > { %1453 = vmatmul.bf16.gmra.mxu0 %v4726_v49  ;;  %1502 = vmatmul.bf16.gmra.mxu1 %v4726_v49  ;;  %v4904_v18 = vmul.f32 %v4876_v50, %v1259_v41  ;;  %v4920_v21 = vmul.f32 %v4876_v50, %v1308_v10 }
 0x21d   : > { %1355 = vmatmul.bf16.gmra.mxu2 %v4726_v49  ;;  %1555 = vadd.xlane.f32.xlu1 %v4862_v40  ;;  %v4883_v49 = vmul.f32 %v4854_v38, %v1158_v44 }
 0x21e   : > { %1636 = vadd.xlane.f32.xlu0 %v4867_v42  ;;  %v1160_v43 = vpop.f32.mrf.mxu2  ;;  %v1209_v52 = vpop.f32.mrf.mxu3  ;;  %6976 = vst [vmem:[#allocation34_spill] sm:$0xff] %v4904_v18 }
 0x21f   : > { %v1161_v45 = vadd.f32 %v1160_v43, %v4796_v63  ;;  %6972 = vst [vmem:[#allocation30_spill] sm:$0xff] %v4883_v49  ;;  %v1210_v58 = vadd.f32 %v1209_v52, %v4785_v60 }
 0x220   : > { %6978 = vst [vmem:[#allocation36_spill] sm:$0xff] %v4920_v21 }
 0x221   : > { %v4879_v51 = vmul.f32 %v4876_v50, %v1161_v45  ;;  %v4894_v0 = vmul.f32 %v4876_v50, %v1210_v58  ;;  %v1309_v1 = vpop.f32.mrf.mxu1  ;;  %v1260_v13 = vpop.f32.mrf.mxu0 }
 0x222   : > { %v1310_v3 = vadd.f32 %v1309_v1, %v4778_v56  ;;  %v1261_v24 = vadd.f32 %v1260_v13, %v4775_v55 }
 0x223   : > { %6971 = vst [vmem:[#allocation29_spill] sm:$0xff] %v4879_v51  ;;  %1559 = vadd.xlane.f32.xlu2 %v4879_v51 }
 0x224   : > { %6974 = vst [vmem:[#allocation32_spill] sm:$0xff] %v4894_v0  ;;  %v4916_v16 = vmul.f32 %v4913_v15, %v1310_v3  ;;  %v4936_v11 = vmul.f32 %v4913_v15, %v1261_v24 }
 0x225   : > { %1557 = vadd.xlane.f32.xlu1 %v4883_v49 }
 0x226   : > { %1800 = vadd.xlane.f32.xlu0 %v4886_v12  ;;  %v1211_v7 = vpop.f32.mrf.mxu3  ;;  %6977 = vst [vmem:[#allocation35_spill] sm:$0xff] %v4916_v16  ;;  %v1162_v19 = vpop.f32.mrf.mxu2 }
 0x227   : > { %v1212_v14 = vadd.f32 %v1211_v7, %v4785_v60  ;;  %v1163_v22 = vadd.f32 %v1162_v19, %v4796_v63  ;;  %6981 = vst [vmem:[#allocation39_spill] sm:$0xff] %v4936_v11  ;;  %v4968_v7 = vld [vmem:[%s4643_s23 + $0x38] sm:$0xff] }
 0x229   : > { %v1312_v23 = vpop.f32.mrf.mxu1  ;;  %v4931_v32 = vmul.f32 %v4913_v15, %v1163_v22  ;;  %v1263_v33 = vpop.f32.mrf.mxu0 }
 0x22a   : > { %v1313_v26 = vadd.f32 %v1312_v23, %v4778_v56  ;;  %v1264_v37 = vadd.f32 %v1263_v33, %v4775_v55  ;;  %v4990_v33 = vld [vmem:[%s4643_s23 + $0x40] sm:$0xff] }
 0x22b   : > { %1409 = vmatmul.bf16.gmra.mxu3 %v4734_v4  ;;  %1640 = vadd.xlane.f32.xlu2 %v4894_v0  ;;  %6980 = vst [vmem:[#allocation38_spill] sm:$0xff] %v4931_v32 }
 0x22c   : > { %1458 = vmatmul.bf16.gmra.mxu0 %v4734_v4  ;;  %1507 = vmatmul.bf16.gmra.mxu1 %v4734_v4  ;;  %v4944_v36 = vmul.f32 %v4941_v34, %v1313_v26  ;;  %v4953_v47 = vmul.f32 %v4941_v34, %v1264_v37 }
 0x22d   : > { %1360 = vmatmul.bf16.gmra.mxu2 %v4734_v4  ;;  %1638 = vadd.xlane.f32.xlu1 %v4899_v2  ;;  %v4923_v4 = vmul.f32 %v4913_v15, %v1212_v14 }
 0x22e   : > { %1721 = vadd.xlane.f32.xlu0 %v4904_v18  ;;  %v1214_v9 = vpop.f32.mrf.mxu3  ;;  %6982 = vst [vmem:[#allocation40_spill] sm:$0xff] %v4944_v36  ;;  %v1165_v43 = vpop.f32.mrf.mxu2 }
 0x22f   : > { %6979 = vst [vmem:[#allocation37_spill] sm:$0xff] %v4923_v4  ;;  %v1215_v44 = vadd.f32 %v1214_v9, %v4785_v60  ;;  %v1166_v45 = vadd.f32 %v1165_v43, %v4796_v63 }
 0x230   : > { %6983 = vst [vmem:[#allocation41_spill] sm:$0xff] %v4953_v47 }
 0x231   : > { %v1314_v46 = vpop.f32.mrf.mxu1  ;;  %v4957_v57 = vmul.f32 %v4941_v34, %v1215_v44  ;;  %v1265_v58 = vpop.f32.mrf.mxu0 }
 0x232   : > { %v1315_v41 = vadd.f32 %v1314_v46, %v4778_v56  ;;  %v1266_v1 = vadd.f32 %v1265_v58, %v4775_v55 }
 0x233   : > { %1804 = vadd.xlane.f32.xlu2 %v4916_v16  ;;  %6984 = vst [vmem:[#allocation42_spill] sm:$0xff] %v4957_v57 }
 0x234   : > { %v4976_v14 = vmul.f32 %v4968_v7, %v1315_v41  ;;  %v4981_v19 = vmul.f32 %v4968_v7, %v1266_v1 }
 0x235   : > { %1802 = vadd.xlane.f32.xlu1 %v4920_v21 }
 0x236   : > { %1642 = vadd.xlane.f32.xlu0 %v4923_v4  ;;  %v1216_v52 = vpop.f32.mrf.mxu3  ;;  %v1167_v3 = vpop.f32.mrf.mxu2  ;;  %6987 = vst [vmem:[#allocation45_spill] sm:$0xff] %v4976_v14 }
 0x237   : > { %v1217_v59 = vadd.f32 %v1216_v52, %v4785_v60  ;;  %6988 = vst [vmem:[#allocation46_spill] sm:$0xff] %v4981_v19  ;;  %v1168_v23 = vadd.f32 %v1167_v3, %v4796_v63 }
 0x239   : > { %v4971_v10 = vmul.f32 %v4968_v7, %v1217_v59  ;;  %v1317_v13 = vpop.f32.mrf.mxu1  ;;  %v1268_v26 = vpop.f32.mrf.mxu0 }
 0x23a   : > { %v1318_v22 = vadd.f32 %v1317_v13, %v4778_v56  ;;  %v1269_v52 = vadd.f32 %v1268_v26, %v4775_v55  ;;  %v5018_v13 = vld [vmem:[%s4643_s23 + $0x48] sm:$0xff] }
 0x23b   : > { %1414 = vmatmul.bf16.gmra.mxu3 %v4742_v29  ;;  %1561 = vadd.xlane.f32.xlu2 %v4931_v32  ;;  %6986 = vst [vmem:[#allocation44_spill] sm:$0xff] %v4971_v10  ;;  %v5208_v32 = vperm.slane %v4772_v54, 5 }
 0x23c   : > { %1463 = vmatmul.bf16.gmra.mxu0 %v4742_v29  ;;  %1512 = vmatmul.bf16.gmra.mxu1 %v4742_v29  ;;  %v4993_v37 = vmul.f32 %v4990_v33, %v1318_v22  ;;  %v5013_v3 = vmul.f32 %v4990_v33, %v1269_v52 }
 0x23d   : > { %1365 = vmatmul.bf16.gmra.mxu2 %v4742_v29  ;;  %1723 = vadd.xlane.f32.xlu1 %v4936_v11  ;;  %v4960_v29 = vmul.f32 %v4941_v34, %v1166_v45 }
 0x23e   : > { %1806 = vadd.xlane.f32.xlu0 %v4944_v36  ;;  %v1219_v24 = vpop.f32.mrf.mxu3  ;;  %6989 = vst [vmem:[#allocation47_spill] sm:$0xff] %v4993_v37  ;;  %v1170_v43 = vpop.f32.mrf.mxu2 }
 0x23f   : > { %6985 = vst [vmem:[#allocation43_spill] sm:$0xff] %v4960_v29  ;;  %v1220_v9 = vadd.f32 %v1219_v24, %v4785_v60  ;;  %v1171_v45 = vadd.f32 %v1170_v43, %v4796_v63 }
 0x240   : > { %6993 = vst [vmem:[#allocation51_spill] sm:$0xff] %v5013_v3 }
 0x241   : > { %v5000_v44 = vmul.f32 %v4990_v33, %v1220_v9  ;;  %v1319_v46 = vpop.f32.mrf.mxu1  ;;  %v5008_v41 = vmul.f32 %v4990_v33, %v1171_v45  ;;  %v1270_v1 = vpop.f32.mrf.mxu0 }
 0x242   : > { %v1320_v58 = vadd.f32 %v1319_v46, %v4778_v56 }
 0x243   : > { %1725 = vadd.xlane.f32.xlu2 %v4953_v47  ;;  %6991 = vst [vmem:[#allocation49_spill] sm:$0xff] %v5000_v44 }
 0x244   : > { %6992 = vst [vmem:[#allocation50_spill] sm:$0xff] %v5008_v41  ;;  %v5021_v22 = vmul.f32 %v5018_v13, %v1320_v58 }
 0x245   : > { %1644 = vadd.xlane.f32.xlu1 %v4957_v57 }
 0x246   : > { %1563 = vadd.xlane.f32.xlu0 %v4960_v29  ;;  %v1221_v59 = vpop.f32.mrf.mxu3  ;;  %6994 = vst [vmem:[#allocation52_spill] sm:$0xff] %v5021_v22  ;;  %v1172_v24 = vpop.f32.mrf.mxu2 }
 0x247   : > { %v1222_v26 = vadd.f32 %v1221_v59, %v4785_v60  ;;  %v1173_v9 = vadd.f32 %v1172_v24, %v4796_v63 }
 0x249   : > { %v1322_v43 = vpop.f32.mrf.mxu1  ;;  %v5034_v52 = vmul.f32 %v5018_v13, %v1222_v26  ;;  %v1273_v59 = vpop.f32.mrf.mxu0 }
 0x24b   : > { %1419 = vmatmul.bf16.gmra.mxu3 %v4750_v48  ;;  %1646 = vadd.xlane.f32.xlu2 %v4971_v10  ;;  %6996 = vst [vmem:[#allocation54_spill] sm:$0xff] %v5034_v52 }
 0x24c   : > { %1468 = vmatmul.bf16.gmra.mxu0 %v4750_v48  ;;  %1517 = vmatmul.bf16.gmra.mxu1 %v4750_v48 }
 0x24d   : > { %1370 = vmatmul.bf16.gmra.mxu2 %v4750_v48  ;;  %1808 = vadd.xlane.f32.xlu1 %v4976_v14  ;;  %v4997_v48 = vmul.f32 %v4968_v7, %v1168_v23  ;;  %v1271_v23 = vadd.f32 %v1270_v1, %v4775_v55  ;;  %v1323_v1 = vadd.f32 %v1322_v43, %v4778_v56 }
 0x24e   : > { %1727 = vadd.xlane.f32.xlu0 %v4981_v19  ;;  %v1224_v46 = vpop.f32.mrf.mxu3  ;;  %v1175_v24 = vpop.f32.mrf.mxu2 }
 0x24f   : > { %6990 = vst [vmem:[#allocation48_spill] sm:$0xff] %v4997_v48  ;;  %v5030_v45 = vmul.f32 %v5018_v13, %v1271_v23  ;;  %v1225_v58 = vadd.f32 %v1224_v46, %v4785_v60  ;;  %v1274_v23 = vadd.f32 %v1273_v59, %v4775_v55  ;;  %v1176_v59 = vadd.f32 %v1175_v24, %v4796_v63 }
 0x251   : > { %6995 = vst [vmem:[#allocation53_spill] sm:$0xff] %v5030_v45 }
 0x253   : > { %1810 = vadd.xlane.f32.xlu2 %v4993_v37 }
 0x255   : > { %1565 = vadd.xlane.f32.xlu1 %v4997_v48 }
 0x256   : > { %1648 = vadd.xlane.f32.xlu0 %v5000_v44 }
 0x25b   : > { %1424 = vmatmul.bf16.gmra.mxu3 %v4758_v35  ;;  %1567 = vadd.xlane.f32.xlu2 %v5008_v41 }
 0x25c   : > { %1473 = vmatmul.bf16.gmra.mxu0 %v4758_v35  ;;  %1522 = vmatmul.bf16.gmra.mxu1 %v4758_v35 }
 0x25d   : > { %1375 = vmatmul.bf16.gmra.mxu2 %v4758_v35  ;;  %1729 = vadd.xlane.f32.xlu1 %v5013_v3  ;;  %v5037_v35 = vmul.f32 %v5018_v13, %v1173_v9 }
 0x25e   : > { %1812 = vadd.xlane.f32.xlu0 %v5021_v22  ;;  %v5045_v22 = vld [vmem:[%s4643_s23 + $0x50] sm:$0xff] }
 0x25f   : > { %6997 = vst [vmem:[#allocation55_spill] sm:$0xff] %v5037_v35  ;;  %v5048_v26 = vmul.f32 %v5045_v22, %v1225_v58  ;;  %v5053_v9 = vmul.f32 %v5045_v22, %v1323_v1  ;;  %v5058_v43 = vmul.f32 %v5045_v22, %v1274_v23  ;;  %v1226_v58 = vpop.f32.mrf.mxu3 }
 0x260   : > { %v1227_v1 = vadd.f32 %v1226_v58, %v4785_v60 }
 0x261   : > { %6998 = vst [vmem:[#allocation56_spill] sm:$0xff] %v5048_v26 }
 0x262   : > { %6999 = vst [vmem:[#allocation57_spill] sm:$0xff] %v5053_v9 }
 0x263   : > { %1731 = vadd.xlane.f32.xlu2 %v5030_v45  ;;  %v1324_v45 = vpop.f32.mrf.mxu1  ;;  %7000 = vst [vmem:[#allocation58_spill] sm:$0xff] %v5058_v43 }
 0x264   : > { %v1325_v46 = vadd.f32 %v1324_v45, %v4778_v56  ;;  %v1177_v45 = vpop.f32.mrf.mxu2 }
 0x265   : > { %1650 = vadd.xlane.f32.xlu1 %v5034_v52  ;;  %v1178_v24 = vadd.f32 %v1177_v45, %v4796_v63 }
 0x266   : > { %1569 = vadd.xlane.f32.xlu0 %v5037_v35  ;;  %v5069_v35 = vld [vmem:[%s4643_s23 + $0x58] sm:$0xff] }
 0x267   : > { %v5072_v23 = vmul.f32 %v5069_v35, %v1325_v46  ;;  %v1229_v37 = vpop.f32.mrf.mxu3 }
 0x268   : > { %v1230_v41 = vadd.f32 %v1229_v37, %v4785_v60 }
 0x269   : > { %7001 = vst [vmem:[#allocation59_spill] sm:$0xff] %v5072_v23 }
 0x26b   : > { %1429 = vmatmul.bf16.gmra.mxu3 %v4766_v53  ;;  %1652 = vadd.xlane.f32.xlu2 %v5048_v26  ;;  %v1275_v26 = vpop.f32.mrf.mxu0 }
 0x26c   : > { %1478 = vmatmul.bf16.gmra.mxu0 %v4766_v53  ;;  %1527 = vmatmul.bf16.gmra.mxu1 %v4766_v53 }
 0x26d   : > { %1380 = vmatmul.bf16.gmra.mxu2 %v4766_v53  ;;  %1814 = vadd.xlane.f32.xlu1 %v5053_v9  ;;  %v5076_v53 = vmul.f32 %v5045_v22, %v1176_v59  ;;  %v5079_v9 = vmul.f32 %v5069_v35, %v1227_v1  ;;  %v5093_v1 = vmul.f32 %v5069_v35, %v1178_v24  ;;  %v1180_v24 = vpop.f32.mrf.mxu2 }
 0x26e   : > { %1733 = vadd.xlane.f32.xlu0 %v5058_v43  ;;  %v1276_v43 = vadd.f32 %v1275_v26, %v4775_v55 }
 0x26f   : > { %7002 = vst [vmem:[#allocation60_spill] sm:$0xff] %v5076_v53 }
 0x270   : > { %7003 = vst [vmem:[#allocation61_spill] sm:$0xff] %v5079_v9 }
 0x271   : > { %v5066_v52 = vpop.xlane.xlu0 %1794  ;;  %v5083_v58 = vpop.xlane.xlu2 %1713  ;;  %7004 = vst [vmem:[#allocation62_spill] sm:$0xff] %v5093_v1 }
 0x273   : > { %1816 = vadd.xlane.f32.xlu2 %v5072_v23  ;;  %v1327_v23 = vpop.f32.mrf.mxu1  ;;  %v1278_v45 = vpop.f32.mrf.mxu0 }
 0x274   : > { %v1328_v59 = vadd.f32 %v1327_v23, %v4778_v56  ;;  %v1279_v26 = vadd.f32 %v1278_v45, %v4775_v55  ;;  %v1231_v45 = vpop.f32.mrf.mxu3 }
 0x275   : > { %1571 = vadd.xlane.f32.xlu1 %v5076_v53  ;;  %v5097_v53 = vmul.f32 %v5069_v35, %v1276_v43 }
 0x276   : > { %1654 = vadd.xlane.f32.xlu0 %v5079_v9  ;;  %v5086_v46 = vpop.xlane.xlu1 %1632  ;;  %v5100_v9 = vld [vmem:[%s4643_s23 + $0x60] sm:$0xff] }
 0x277   : > { %7005 = vst [vmem:[#allocation63_spill] sm:$0xff] %v5097_v53  ;;  %v5103_v44 = vmul.f32 %v5100_v9, %v1328_v59  ;;  %v5117_v59 = vmul.f32 %v5100_v9, %v1279_v26 }
 0x279   : > { %v5090_v3 = vpop.xlane.xlu0 %1551  ;;  %7006 = vst [vmem:[#allocation64_spill] sm:$0xff] %v5103_v44 }
 0x27a   : > { %7007 = vst [vmem:[#allocation65_spill] sm:$0xff] %v5117_v59 }
 0x27b   : > { %1573 = vadd.xlane.f32.xlu2 %v5093_v1  ;;  %v1181_v1 = vadd.f32 %v1180_v24, %v4796_v63  ;;  %v1329_v14 = vpop.f32.mrf.mxu1  ;;  %v1280_v37 = vpop.f32.mrf.mxu0  ;;  %v1232_v24 = vadd.f32 %v1231_v45, %v4785_v60 }
 0x27c   : > { %v1330_v26 = vadd.f32 %v1329_v14, %v4778_v56  ;;  %v1281_v48 = vadd.f32 %v1280_v37, %v4775_v55  ;;  %v1234_v47 = vpop.f32.mrf.mxu3 }
 0x27d   : > { %1735 = vadd.xlane.f32.xlu1 %v5097_v53  ;;  %v5124_v53 = vmul.f32 %v5100_v9, %v1181_v1  ;;  %v5138_v1 = vld [vmem:[%s4643_s23 + $0x68] sm:$0xff] }
 0x27e   : > { %1818 = vadd.xlane.f32.xlu0 %v5103_v44  ;;  %v5108_v23 = vpop.xlane.xlu2 %1634  ;;  %v5121_v44 = vmul.f32 %v5100_v9, %v1230_v41  ;;  %v1182_v41 = vpop.f32.mrf.mxu2  ;;  %v5141_v45 = vmul.f32 %v5138_v1, %v1232_v24  ;;  %v5148_v14 = vmul.f32 %v5138_v1, %v1281_v48  ;;  %v5162_v48 = vld [vmem:[%s4643_s23 + $0x70] sm:$0xff] }
 0x27f   : > { %7009 = vst [vmem:[#allocation67_spill] sm:$0xff] %v5124_v53  ;;  %v1183_v24 = vadd.f32 %v1182_v41, %v4796_v63 }
 0x280   : > { %v5112_v43 = vpop.xlane.xlu1 %1796  ;;  %7008 = vst [vmem:[#allocation66_spill] sm:$0xff] %v5121_v44 }
 0x281   : > { %v5114_v19 = vpop.xlane.xlu0 %1715  ;;  %7010 = vst [vmem:[#allocation68_spill] sm:$0xff] %v5141_v45 }
 0x282   : > { %7012 = vst [vmem:[#allocation70_spill] sm:$0xff] %v5148_v14 }
 0x283   : > { %1737 = vadd.xlane.f32.xlu2 %v5117_v59  ;;  %v1283_v29 = vpop.f32.mrf.mxu0 }
 0x284   : > { %v1236_v51 = vpop.f32.mrf.mxu3 }
 0x285   : > { %1656 = vadd.xlane.f32.xlu1 %v5121_v44  ;;  %v1332_v44 = vpop.f32.mrf.mxu1  ;;  %v1237_v11 = vadd.f32 %v1236_v51, %v4785_v60 }
 0x286   : > { %1575 = vadd.xlane.f32.xlu0 %v5124_v53  ;;  %v5129_v10 = vpop.xlane.xlu2 %1798  ;;  %v5145_v53 = vmul.f32 %v5138_v1, %v1330_v26  ;;  %v1333_v37 = vadd.f32 %v1332_v44, %v4778_v56 }
 0x288   : > { %v5133_v59 = vpop.xlane.xlu1 %1717  ;;  %7011 = vst [vmem:[#allocation69_spill] sm:$0xff] %v5145_v53  ;;  %v5165_v44 = vmul.f32 %v5162_v48, %v1333_v37  ;;  %v1284_v37 = vadd.f32 %v1283_v29, %v4775_v55 }
 0x289   : > { %v5135_v36 = vpop.xlane.xlu0 %1553 }
 0x28a   : > { %7013 = vst [vmem:[#allocation71_spill] sm:$0xff] %v5165_v44 }
 0x28b   : > { %1658 = vadd.xlane.f32.xlu2 %v5141_v45  ;;  %v1235_v45 = vadd.f32 %v1234_v47, %v4785_v60 }
 0x28d   : > { %1820 = vadd.xlane.f32.xlu1 %v5145_v53  ;;  %v1185_v53 = vpop.f32.mrf.mxu2  ;;  %v5172_v41 = vmul.f32 %v5162_v48, %v1235_v45  ;;  %v1334_v18 = vpop.f32.mrf.mxu1 }
 0x28e   : > { %1739 = vadd.xlane.f32.xlu0 %v5148_v14  ;;  %v5153_v57 = vpop.xlane.xlu2 %1719  ;;  %v5169_v14 = vmul.f32 %v5138_v1, %v1183_v24  ;;  %v1186_v47 = vadd.f32 %v1185_v53, %v4796_v63  ;;  %v1285_v53 = vpop.f32.mrf.mxu0 }
 0x28f   : > { %7015 = vst [vmem:[#allocation73_spill] sm:$0xff] %v5172_v41 }
 0x290   : > { %v5157_v21 = vpop.xlane.xlu1 %1555  ;;  %7014 = vst [vmem:[#allocation72_spill] sm:$0xff] %v5169_v14  ;;  %v5186_v45 = vmul.f32 %v5162_v48, %v1186_v47 }
 0x291   : > { %v5159_v26 = vpop.xlane.xlu0 %1636 }
 0x292   : > { %7016 = vst [vmem:[#allocation74_spill] sm:$0xff] %v5186_v45 }
 0x293   : > { %1822 = vadd.xlane.f32.xlu2 %v5165_v44  ;;  %v1335_v44 = vadd.f32 %v1334_v18, %v4778_v56  ;;  %v1286_v56 = vadd.f32 %v1285_v53, %v4775_v55  ;;  %v1395_v53 = vpop.f32.mrf.mxu3 }
 0x295   : > { %1577 = vadd.xlane.f32.xlu1 %v5169_v14  ;;  %v5190_v14 = vmul.f32 %v5162_v48, %v1284_v37  ;;  %v1187_v18 = vpop.f32.mrf.mxu2  ;;  %v1493_v37 = vpop.f32.mrf.mxu1 }
 0x296   : > { %1660 = vadd.xlane.f32.xlu0 %v5172_v41  ;;  %v5177_v0 = vpop.xlane.xlu2 %1559  ;;  %v5193_v41 = vld [vmem:[%s4643_s23 + $0x78] sm:$0xff] }
 0x297   : > { %7017 = vst [vmem:[#allocation75_spill] sm:$0xff] %v5190_v14  ;;  %v5196_v29 = vmul.f32 %v5193_v41, %v1335_v44  ;;  %v5213_v55 = vmul.f32 %v5193_v41, %v1286_v56  ;;  %v5220_v60 = vmul.f32 %v5193_v41, %v1237_v11  ;;  %v1396_v56 = vadd.f32 %v1395_v53, %v5208_v32 }
 0x298   : > { %v5181_v24 = vpop.xlane.xlu1 %1557  ;;  %v5243_v53 = vperm.slane %v4772_v54, 4 }
 0x299   : > { %v5183_v16 = vpop.xlane.xlu0 %1800  ;;  %7018 = vst [vmem:[#allocation76_spill] sm:$0xff] %v5196_v29 }
 0x29a   : > { %7019 = vst [vmem:[#allocation77_spill] sm:$0xff] %v5213_v55 }
 0x29b   : > { %1579 = vadd.xlane.f32.xlu2 %v5186_v45  ;;  %v1188_v45 = vadd.f32 %v1187_v18, %v4796_v63  ;;  %7020 = vst [vmem:[#allocation78_spill] sm:$0xff] %v5220_v60  ;;  %v5223_v63 = vperm.slane %v4772_v54, 6  ;;  %v1444_v18 = vpop.f32.mrf.mxu0 }
 0x29d   : > { %1741 = vadd.xlane.f32.xlu1 %v5190_v14  ;;  %v5226_v51 = vmul.f32 %v5193_v41, %v1188_v45  ;;  %v1445_v11 = vadd.f32 %v1444_v18, %v5223_v63  ;;  %v1346_v27 = vpop.f32.mrf.mxu2  ;;  %v4233_v45 = vld [vmem:[%s4643_s23] sm:$0xff]  ;;  %v1495_v12 = vpop.f32.mrf.mxu1 }
 0x29e   : > { %1824 = vadd.xlane.f32.xlu0 %v5196_v29  ;;  %v5201_v47 = vpop.xlane.xlu2 %1640  ;;  %v5216_v29 = vperm.slane %v4772_v54, 7  ;;  %v5240_v40 = vmul.f32 %v4233_v45, %v1396_v56  ;;  %v1397_v18 = vpop.f32.mrf.mxu3  ;;  %v1347_v56 = vadd.f32 %v1346_v27, %v5243_v53 }
 0x29f   : > { %7021 = vst [vmem:[#allocation79_spill] sm:$0xff] %v5226_v51  ;;  %v1398_v54 = vadd.f32 %v1397_v18, %v5208_v32 }
 0x2a0   : > { %v5205_v4 = vpop.xlane.xlu1 %1638  ;;  %7022 = vst [vmem:[#allocation80_spill] sm:$0xff] %v5240_v40  ;;  %v5265_v8 = vmul.f32 %v4233_v45, %v1347_v56 }
 0x2a1   : > { %v5210_v44 = vpop.xlane.xlu0 %1721  ;;  %v5268_v20 = vmul.f32 %v4843_v25, %v1398_v54 }
 0x2a2   : > { %7026 = vst [vmem:[#allocation84_spill] sm:$0xff] %v5265_v8 }
 0x2a3   : > { %1743 = vadd.xlane.f32.xlu2 %v5213_v55  ;;  %v1494_v55 = vadd.f32 %v1493_v37, %v5216_v29  ;;  %v1496_v37 = vadd.f32 %v1495_v12, %v5216_v29  ;;  %v1446_v2 = vpop.f32.mrf.mxu0  ;;  %7027 = vst [vmem:[#allocation85_spill] sm:$0xff] %v5268_v20 }
 0x2a5   : > { %1662 = vadd.xlane.f32.xlu1 %v5220_v60  ;;  %v5246_v60 = vmul.f32 %v4233_v45, %v1494_v55  ;;  %v1348_v12 = vpop.f32.mrf.mxu2  ;;  %v1498_v17 = vpop.f32.mrf.mxu1 }
 0x2a6   : > { %1581 = vadd.xlane.f32.xlu0 %v5226_v51  ;;  %v5231_v14 = vpop.xlane.xlu2 %1804  ;;  %v5248_v51 = vmul.f32 %v4233_v45, %v1445_v11  ;;  %v5262_v11 = vmul.f32 %v4843_v25, %v1496_v37  ;;  %v1349_v27 = vadd.f32 %v1348_v12, %v5243_v53  ;;  %v1447_v37 = vadd.f32 %v1446_v2, %v5223_v63 }
 0x2a7   : > { %7023 = vst [vmem:[#allocation81_spill] sm:$0xff] %v5246_v60  ;;  %v1499_v31 = vadd.f32 %v1498_v17, %v5216_v29 }
 0x2a8   : > { %v5235_v30 = vpop.xlane.xlu1 %1802  ;;  %7024 = vst [vmem:[#allocation82_spill] sm:$0xff] %v5248_v51  ;;  %v5282_v56 = vmul.f32 %v4843_v25, %v1349_v27  ;;  %v5286_v12 = vmul.f32 %v4843_v25, %v1447_v37 }
 0x2a9   : > { %v5237_v42 = vpop.xlane.xlu0 %1642  ;;  %7025 = vst [vmem:[#allocation83_spill] sm:$0xff] %v5262_v11 }
 0x2aa   : > { %7028 = vst [vmem:[#allocation86_spill] sm:$0xff] %v5282_v56 }
 0x2ab   : > { %1956 = vadd.xlane.f32.xlu2 %v5240_v40  ;;  %v1449_v54 = vpop.f32.mrf.mxu0  ;;  %7029 = vst [vmem:[#allocation87_spill] sm:$0xff] %v5286_v12 }
 0x2ac   : > { %v1450_v2 = vadd.f32 %v1449_v54, %v5223_v63 }
 0x2ad   : > { %2118 = vadd.xlane.f32.xlu1 %v5246_v60  ;;  %v1400_v60 = vpop.f32.mrf.mxu3  ;;  %v1351_v17 = vpop.f32.mrf.mxu2 }
 0x2ae   : > { %2037 = vadd.xlane.f32.xlu0 %v5248_v51  ;;  %v5253_v39 = vpop.xlane.xlu2 %1561  ;;  %v1401_v27 = vadd.f32 %v1400_v60, %v5208_v32  ;;  %v1352_v40 = vadd.f32 %v1351_v17, %v5243_v53 }
 0x2b0   : > { %v5257_v49 = vpop.xlane.xlu1 %1723  ;;  %v5307_v54 = vmul.f32 %v4837_v28, %v1401_v27 }
 0x2b1   : > { %v5259_v55 = vpop.xlane.xlu0 %1806 }
 0x2b2   : > { %7032 = vst [vmem:[#allocation90_spill] sm:$0xff] %v5307_v54 }
 0x2b3   : > { %2120 = vadd.xlane.f32.xlu2 %v5262_v11  ;;  %v1451_v60 = vpop.f32.mrf.mxu0 }
 0x2b4   : > { %v1452_v61 = vadd.f32 %v1451_v60, %v5223_v63 }
 0x2b5   : > { %1875 = vadd.xlane.f32.xlu1 %v5265_v8  ;;  %v1402_v37 = vpop.f32.mrf.mxu3 }
 0x2b6   : > { %1958 = vadd.xlane.f32.xlu0 %v5268_v20  ;;  %v5273_v18 = vpop.xlane.xlu2 %1725  ;;  %v5289_v20 = vmul.f32 %v4837_v28, %v1499_v31  ;;  %v5303_v31 = vmul.f32 %v4837_v28, %v1450_v2  ;;  %v1403_v17 = vadd.f32 %v1402_v37, %v5208_v32 }
 0x2b8   : > { %v5277_v11 = vpop.xlane.xlu1 %1644  ;;  %7030 = vst [vmem:[#allocation88_spill] sm:$0xff] %v5289_v20 }
 0x2b9   : > { %v5279_v45 = vpop.xlane.xlu0 %1563  ;;  %7031 = vst [vmem:[#allocation89_spill] sm:$0xff] %v5303_v31 }
 0x2bb   : > { %1877 = vadd.xlane.f32.xlu2 %v5282_v56  ;;  %v1500_v56 = vpop.f32.mrf.mxu1  ;;  %v1454_v5 = vpop.f32.mrf.mxu0 }
 0x2bc   : > { %v1501_v2 = vadd.f32 %v1500_v56, %v5216_v29 }
 0x2bd   : > { %2039 = vadd.xlane.f32.xlu1 %v5286_v12  ;;  %v1405_v60 = vpop.f32.mrf.mxu3 }
 0x2be   : > { %2122 = vadd.xlane.f32.xlu0 %v5289_v20  ;;  %v5294_v51 = vpop.xlane.xlu2 %1646  ;;  %v5310_v20 = vmul.f32 %v4837_v28, %v1352_v40  ;;  %v5324_v28 = vmul.f32 %v4854_v38, %v1403_v17  ;;  %v5328_v37 = vmul.f32 %v4854_v38, %v1501_v2 }
 0x2c0   : > { %v5298_v8 = vpop.xlane.xlu1 %1808  ;;  %7033 = vst [vmem:[#allocation91_spill] sm:$0xff] %v5310_v20 }
 0x2c1   : > { %v5300_v25 = vpop.xlane.xlu0 %1727  ;;  %7036 = vst [vmem:[#allocation94_spill] sm:$0xff] %v5324_v28 }
 0x2c2   : > { %7037 = vst [vmem:[#allocation95_spill] sm:$0xff] %v5328_v37 }
 0x2c3   : > { %2041 = vadd.xlane.f32.xlu2 %v5303_v31  ;;  %v1353_v31 = vpop.f32.mrf.mxu2  ;;  %v1503_v40 = vpop.f32.mrf.mxu1 }
 0x2c4   : > { %v1504_v56 = vadd.f32 %v1503_v40, %v5216_v29  ;;  %v1354_v17 = vadd.f32 %v1353_v31, %v5243_v53 }
 0x2c5   : > { %1960 = vadd.xlane.f32.xlu1 %v5307_v54  ;;  %v5331_v54 = vmul.f32 %v4854_v38, %v1452_v61 }
 0x2c6   : > { %1879 = vadd.xlane.f32.xlu0 %v5310_v20  ;;  %v5315_v12 = vpop.xlane.xlu2 %1810  ;;  %v5345_v61 = vmul.f32 %v4876_v50, %v1504_v56  ;;  %v1455_v56 = vadd.f32 %v1454_v5, %v5223_v63 }
 0x2c7   : > { %7034 = vst [vmem:[#allocation92_spill] sm:$0xff] %v5315_v12 }
 0x2c8   : > { %v5319_v62 = vpop.xlane.xlu1 %1565  ;;  %7038 = vst [vmem:[#allocation96_spill] sm:$0xff] %v5331_v54 }
 0x2c9   : > { %v5321_v27 = vpop.xlane.xlu0 %1648  ;;  %7041 = vst [vmem:[#allocation99_spill] sm:$0xff] %v5345_v61 }
 0x2ca   : > { %7035 = vst [vmem:[#allocation93_spill] sm:$0xff] %v5321_v27 }
 0x2cb   : > { %1962 = vadd.xlane.f32.xlu2 %v5324_v28  ;;  %v1406_v28 = vadd.f32 %v1405_v60, %v5208_v32  ;;  %v1356_v40 = vpop.f32.mrf.mxu2  ;;  %v1505_v12 = vpop.f32.mrf.mxu1 }
 0x2cc   : > { %v1357_v31 = vadd.f32 %v1356_v40, %v5243_v53  ;;  %v5370_v40 = vmul.f32 %v4876_v50, %v1455_v56 }
 0x2cd   : > { %2124 = vadd.xlane.f32.xlu1 %v5328_v37  ;;  %v5349_v37 = vmul.f32 %v4854_v38, %v1354_v17  ;;  %v1456_v17 = vpop.f32.mrf.mxu0 }
 0x2ce   : > { %2043 = vadd.xlane.f32.xlu0 %v5331_v54  ;;  %v5336_v20 = vpop.xlane.xlu2 %1567  ;;  %v5352_v54 = vmul.f32 %v4876_v50, %v1406_v28  ;;  %v5366_v28 = vmul.f32 %v4876_v50, %v1357_v31  ;;  %7048 = vst [vmem:[#allocation106_spill] sm:$0xff] %v5370_v40  ;;  %v1457_v5 = vadd.f32 %v1456_v17, %v5223_v63 }
 0x2cf   : > { %7042 = vst [vmem:[#allocation100_spill] sm:$0xff] %v5349_v37 }
 0x2d0   : > { %v5340_v6 = vpop.xlane.xlu1 %1729  ;;  %7043 = vst [vmem:[#allocation101_spill] sm:$0xff] %v5352_v54 }
 0x2d1   : > { %7039 = vst [vmem:[#allocation97_spill] sm:$0xff] %v5340_v6  ;;  %v5342_v2 = vpop.xlane.xlu0 %1812 }
 0x2d2   : > { %7040 = vst [vmem:[#allocation98_spill] sm:$0xff] %v5342_v2  ;;  %v1506_v2 = vadd.f32 %v1505_v12, %v5216_v29 }
 0x2d3   : > { %2126 = vadd.xlane.f32.xlu2 %v5345_v61  ;;  %v1407_v61 = vpop.f32.mrf.mxu3  ;;  %7047 = vst [vmem:[#allocation105_spill] sm:$0xff] %v5366_v28  ;;  %v1358_v12 = vpop.f32.mrf.mxu2 }
 0x2d4   : > { %v1408_v31 = vadd.f32 %v1407_v61, %v5208_v32 }
 0x2d5   : > { %1881 = vadd.xlane.f32.xlu1 %v5349_v37  ;;  %v1459_v61 = vpop.f32.mrf.mxu0 }
 0x2d6   : > { %1964 = vadd.xlane.f32.xlu0 %v5352_v54  ;;  %v5357_v60 = vpop.xlane.xlu2 %1731  ;;  %v5373_v54 = vmul.f32 %v4913_v15, %v1506_v2  ;;  %v5387_v2 = vmul.f32 %v4913_v15, %v1457_v5  ;;  %v5391_v17 = vmul.f32 %v4913_v15, %v1408_v31 }
 0x2d7   : > { %7044 = vst [vmem:[#allocation102_spill] sm:$0xff] %v5357_v60  ;;  %v1359_v60 = vadd.f32 %v1358_v12, %v5243_v53 }
 0x2d8   : > { %v5361_v6 = vpop.xlane.xlu1 %1650  ;;  %7049 = vst [vmem:[#allocation107_spill] sm:$0xff] %v5373_v54 }
 0x2d9   : > { %7045 = vst [vmem:[#allocation103_spill] sm:$0xff] %v5361_v6  ;;  %v5363_v38 = vpop.xlane.xlu0 %1569 }
 0x2da   : > { %7046 = vst [vmem:[#allocation104_spill] sm:$0xff] %v5363_v38 }
 0x2db   : > { %1883 = vadd.xlane.f32.xlu2 %v5366_v28  ;;  %v1508_v28 = vpop.f32.mrf.mxu1  ;;  %7053 = vst [vmem:[#allocation111_spill] sm:$0xff] %v5387_v2  ;;  %v1410_v56 = vpop.f32.mrf.mxu3 }
 0x2dc   : > { %7054 = vst [vmem:[#allocation112_spill] sm:$0xff] %v5391_v17  ;;  %v1411_v12 = vadd.f32 %v1410_v56, %v5208_v32  ;;  %v1509_v5 = vadd.f32 %v1508_v28, %v5216_v29 }
 0x2dd   : > { %2045 = vadd.xlane.f32.xlu1 %v5370_v40  ;;  %v5394_v40 = vmul.f32 %v4913_v15, %v1359_v60 }
 0x2de   : > { %2128 = vadd.xlane.f32.xlu0 %v5373_v54  ;;  %v5378_v37 = vpop.xlane.xlu2 %1652  ;;  %v5406_v15 = vmul.f32 %v4941_v34, %v1411_v12  ;;  %v5410_v56 = vmul.f32 %v4941_v34, %v1509_v5 }
 0x2df   : > { %7050 = vst [vmem:[#allocation108_spill] sm:$0xff] %v5378_v37 }
 0x2e0   : > { %v5382_v6 = vpop.xlane.xlu1 %1814  ;;  %7055 = vst [vmem:[#allocation113_spill] sm:$0xff] %v5394_v40 }
 0x2e1   : > { %7051 = vst [vmem:[#allocation109_spill] sm:$0xff] %v5382_v6  ;;  %v5384_v50 = vpop.xlane.xlu0 %1733  ;;  %v1533_v6 = vlaneseq }
 0x2e2   : > { %7052 = vst [vmem:[#allocation110_spill] sm:$0xff] %v5384_v50  ;;  %v1361_v50 = vpop.f32.mrf.mxu2 }
 0x2e3   : > { %2047 = vadd.xlane.f32.xlu2 %v5387_v2  ;;  %v1460_v2 = vadd.f32 %v1459_v61, %v5223_v63  ;;  %7058 = vst [vmem:[#allocation116_spill] sm:$0xff] %v5406_v15  ;;  %v1510_v60 = vpop.f32.mrf.mxu1  ;;  %v1362_v5 = vadd.f32 %v1361_v50, %v5243_v53 }
 0x2e4   : > { %7059 = vst [vmem:[#allocation117_spill] sm:$0xff] %v5410_v56  ;;  %v1511_v61 = vadd.f32 %v1510_v60, %v5216_v29  ;;  %v1461_v60 = vpop.f32.mrf.mxu0 }
 0x2e5   : > { %1966 = vadd.xlane.f32.xlu1 %v5391_v17  ;;  %v5412_v17 = vand.u32 127, %v1533_v6  ;;  %v5415_v28 = vmul.f32 %v4941_v34, %v1460_v2 }
 0x2e6   : > { %1885 = vadd.xlane.f32.xlu0 %v5394_v40  ;;  %v5399_v54 = vpop.xlane.xlu2 %1816  ;;  %v1412_v40 = vpop.f32.mrf.mxu3  ;;  %v5432_v38 = vmul.f32 %v4968_v7, %v1511_v61  ;;  %v1462_v61 = vadd.f32 %v1461_v60, %v5223_v63 }
 0x2e7   : > { %7056 = vst [vmem:[#allocation114_spill] sm:$0xff] %v5399_v54  ;;  %vm1664_vm0 = vcmp.eq.s32.totalorder %v5412_v17, 1  ;;  %vm1583_vm1 = vcmp.eq.s32.totalorder %v5412_v17, 0  ;;  %vm1745_vm2 = vcmp.eq.s32.totalorder %v5412_v17, 2  ;;  %vm1826_vm3 = vcmp.eq.s32.totalorder %v5412_v17, 3 }
 0x2e8   : > { %v5403_v31 = vpop.xlane.xlu1 %1571  ;;  %7060 = vst [vmem:[#allocation118_spill] sm:$0xff] %v5415_v28  ;;  %v5457_v60 = vmul.f32 %v4968_v7, %v1462_v61  ;;  %vm1907_vm4 = vcmp.eq.s32.totalorder %v5412_v17, 4  ;;  %vm1988_vm5 = vcmp.eq.s32.totalorder %v5412_v17, 5  ;;  %vm2069_vm6 = vcmp.eq.s32.totalorder %v5412_v17, 6 }
 0x2e9   : > { %7057 = vst [vmem:[#allocation115_spill] sm:$0xff] %v5403_v31  ;;  %v1655_v37 = vpop.xlane.xlu0 %1654  ;;  %vm2150_vm7 = vcmp.eq.s32.totalorder %v5412_v17, 7 }
 0x2ea   : > { %v1676_v6 = vsel %vm1664_vm0, %v1655_v37, 0.0  ;;  %7061 = vst [vmem:[#allocation119_spill] sm:$0xff] %v5432_v38  ;;  %v1363_v50 = vpop.f32.mrf.mxu2  ;;  %v5438_v37 = vmul.f32 %v4941_v34, %v1362_v5 }
 0x2eb   : > { %1968 = vadd.xlane.f32.xlu2 %v5406_v15  ;;  %7066 = vst [vmem:[#allocation124_spill] sm:$0xff] %v5457_v60 }
 0x2ec   : > { %7063 = vst [vmem:[#allocation121_spill] sm:$0xff] %v5438_v37 }
 0x2ed   : > { %2130 = vadd.xlane.f32.xlu1 %v5410_v56  ;;  %v1413_v56 = vadd.f32 %v1412_v40, %v5208_v32  ;;  %v1364_v40 = vadd.f32 %v1363_v50, %v5243_v53 }
 0x2ee   : > { %2049 = vadd.xlane.f32.xlu0 %v5415_v28  ;;  %v1574_v12 = vpop.xlane.xlu2 %1573 }
 0x2ef   : > { %v1595_v2 = vsel %vm1583_vm1, %v1574_v12, 0.0  ;;  %v5441_v12 = vmul.f32 %v4968_v7, %v1413_v56  ;;  %v5449_v34 = vmul.f32 %v4968_v7, %v1364_v40  ;;  %v1464_v56 = vpop.f32.mrf.mxu0 }
 0x2f0   : > { %v1692_v15 = vadd.f32 %v1676_v6, %v1595_v2  ;;  %v1736_v54 = vpop.xlane.xlu1 %1735  ;;  %v1513_v6 = vpop.f32.mrf.mxu1  ;;  %v1465_v40 = vadd.f32 %v1464_v56, %v5223_v63 }
 0x2f1   : > { %v1757_v31 = vsel %vm1745_vm2, %v1736_v54, 0.0  ;;  %v1819_v28 = vpop.xlane.xlu0 %1818  ;;  %7064 = vst [vmem:[#allocation122_spill] sm:$0xff] %v5441_v12 }
 0x2f2   : > { %v5434_v27 = vadd.f32 %v1757_v31, %v1692_v15  ;;  %v1514_v31 = vadd.f32 %v1513_v6, %v5216_v29  ;;  %v1415_v15 = vpop.f32.mrf.mxu3  ;;  %7065 = vst [vmem:[#allocation123_spill] sm:$0xff] %v5449_v34  ;;  %v5475_v56 = vmul.f32 %v4990_v33, %v1465_v40 }
 0x2f3   : > { %2132 = vadd.xlane.f32.xlu2 %v5432_v38  ;;  %v1416_v61 = vadd.f32 %v1415_v15, %v5208_v32 }
 0x2f4   : > { %7062 = vst [vmem:[#allocation120_spill] sm:$0xff] %v5434_v27 }
 0x2f5   : > { %1887 = vadd.xlane.f32.xlu1 %v5438_v37  ;;  %7069 = vst [vmem:[#allocation127_spill] sm:$0xff] %v5475_v56 }
 0x2f6   : > { %1970 = vadd.xlane.f32.xlu0 %v5441_v12  ;;  %v1738_v54 = vpop.xlane.xlu2 %1737  ;;  %v5462_v12 = vmul.f32 %v4990_v33, %v1514_v31 }
 0x2f7   : > { %v1758_v6 = vsel %vm1745_vm2, %v1738_v54, 0.0  ;;  %v1466_v15 = vpop.f32.mrf.mxu0 }
 0x2f8   : > { %v1657_v2 = vpop.xlane.xlu1 %1656  ;;  %7067 = vst [vmem:[#allocation125_spill] sm:$0xff] %v5462_v12 }
 0x2f9   : > { %v1576_v38 = vpop.xlane.xlu0 %1575  ;;  %v1677_v5 = vsel %vm1664_vm0, %v1657_v2, 0.0  ;;  %v1366_v2 = vpop.f32.mrf.mxu2 }
 0x2fa   : > { %v1596_v50 = vsel %vm1583_vm1, %v1576_v38, 0.0  ;;  %v1839_v38 = vsel %vm1826_vm3, %v1819_v28, 0.0  ;;  %v1367_v31 = vadd.f32 %v1366_v2, %v5243_v53  ;;  %v5479_v28 = vmul.f32 %v4990_v33, %v1416_v61 }
 0x2fb   : > { %v1693_v37 = vadd.f32 %v1677_v5, %v1596_v50  ;;  %1889 = vadd.xlane.f32.xlu2 %v5449_v34  ;;  %v1515_v5 = vpop.f32.mrf.mxu1 }
 0x2fc   : > { %7070 = vst [vmem:[#allocation128_spill] sm:$0xff] %v5479_v28  ;;  %v1516_v40 = vadd.f32 %v1515_v5, %v5216_v29 }
 0x2fd   : > { %v1774_v27 = vadd.f32 %v1758_v6, %v1693_v37  ;;  %2051 = vadd.xlane.f32.xlu1 %v5457_v60  ;;  %v1417_v37 = vpop.f32.mrf.mxu3  ;;  %v5482_v6 = vmul.f32 %v4990_v33, %v1367_v31 }
 0x2fe   : > { %2134 = vadd.xlane.f32.xlu0 %v5462_v12  ;;  %v1659_v7 = vpop.xlane.xlu2 %1658  ;;  %v5500_v5 = vmul.f32 %v5018_v13, %v1516_v40 }
 0x2ff   : > { %v5471_v54 = vadd.f32 %v1839_v38, %v1774_v27  ;;  %7071 = vst [vmem:[#allocation129_spill] sm:$0xff] %v5482_v6  ;;  %v1418_v27 = vadd.f32 %v1417_v37, %v5208_v32  ;;  %v1467_v38 = vadd.f32 %v1466_v15, %v5223_v63  ;;  %v1678_v61 = vsel %vm1664_vm0, %v1659_v7, 0.0 }
 0x300   : > { %v1821_v50 = vpop.xlane.xlu1 %1820  ;;  %7073 = vst [vmem:[#allocation131_spill] sm:$0xff] %v5500_v5 }
 0x301   : > { %7068 = vst [vmem:[#allocation126_spill] sm:$0xff] %v5471_v54  ;;  %v1740_v34 = vpop.xlane.xlu0 %1739  ;;  %v1368_v12 = vpop.f32.mrf.mxu2  ;;  %v5494_v37 = vmul.f32 %v5018_v13, %v1418_v27  ;;  %v5503_v7 = vmul.f32 %v5018_v13, %v1467_v38  ;;  %v1840_v27 = vsel %vm1826_vm3, %v1821_v50, 0.0 }
 0x302   : > { %v1369_v40 = vadd.f32 %v1368_v12, %v5243_v53 }
 0x303   : > { %2053 = vadd.xlane.f32.xlu2 %v5475_v56  ;;  %7072 = vst [vmem:[#allocation130_spill] sm:$0xff] %v5494_v37 }
 0x304   : > { %7074 = vst [vmem:[#allocation132_spill] sm:$0xff] %v5503_v7 }
 0x305   : > { %1972 = vadd.xlane.f32.xlu1 %v5479_v28  ;;  %v1518_v28 = vpop.f32.mrf.mxu1  ;;  %v1420_v54 = vpop.f32.mrf.mxu3 }
 0x306   : > { %1891 = vadd.xlane.f32.xlu0 %v5482_v6  ;;  %v1823_v2 = vpop.xlane.xlu2 %1822  ;;  %v1759_v6 = vsel %vm1745_vm2, %v1740_v34, 0.0  ;;  %v1421_v38 = vadd.f32 %v1420_v54, %v5208_v32 }
 0x308   : > { %v1578_v56 = vpop.xlane.xlu1 %1577  ;;  %v5530_v54 = vmul.f32 %v5045_v22, %v1421_v38 }
 0x309   : > { %v1597_v33 = vsel %vm1583_vm1, %v1578_v56, 0.0  ;;  %v1661_v31 = vpop.xlane.xlu0 %1660  ;;  %v1519_v56 = vadd.f32 %v1518_v28, %v5216_v29  ;;  %v1469_v28 = vpop.f32.mrf.mxu0 }
 0x30a   : > { %v1694_v60 = vadd.f32 %v1678_v61, %v1597_v33  ;;  %7077 = vst [vmem:[#allocation135_spill] sm:$0xff] %v5530_v54 }
 0x30b   : > { %1974 = vadd.xlane.f32.xlu2 %v5494_v37 }
 0x30c   : > { %v1775_v15 = vadd.f32 %v1759_v6, %v1694_v60  ;;  %v1679_v60 = vsel %vm1664_vm0, %v1661_v31, 0.0  ;;  %v1841_v31 = vsel %vm1826_vm3, %v1823_v2, 0.0  ;;  %v1470_v2 = vadd.f32 %v1469_v28, %v5223_v63 }
 0x30d   : > { %2136 = vadd.xlane.f32.xlu1 %v5500_v5 }
 0x30e   : > { %2055 = vadd.xlane.f32.xlu0 %v5503_v7  ;;  %v1580_v34 = vpop.xlane.xlu2 %1579  ;;  %v5510_v61 = vadd.f32 %v1840_v27, %v1775_v15  ;;  %v5521_v15 = vmul.f32 %v5045_v22, %v1519_v56  ;;  %v1371_v27 = vpop.f32.mrf.mxu2  ;;  %v5548_v28 = vmul.f32 %v5045_v22, %v1470_v2 }
 0x30f   : > { %v1598_v6 = vsel %vm1583_vm1, %v1580_v34, 0.0  ;;  %v5527_v34 = vmul.f32 %v5018_v13, %v1369_v40 }
 0x310   : > { %v1695_v33 = vadd.f32 %v1679_v60, %v1598_v6  ;;  %v1742_v50 = vpop.xlane.xlu1 %1741  ;;  %7075 = vst [vmem:[#allocation133_spill] sm:$0xff] %v5521_v15  ;;  %v1372_v6 = vadd.f32 %v1371_v27, %v5243_v53 }
 0x311   : > { %v1760_v5 = vsel %vm1745_vm2, %v1742_v50, 0.0  ;;  %v1825_v7 = vpop.xlane.xlu0 %1824  ;;  %7076 = vst [vmem:[#allocation134_spill] sm:$0xff] %v5527_v34  ;;  %v1520_v50 = vpop.f32.mrf.mxu1 }
 0x312   : > { %v1776_v12 = vadd.f32 %v1760_v5, %v1695_v33  ;;  %v1521_v56 = vadd.f32 %v1520_v50, %v5216_v29  ;;  %v1422_v33 = vpop.f32.mrf.mxu3  ;;  %v5540_v38 = vmul.f32 %v5045_v22, %v1372_v6  ;;  %7080 = vst [vmem:[#allocation138_spill] sm:$0xff] %v5548_v28 }
 0x313   : > { %2138 = vadd.xlane.f32.xlu2 %v5521_v15  ;;  %v1423_v22 = vadd.f32 %v1422_v33, %v5208_v32 }
 0x314   : > { %v5532_v60 = vadd.f32 %v1841_v31, %v1776_v12  ;;  %7079 = vst [vmem:[#allocation137_spill] sm:$0xff] %v5540_v38  ;;  %v1471_v12 = vpop.f32.mrf.mxu0 }
 0x315   : > { %1893 = vadd.xlane.f32.xlu1 %v5527_v34  ;;  %v1472_v6 = vadd.f32 %v1471_v12, %v5223_v63 }
 0x316   : > { %7078 = vst [vmem:[#allocation136_spill] sm:$0xff] %v5532_v60  ;;  %1976 = vadd.xlane.f32.xlu0 %v5530_v54  ;;  %v1744_v5 = vpop.xlane.xlu2 %1743  ;;  %v5553_v54 = vmul.f32 %v5069_v35, %v1521_v56  ;;  %v1373_v37 = vpop.f32.mrf.mxu2 }
 0x317   : > { %v1761_v50 = vsel %vm1745_vm2, %v1744_v5, 0.0  ;;  %v1374_v5 = vadd.f32 %v1373_v37, %v5243_v53 }
 0x318   : > { %v1663_v13 = vpop.xlane.xlu1 %1662  ;;  %7081 = vst [vmem:[#allocation139_spill] sm:$0xff] %v5553_v54 }
 0x319   : > { %v1582_v40 = vpop.xlane.xlu0 %1581  ;;  %v1680_v27 = vsel %vm1664_vm0, %v1663_v13, 0.0  ;;  %v1842_v13 = vsel %vm1826_vm3, %v1825_v7, 0.0  ;;  %v1523_v56 = vpop.f32.mrf.mxu1  ;;  %v5575_v7 = vmul.f32 %v5069_v35, %v1423_v22  ;;  %v5578_v33 = vmul.f32 %v5069_v35, %v1374_v5 }
 0x31a   : > { %v1599_v31 = vsel %vm1583_vm1, %v1582_v40, 0.0 }
 0x31b   : > { %v1696_v15 = vadd.f32 %v1680_v27, %v1599_v31  ;;  %1895 = vadd.xlane.f32.xlu2 %v5540_v38  ;;  %v1425_v31 = vpop.f32.mrf.mxu3  ;;  %7084 = vst [vmem:[#allocation142_spill] sm:$0xff] %v5575_v7 }
 0x31c   : > { %7085 = vst [vmem:[#allocation143_spill] sm:$0xff] %v5578_v33  ;;  %v1426_v37 = vadd.f32 %v1425_v31, %v5208_v32 }
 0x31d   : > { %v1777_v34 = vadd.f32 %v1761_v50, %v1696_v15  ;;  %2057 = vadd.xlane.f32.xlu1 %v5548_v28  ;;  %v5571_v15 = vmul.f32 %v5069_v35, %v1472_v6  ;;  %v1524_v6 = vadd.f32 %v1523_v56, %v5216_v29 }
 0x31e   : > { %2140 = vadd.xlane.f32.xlu0 %v5553_v54  ;;  %v5560_v40 = vpop.xlane.xlu2 %1956  ;;  %v1376_v54 = vpop.f32.mrf.mxu2  ;;  %v5590_v35 = vmul.f32 %v5100_v9, %v1426_v37 }
 0x31f   : > { %v5563_v2 = vadd.f32 %v1842_v13, %v1777_v34  ;;  %7083 = vst [vmem:[#allocation141_spill] sm:$0xff] %v5571_v15  ;;  %v1474_v34 = vpop.f32.mrf.mxu0  ;;  %v5594_v31 = vmul.f32 %v5100_v9, %v1524_v6  ;;  %v1377_v37 = vadd.f32 %v1376_v54, %v5243_v53  ;;  %v1584_v6 = vsel %vm1583_vm1, %v5090_v3, 0.0 }
 0x320   : > { %v5566_v27 = vpop.xlane.xlu1 %2118  ;;  %v1475_v13 = vadd.f32 %v1474_v34, %v5223_v63  ;;  %7086 = vst [vmem:[#allocation144_spill] sm:$0xff] %v5590_v35  ;;  %v1585_v3 = vsel %vm1583_vm1, %v5135_v36, 0.0  ;;  %v1746_v36 = vsel %vm1745_vm2, %v5083_v58, 0.0  ;;  %v1747_v58 = vsel %vm1745_vm2, %v5114_v19, 0.0 }
 0x321   : > { %7082 = vst [vmem:[#allocation140_spill] sm:$0xff] %v5563_v2  ;;  %v5568_v12 = vpop.xlane.xlu0 %2037  ;;  %v1525_v5 = vpop.f32.mrf.mxu1  ;;  %v5619_v54 = vmul.f32 %v5100_v9, %v1377_v37  ;;  %v1828_v19 = vsel %vm1826_vm3, %v5112_v43, 0.0 }
 0x322   : > { %7087 = vst [vmem:[#allocation145_spill] sm:$0xff] %v5594_v31  ;;  %v1526_v56 = vadd.f32 %v1525_v5, %v5216_v29 }
 0x323   : > { %2059 = vadd.xlane.f32.xlu2 %v5571_v15  ;;  %7090 = vst [vmem:[#allocation148_spill] sm:$0xff] %v5619_v54 }
 0x324   : > { %v5612_v5 = vmul.f32 %v5138_v1, %v1526_v56 }
 0x325   : > { %1978 = vadd.xlane.f32.xlu1 %v5575_v7  ;;  %v5597_v7 = vmul.f32 %v5100_v9, %v1475_v13 }
 0x326   : > { %1897 = vadd.xlane.f32.xlu0 %v5578_v33  ;;  %v5583_v50 = vpop.xlane.xlu2 %2120  ;;  %v1427_v33 = vpop.f32.mrf.mxu3  ;;  %7089 = vst [vmem:[#allocation147_spill] sm:$0xff] %v5612_v5 }
 0x327   : > { %7088 = vst [vmem:[#allocation146_spill] sm:$0xff] %v5597_v7  ;;  %v1476_v28 = vpop.f32.mrf.mxu0  ;;  %v1428_v38 = vadd.f32 %v1427_v33, %v5208_v32 }
 0x328   : > { %v1876_v15 = vpop.xlane.xlu1 %1875 }
 0x329   : > { %v5587_v22 = vpop.xlane.xlu0 %1958  ;;  %v5625_v2 = vmul.f32 %v5138_v1, %v1428_v38  ;;  %v1528_v60 = vpop.f32.mrf.mxu1  ;;  %v1477_v38 = vadd.f32 %v1476_v28, %v5223_v63 }
 0x32b   : > { %1980 = vadd.xlane.f32.xlu2 %v5590_v35  ;;  %7091 = vst [vmem:[#allocation149_spill] sm:$0xff] %v5625_v2 }
 0x32d   : > { %2142 = vadd.xlane.f32.xlu1 %v5594_v31  ;;  %v1378_v31 = vpop.f32.mrf.mxu2 }
 0x32e   : > { %2061 = vadd.xlane.f32.xlu0 %v5597_v7  ;;  %v1878_v34 = vpop.xlane.xlu2 %1877  ;;  %v1665_v7 = vsel %vm1664_vm0, %v5086_v46, 0.0  ;;  %v1379_v56 = vadd.f32 %v1378_v31, %v5243_v53  ;;  %v1666_v46 = vsel %vm1664_vm0, %v5108_v23, 0.0  ;;  %v1529_v31 = vadd.f32 %v1528_v60, %v5216_v29 }
 0x32f   : > { %v1681_v33 = vadd.f32 %v1665_v7, %v1584_v6  ;;  %v1682_v7 = vadd.f32 %v1666_v46, %v1585_v3  ;;  %v1430_v6 = vpop.f32.mrf.mxu3  ;;  %v1479_v28 = vpop.f32.mrf.mxu0  ;;  %v1667_v60 = vsel %vm1664_vm0, %v5159_v26, 0.0  ;;  %v1908_v3 = vsel %vm1907_vm4, %v1876_v15, 0.0 }
 0x330   : > { %v5604_v35 = vpop.xlane.xlu1 %2039  ;;  %v1586_v26 = vsel %vm1583_vm1, %v5157_v21, 0.0  ;;  %v1668_v15 = vsel %vm1664_vm0, %v5205_v4, 0.0  ;;  %v1909_v43 = vsel %vm1907_vm4, %v1878_v34, 0.0  ;;  %v1587_v21 = vsel %vm1583_vm1, %v5181_v24, 0.0 }
 0x331   : > { %v5609_v13 = vpop.xlane.xlu0 %2122  ;;  %v1762_v37 = vadd.f32 %v1746_v36, %v1681_v33  ;;  %v1763_v33 = vadd.f32 %v1747_v58, %v1682_v7  ;;  %v1480_v36 = vadd.f32 %v1479_v28, %v5223_v63  ;;  %v1431_v4 = vadd.f32 %v1430_v6, %v5208_v32 }
 0x332   : > { %v1989_v34 = vsel %vm1988_vm5, %v5560_v40, 0.0  ;;  %v1669_v40 = vsel %vm1664_vm0, %v5201_v47, 0.0 }
 0x333   : > { %2144 = vadd.xlane.f32.xlu2 %v5612_v5  ;;  %v5693_v24 = vmul.f32 %v5162_v48, %v1480_v36  ;;  %v1588_v36 = vsel %vm1583_vm1, %v5177_v0, 0.0 }
 0x335   : > { %1899 = vadd.xlane.f32.xlu1 %v5619_v54  ;;  %v1827_v54 = vsel %vm1826_vm3, %v5066_v52, 0.0  ;;  %v5662_v52 = vmul.f32 %v5162_v48, %v1529_v31  ;;  %v1684_v31 = vadd.f32 %v1668_v15, %v1587_v21  ;;  %v5707_v15 = vmul.f32 %v5162_v48, %v1431_v4 }
 0x336   : > { %1982 = vadd.xlane.f32.xlu0 %v5625_v2  ;;  %v5633_v9 = vpop.xlane.xlu2 %2041  ;;  %v5644_v2 = vmul.f32 %v5138_v1, %v1379_v56  ;;  %v5659_v56 = vmul.f32 %v5138_v1, %v1477_v38  ;;  %v1843_v46 = vadd.f32 %v1827_v54, %v1762_v37  ;;  %v1381_v1 = vpop.f32.mrf.mxu2  ;;  %v1683_v54 = vadd.f32 %v1667_v60, %v1586_v26 }
 0x337   : > { %7092 = vst [vmem:[#allocation150_spill] sm:$0xff] %v5662_v52  ;;  %v1844_v37 = vadd.f32 %v1828_v19, %v1763_v33  ;;  %v1382_v58 = vadd.f32 %v1381_v1, %v5243_v53  ;;  %v1748_v60 = vsel %vm1745_vm2, %v5133_v59, 0.0  ;;  %v1432_v33 = vpop.f32.mrf.mxu3  ;;  %v1829_v26 = vsel %vm1826_vm3, %v5129_v10, 0.0 }
 0x338   : > { %v5641_v5 = vpop.xlane.xlu1 %1960  ;;  %v1924_v7 = vadd.f32 %v1908_v3, %v1843_v46  ;;  %v1764_v6 = vadd.f32 %v1748_v60, %v1683_v54  ;;  %v1749_v59 = vsel %vm1745_vm2, %v5153_v57, 0.0  ;;  %v1530_v54 = vpop.f32.mrf.mxu1  ;;  %v1990_v10 = vsel %vm1988_vm5, %v5587_v22, 0.0 }
 0x339   : > { %v1880_v23 = vpop.xlane.xlu0 %1879  ;;  %v1925_v3 = vadd.f32 %v1909_v43, %v1844_v37  ;;  %v1765_v1 = vadd.f32 %v1749_v59, %v1684_v31  ;;  %v5716_v57 = vmul.f32 %v5162_v48, %v1382_v58  ;;  %v1433_v47 = vadd.f32 %v1432_v33, %v5208_v32 }
 0x33a   : > { %v2005_v19 = vadd.f32 %v1989_v34, %v1924_v7  ;;  %v1481_v7 = vpop.f32.mrf.mxu0  ;;  %v2070_v43 = vsel %vm2069_vm6, %v5568_v12, 0.0  ;;  %v1910_v0 = vsel %vm1907_vm4, %v1880_v23, 0.0  ;;  %v1685_v4 = vadd.f32 %v1669_v40, %v1588_v36 }
 0x33b   : > { %1901 = vadd.xlane.f32.xlu2 %v5644_v2  ;;  %v2006_v21 = vadd.f32 %v1990_v10, %v1925_v3  ;;  %v1845_v37 = vadd.f32 %v1829_v26, %v1764_v6  ;;  %v1830_v32 = vsel %vm1826_vm3, %v5183_v16, 0.0  ;;  %v1750_v12 = vsel %vm1745_vm2, %v5210_v44, 0.0 }
 0x33c   : > { %v2086_v22 = vadd.f32 %v2070_v43, %v2005_v19  ;;  %v1531_v23 = vadd.f32 %v1530_v54, %v5216_v29  ;;  %v1482_v31 = vadd.f32 %v1481_v7, %v5223_v63  ;;  %v2071_v58 = vsel %vm2069_vm6, %v5604_v35, 0.0  ;;  %v5749_v35 = vld [vmem:[%s6820_s7] ss:$0 sm:$0xff] }
 0x33d   : > { %2063 = vadd.xlane.f32.xlu1 %v5659_v56  ;;  %v1926_v60 = vadd.f32 %v1910_v0, %v1845_v37  ;;  %v1846_v3 = vadd.f32 %v1830_v32, %v1765_v1  ;;  %v2151_v6 = vsel %vm2150_vm7, %v5566_v27, 0.0  ;;  %v2087_v16 = vadd.f32 %v2071_v58, %v2006_v21 }
 0x33e   : > { %2146 = vadd.xlane.f32.xlu0 %v5662_v52  ;;  %v1963_v38 = vpop.xlane.xlu2 %1962  ;;  %v5744_v29 = vmul.f32 %v5193_v41, %v1433_v47  ;;  %v1766_v63 = vadd.f32 %v1750_v12, %v1685_v4  ;;  %v2167_v26 = vadd.f32 %v2151_v6, %v2086_v22  ;;  %v1831_v27 = vsel %vm1826_vm3, %v5235_v30, 0.0  ;;  %v1383_v1 = vpop.f32.mrf.mxu2 }
 0x33f   : > { %v1991_v59 = vsel %vm1988_vm5, %v5641_v5, 0.0  ;;  %v1992_v40 = vsel %vm1988_vm5, %v1963_v38, 0.0  ;;  %v5761_v36 = vmul.f32 %v5193_v41, %v1531_v23  ;;  %v2152_v54 = vsel %vm2150_vm7, %v5583_v50, 0.0 }
 0x340   : > { %v5684_v28 = vpop.xlane.xlu1 %2124  ;;  %7093 = vst [vmem:[#allocation151_spill] sm:$0xff] %v5744_v29  ;;  %v2007_v10 = vadd.f32 %v1991_v59, %v1926_v60  ;;  %v5767_v30 = vmul.f32 %v5193_v41, %v1482_v31  ;;  %v2168_v47 = vadd.f32 %v2152_v54, %v2087_v16  ;;  %v1847_v38 = vadd.f32 %v1831_v27, %v1766_v63 }
 0x341   : > { %v2044_v46 = vpop.xlane.xlu0 %2043  ;;  %7094 = vst [vmem:[#allocation152_spill] sm:$0xff] %v5761_v36  ;;  %v1589_v43 = vsel %vm1583_vm1, %v5253_v39, 0.0  ;;  %v5777_v0 = vadd.f32 %v5749_v35, %v2167_v26  ;;  %v1384_v4 = vadd.f32 %v1383_v1, %v5243_v53  ;;  %v1670_v39 = vsel %vm1664_vm0, %v5237_v42, 0.0 }
 0x342   : > { %7095 = vst [vmem:[#allocation153_spill] sm:$0xff] %v5767_v30  ;;  %v2073_v5 = vsel %vm2069_vm6, %v2044_v46, 0.0  ;;  %v2072_v46 = vsel %vm2069_vm6, %v5633_v9, 0.0  ;;  %v1686_v23 = vadd.f32 %v1670_v39, %v1589_v43  ;;  %v2154_v53 = vsel %vm2150_vm7, %v5684_v28, 0.0 }
 0x343   : > { %2065 = vadd.xlane.f32.xlu2 %v5693_v24  ;;  %v2088_v37 = vadd.f32 %v2072_v46, %v2007_v10  ;;  %v5794_v58 = vadd.f32 %v5749_v35, %v2168_v47  ;;  %v5804_v28 = vmul.f32 %v5193_v41, %v1384_v4  ;;  %v1751_v16 = vsel %vm1745_vm2, %v5257_v49, 0.0 }
 0x344   : > { %v1767_v63 = vadd.f32 %v1751_v16, %v1686_v23  ;;  %v1832_v49 = vsel %vm1826_vm3, %v5231_v14, 0.0  ;;  %v1671_v46 = vsel %vm1664_vm0, %v5277_v11, 0.0  ;;  %v1752_v23 = vsel %vm1745_vm2, %v5273_v18, 0.0 }
 0x345   : > { %1984 = vadd.xlane.f32.xlu1 %v5707_v15  ;;  %7096 = vst [vmem:[#allocation154_spill] sm:$0xff] %v5804_v28  ;;  %v1833_v18 = vsel %vm1826_vm3, %v5259_v55, 0.0  ;;  %v1834_v55 = vsel %vm1826_vm3, %v5298_v8, 0.0 }
 0x346   : > { %1903 = vadd.xlane.f32.xlu0 %v5716_v57  ;;  %v2127_v48 = vpop.xlane.xlu2 %2126 }
 0x348   : > { %v1882_v34 = vpop.xlane.xlu1 %1881 }
 0x349   : > { %v1911_v33 = vsel %vm1907_vm4, %v1882_v34, 0.0  ;;  %v1965_v44 = vpop.xlane.xlu0 %1964  ;;  %v2204_v34 = vsel %vm2203_vm8, %v5777_v0, -inf }
 0x34a   : > { %v1927_v19 = vadd.f32 %v1911_v33, %v1846_v3  ;;  %v1993_v31 = vsel %vm1988_vm5, %v1965_v44, 0.0  ;;  %v2153_v3 = vsel %vm2150_vm7, %v5609_v13, 0.0  ;;  %v2207_v13 = vsel %vm2203_vm8, %v5794_v58, -inf }
 0x34b   : > { %1986 = vadd.xlane.f32.xlu2 %v5744_v29  ;;  %v2169_v44 = vadd.f32 %v2153_v3, %v2088_v37 }
 0x34c   : > { %v2008_v7 = vadd.f32 %v1992_v40, %v1927_v19  ;;  %v2155_v19 = vsel %vm2150_vm7, %v2127_v48, 0.0  ;;  %v1848_v48 = vadd.f32 %v1832_v49, %v1767_v63 }
 0x34d   : > { %2148 = vadd.xlane.f32.xlu1 %v5761_v36  ;;  %v5821_v40 = vadd.f32 %v5749_v35, %v2169_v44 }
 0x34e   : > { %v2089_v21 = vadd.f32 %v2073_v5, %v2008_v7  ;;  %2067 = vadd.xlane.f32.xlu0 %v5767_v30  ;;  %v1884_v50 = vpop.xlane.xlu2 %1883 }
 0x34f   : > { %v1912_v22 = vsel %vm1907_vm4, %v1884_v50, 0.0  ;;  %v2210_v5 = vsel %vm2203_vm8, %v5821_v40, -inf }
 0x350   : > { %v1928_v32 = vadd.f32 %v1912_v22, %v1847_v38  ;;  %v2046_v12 = vpop.xlane.xlu1 %2045  ;;  %v2170_v42 = vadd.f32 %v2154_v53, %v2089_v21  ;;  %v1590_v38 = vsel %vm1583_vm1, %v5279_v45, 0.0  ;;  %v1591_v53 = vsel %vm1583_vm1, %v5319_v62, 0.0 }
 0x351   : > { %v2129_v9 = vpop.xlane.xlu0 %2128  ;;  %v2074_v6 = vsel %vm2069_vm6, %v2046_v12, 0.0  ;;  %v1687_v39 = vadd.f32 %v1671_v46, %v1590_v38 }
 0x352   : > { %v2009_v60 = vadd.f32 %v1993_v31, %v1928_v32  ;;  %v5815_v27 = vadd.f32 %v5749_v35, %v2170_v42  ;;  %v2156_v37 = vsel %vm2150_vm7, %v2129_v9, 0.0 }
 0x353   : > { %2205 = vmax.xlane.f32.xlu2 %v2204_v34  ;;  %v1768_v11 = vadd.f32 %v1752_v23, %v1687_v39 }
 0x354   : > { %v2090_v33 = vadd.f32 %v2074_v6, %v2009_v60  ;;  %v2213_v7 = vsel %vm2203_vm8, %v5815_v27, -inf  ;;  %v1672_v60 = vsel %vm1664_vm0, %v5294_v51, 0.0  ;;  %v1753_v6 = vsel %vm1745_vm2, %v5300_v25, 0.0 }
 0x355   : > { %1905 = vadd.xlane.f32.xlu1 %v5804_v28  ;;  %v1688_v34 = vadd.f32 %v1672_v60, %v1591_v53  ;;  %v1849_v62 = vadd.f32 %v1833_v18, %v1768_v11  ;;  %v1592_v25 = vsel %vm1583_vm1, %v5336_v20, 0.0 }
 0x356   : > { %v2171_v26 = vadd.f32 %v2155_v19, %v2090_v33  ;;  %2208 = vmax.xlane.f32.xlu0 %v2207_v13  ;;  %v2048_v41 = vpop.xlane.xlu2 %2047 }
 0x357   : > { %v2075_v50 = vsel %vm2069_vm6, %v2048_v41, 0.0  ;;  %v1769_v33 = vadd.f32 %v1753_v6, %v1688_v34 }
 0x358   : > { %v1967_v59 = vpop.xlane.xlu1 %1966  ;;  %v5824_v54 = vadd.f32 %v5749_v35, %v2171_v26 }
 0x359   : > { %v1886_v1 = vpop.xlane.xlu0 %1885  ;;  %v1994_v14 = vsel %vm1988_vm5, %v1967_v59, 0.0  ;;  %v1850_v49 = vadd.f32 %v1834_v55, %v1769_v33 }
 0x35a   : > { %v1913_v10 = vsel %vm1907_vm4, %v1886_v1, 0.0  ;;  %v2216_v21 = vsel %vm2203_vm8, %v5824_v54, -inf  ;;  %v7097_v1 = vld [vmem:[#allocation93_spill] sm:$0xff] }
 0x35b   : > { %v1929_v47 = vadd.f32 %v1913_v10, %v1848_v48  ;;  %2214 = vmax.xlane.f32.xlu2 %v2213_v7  ;;  %v1673_v8 = vsel %vm1664_vm0, %v7097_v1, 0.0 }
 0x35d   : > { %v2010_v43 = vadd.f32 %v1994_v14, %v1929_v47  ;;  %2211 = vmax.xlane.f32.xlu1 %v2210_v5  ;;  %v1689_v14 = vadd.f32 %v1673_v8, %v1592_v25 }
 0x35e   : > { %2217 = vmax.xlane.f32.xlu0 %v2216_v21  ;;  %v1969_v4 = vpop.xlane.xlu2 %1968 }
 0x35f   : > { %v2091_v22 = vadd.f32 %v2075_v50, %v2010_v43  ;;  %v1995_v63 = vsel %vm1988_vm5, %v1969_v4, 0.0  ;;  %v7098_v50 = vld [vmem:[#allocation97_spill] sm:$0xff] }
 0x360   : > { %v2131_v45 = vpop.xlane.xlu1 %2130  ;;  %v1754_v4 = vsel %vm1745_vm2, %v7098_v50, 0.0 }
 0x361   : > { %v2050_v32 = vpop.xlane.xlu0 %2049  ;;  %v2172_v12 = vadd.f32 %v2156_v37, %v2091_v22  ;;  %v2157_v59 = vsel %vm2150_vm7, %v2131_v45, 0.0  ;;  %v1770_v39 = vadd.f32 %v1754_v4, %v1689_v14 }
 0x362   : > { %v2076_v13 = vsel %vm2069_vm6, %v2050_v32, 0.0 }
 0x363   : > { %v5853_v31 = vadd.f32 %v5749_v35, %v2172_v12  ;;  %v7099_v12 = vld [vmem:[#allocation92_spill] sm:$0xff] }
 0x364   : > { %v1835_v23 = vsel %vm1826_vm3, %v7099_v12, 0.0 }
 0x365   : > { %v2219_v9 = vsel %vm2203_vm8, %v5853_v31, -inf  ;;  %v1851_v60 = vadd.f32 %v1835_v23, %v1770_v39 }
 0x366   : > { %2220 = vmax.xlane.f32.xlu1 %v2219_v9  ;;  %v2133_v42 = vpop.xlane.xlu2 %2132 }
 0x367   : > { %v2158_v37 = vsel %vm2150_vm7, %v2133_v42, 0.0 }
 0x368   : > { %v1888_v3 = vpop.xlane.xlu1 %1887 }
 0x369   : > { %v1914_v16 = vsel %vm1907_vm4, %v1888_v3, 0.0  ;;  %v1971_v51 = vpop.xlane.xlu0 %1970 }
 0x36a   : > { %v1930_v44 = vadd.f32 %v1914_v16, %v1849_v62  ;;  %v1996_v20 = vsel %vm1988_vm5, %v1971_v51, 0.0  ;;  %v7100_v62 = vld [vmem:[#allocation104_spill] sm:$0xff] }
 0x36b   : > { %v1593_v6 = vsel %vm1583_vm1, %v7100_v62, 0.0 }
 0x36c   : > { %v2011_v19 = vadd.f32 %v1995_v63, %v1930_v44  ;;  %v7101_v44 = vld [vmem:[#allocation103_spill] sm:$0xff] }
 0x36d   : > { %v1674_v63 = vsel %vm1664_vm0, %v7101_v44, 0.0 }
 0x36e   : > { %v2092_v26 = vadd.f32 %v2076_v13, %v2011_v19  ;;  %v1890_v41 = vpop.xlane.xlu2 %1889  ;;  %v1690_v55 = vadd.f32 %v1674_v63, %v1593_v6 }
 0x36f   : > { %v1915_v48 = vsel %vm1907_vm4, %v1890_v41, 0.0 }
 0x370   : > { %v1931_v10 = vadd.f32 %v1915_v48, %v1850_v49  ;;  %v2052_v7 = vpop.xlane.xlu1 %2051  ;;  %v2173_v47 = vadd.f32 %v2157_v59, %v2092_v26  ;;  %v7102_v49 = vld [vmem:[#allocation102_spill] sm:$0xff]  ;;  %v7103_v48 = vld [vmem:[#allocation115_spill] sm:$0xff] }
 0x371   : > { %v2135_v5 = vpop.xlane.xlu0 %2134  ;;  %v2077_v21 = vsel %vm2069_vm6, %v2052_v7, 0.0  ;;  %v1755_v59 = vsel %vm1745_vm2, %v7102_v49, 0.0  ;;  %v1594_v1 = vsel %vm1583_vm1, %v7103_v48, 0.0  ;;  %v7104_v7 = vld [vmem:[#allocation108_spill] sm:$0xff] }
 0x372   : > { %v2012_v38 = vadd.f32 %v1996_v20, %v1931_v10  ;;  %v5888_v43 = vadd.f32 %v5749_v35, %v2173_v47  ;;  %v2159_v13 = vsel %vm2150_vm7, %v2135_v5, 0.0  ;;  %v1771_v10 = vadd.f32 %v1755_v59, %v1690_v55  ;;  %v7108_v59 = vld [vmem:[#allocation114_spill] sm:$0xff] }
 0x373   : > { %v1675_v47 = vsel %vm1664_vm0, %v7104_v7, 0.0  ;;  %v1838_v48 = vsel %vm1826_vm3, %v7108_v59, 0.0  ;;  %v7109_v7 = vld [vmem:[#allocation120_spill] sm:$0xff] }
 0x374   : > { %v2093_v46 = vadd.f32 %v2077_v21, %v2012_v38  ;;  %v2222_v22 = vsel %vm2203_vm8, %v5888_v43, -inf  ;;  %v1691_v20 = vadd.f32 %v1675_v47, %v1594_v1  ;;  %v7105_v38 = vld [vmem:[#allocation98_spill] sm:$0xff]  ;;  %v1854_v47 = vadd.f32 %v1838_v48, %v7109_v7 }
 0x375   : > { %2223 = vmax.xlane.f32.xlu2 %v2222_v22  ;;  %v1836_v21 = vsel %vm1826_vm3, %v7105_v38, 0.0 }
 0x376   : > { %v2174_v45 = vadd.f32 %v2158_v37, %v2093_v46  ;;  %v2054_v32 = vpop.xlane.xlu2 %2053  ;;  %v1852_v4 = vadd.f32 %v1836_v21, %v1771_v10  ;;  %v7106_v46 = vld [vmem:[#allocation110_spill] sm:$0xff] }
 0x377   : > { %v2078_v51 = vsel %vm2069_vm6, %v2054_v32, 0.0  ;;  %v1756_v22 = vsel %vm1745_vm2, %v7106_v46, 0.0 }
 0x378   : > { %v1973_v53 = vpop.xlane.xlu1 %1972  ;;  %v5903_v11 = vadd.f32 %v5749_v35, %v2174_v45  ;;  %v1772_v45 = vadd.f32 %v1756_v22, %v1691_v20 }
 0x379   : > { %v1892_v9 = vpop.xlane.xlu0 %1891  ;;  %v1997_v3 = vsel %vm1988_vm5, %v1973_v53, 0.0  ;;  %v7107_v53 = vld [vmem:[#allocation109_spill] sm:$0xff] }
 0x37a   : > { %v1916_v34 = vsel %vm1907_vm4, %v1892_v9, 0.0  ;;  %v2225_v18 = vsel %vm2203_vm8, %v5903_v11, -inf }
 0x37b   : > { %v1932_v42 = vadd.f32 %v1916_v34, %v1851_v60  ;;  %2226 = vmax.xlane.f32.xlu0 %v2225_v18  ;;  %v1837_v60 = vsel %vm1826_vm3, %v7107_v53, 0.0 }
 0x37d   : > { %v2013_v16 = vadd.f32 %v1997_v3, %v1932_v42  ;;  %v1853_v42 = vadd.f32 %v1837_v60, %v1772_v45 }
 0x37e   : > { %v1975_v33 = vpop.xlane.xlu2 %1974 }
 0x37f   : > { %v2094_v19 = vadd.f32 %v2078_v51, %v2013_v16  ;;  %v1998_v12 = vsel %vm1988_vm5, %v1975_v33, 0.0 }
 0x380   : > { %v2137_v25 = vpop.xlane.xlu1 %2136 }
 0x381   : > { %v2056_v26 = vpop.xlane.xlu0 %2055  ;;  %v2175_v41 = vadd.f32 %v2159_v13, %v2094_v19  ;;  %v2160_v3 = vsel %vm2150_vm7, %v2137_v25, 0.0 }
 0x382   : > { %v2079_v9 = vsel %vm2069_vm6, %v2056_v26, 0.0 }
 0x383   : > { %v5928_v8 = vadd.f32 %v5749_v35, %v2175_v41 }
 0x385   : > { %v2228_v14 = vsel %vm2203_vm8, %v5928_v8, -inf }
 0x386   : > { %2229 = vmax.xlane.f32.xlu1 %v2228_v14  ;;  %v2139_v5 = vpop.xlane.xlu2 %2138 }
 0x387   : > { %v2161_v26 = vsel %vm2150_vm7, %v2139_v5, 0.0 }
 0x388   : > { %v1894_v50 = vpop.xlane.xlu1 %1893 }
 0x389   : > { %v1917_v39 = vsel %vm1907_vm4, %v1894_v50, 0.0  ;;  %v1977_v37 = vpop.xlane.xlu0 %1976 }
 0x38a   : > { %v1933_v32 = vadd.f32 %v1917_v39, %v1852_v4  ;;  %v1999_v33 = vsel %vm1988_vm5, %v1977_v37, 0.0 }
 0x38c   : > { %v2014_v23 = vadd.f32 %v1998_v12, %v1933_v32 }
 0x38e   : > { %v2095_v34 = vadd.f32 %v2079_v9, %v2014_v23  ;;  %v1896_v18 = vpop.xlane.xlu2 %1895 }
 0x38f   : > { %v1918_v62 = vsel %vm1907_vm4, %v1896_v18, 0.0  ;;  %v7110_v18 = vld [vmem:[#allocation126_spill] sm:$0xff] }
 0x390   : > { %v1934_v6 = vadd.f32 %v1918_v62, %v1853_v42  ;;  %v2058_v16 = vpop.xlane.xlu1 %2057  ;;  %v2176_v51 = vadd.f32 %v2160_v3, %v2095_v34 }
 0x391   : > { %v2141_v44 = vpop.xlane.xlu0 %2140  ;;  %v2080_v55 = vsel %vm2069_vm6, %v2058_v16, 0.0 }
 0x392   : > { %v2015_v63 = vadd.f32 %v1999_v33, %v1934_v6  ;;  %v5957_v19 = vadd.f32 %v5749_v35, %v2176_v51  ;;  %v2162_v39 = vsel %vm2150_vm7, %v2141_v44, 0.0 }
 0x394   : > { %v2096_v13 = vadd.f32 %v2080_v55, %v2015_v63  ;;  %v2231_v25 = vsel %vm2203_vm8, %v5957_v19, -inf }
 0x395   : > { %2232 = vmax.xlane.f32.xlu2 %v2231_v25 }
 0x396   : > { %v2177_v41 = vadd.f32 %v2161_v26, %v2096_v13  ;;  %v2060_v49 = vpop.xlane.xlu2 %2059 }
 0x397   : > { %v2081_v4 = vsel %vm2069_vm6, %v2060_v49, 0.0 }
 0x398   : > { %v1979_v1 = vpop.xlane.xlu1 %1978  ;;  %v5969_v10 = vadd.f32 %v5749_v35, %v2177_v41 }
 0x399   : > { %v1898_v14 = vpop.xlane.xlu0 %1897  ;;  %v2000_v21 = vsel %vm1988_vm5, %v1979_v1, 0.0 }
 0x39a   : > { %v1919_v20 = vsel %vm1907_vm4, %v1898_v14, 0.0  ;;  %v2234_v5 = vsel %vm2203_vm8, %v5969_v10, -inf }
 0x39b   : > { %v1935_v38 = vadd.f32 %v1919_v20, %v1854_v47  ;;  %2235 = vmax.xlane.f32.xlu0 %v2234_v5 }
 0x39d   : > { %v2016_v50 = vadd.f32 %v2000_v21, %v1935_v38 }
 0x39e   : > { %v1981_v46 = vpop.xlane.xlu2 %1980 }
 0x39f   : > { %v2097_v22 = vadd.f32 %v2081_v4, %v2016_v50  ;;  %v2001_v3 = vsel %vm1988_vm5, %v1981_v46, 0.0  ;;  %v7111_v50 = vld [vmem:[#allocation136_spill] sm:$0xff] }
 0x3a0   : > { %v2143_v37 = vpop.xlane.xlu1 %2142 }
 0x3a1   : > { %v2062_v45 = vpop.xlane.xlu0 %2061  ;;  %v2178_v32 = vadd.f32 %v2162_v39, %v2097_v22  ;;  %v2163_v33 = vsel %vm2150_vm7, %v2143_v37, 0.0 }
 0x3a2   : > { %v2082_v6 = vsel %vm2069_vm6, %v2062_v45, 0.0 }
 0x3a3   : > { %v5983_v12 = vadd.f32 %v5749_v35, %v2178_v32 }
 0x3a5   : > { %v2237_v23 = vsel %vm2203_vm8, %v5983_v12, -inf }
 0x3a6   : > { %2238 = vmax.xlane.f32.xlu1 %v2237_v23  ;;  %v2145_v53 = vpop.xlane.xlu2 %2144 }
 0x3a8   : > { %v1900_v60 = vpop.xlane.xlu1 %1899 }
 0x3a9   : > { %v1920_v9 = vsel %vm1907_vm4, %v1900_v60, 0.0  ;;  %v1983_v34 = vpop.xlane.xlu0 %1982 }
 0x3aa   : > { %v1936_v42 = vadd.f32 %v1920_v9, %v7110_v18  ;;  %v2002_v25 = vsel %vm1988_vm5, %v1983_v34, 0.0 }
 0x3ac   : > { %v2017_v62 = vadd.f32 %v2001_v3, %v1936_v42 }
 0x3ae   : > { %v2098_v16 = vadd.f32 %v2082_v6, %v2017_v62  ;;  %v1902_v51 = vpop.xlane.xlu2 %1901 }
 0x3af   : > { %v1921_v44 = vsel %vm1907_vm4, %v1902_v51, 0.0 }
 0x3b0   : > { %v1937_v63 = vadd.f32 %v1921_v44, %v5510_v61  ;;  %v2064_v55 = vpop.xlane.xlu1 %2063  ;;  %v2179_v13 = vadd.f32 %v2163_v33, %v2098_v16  ;;  %v2164_v61 = vsel %vm2150_vm7, %v2145_v53, 0.0  ;;  %v7112_v44 = vld [vmem:[#allocation140_spill] sm:$0xff] }
 0x3b1   : > { %v2147_v26 = vpop.xlane.xlu0 %2146  ;;  %v2083_v59 = vsel %vm2069_vm6, %v2064_v55, 0.0 }
 0x3b2   : > { %v2018_v41 = vadd.f32 %v2002_v25, %v1937_v63  ;;  %v6002_v49 = vadd.f32 %v5749_v35, %v2179_v13  ;;  %v2165_v32 = vsel %vm2150_vm7, %v2147_v26, 0.0 }
 0x3b4   : > { %v2099_v48 = vadd.f32 %v2083_v59, %v2018_v41  ;;  %v2240_v1 = vsel %vm2203_vm8, %v6002_v49, -inf }
 0x3b5   : > { %2241 = vmax.xlane.f32.xlu2 %v2240_v1 }
 0x3b6   : > { %v2180_v7 = vadd.f32 %v2164_v61, %v2099_v48  ;;  %v2066_v47 = vpop.xlane.xlu2 %2065 }
 0x3b7   : > { %v2084_v39 = vsel %vm2069_vm6, %v2066_v47, 0.0 }
 0x3b8   : > { %v1985_v14 = vpop.xlane.xlu1 %1984  ;;  %v6011_v20 = vadd.f32 %v5749_v35, %v2180_v7 }
 0x3b9   : > { %v1904_v5 = vpop.xlane.xlu0 %1903  ;;  %v2003_v46 = vsel %vm1988_vm5, %v1985_v14, 0.0 }
 0x3ba   : > { %v1922_v38 = vsel %vm1907_vm4, %v1904_v5, 0.0  ;;  %v2243_v21 = vsel %vm2203_vm8, %v6011_v20, -inf }
 0x3bb   : > { %v1938_v4 = vadd.f32 %v1922_v38, %v7111_v50  ;;  %2244 = vmax.xlane.f32.xlu0 %v2243_v21 }
 0x3bd   : > { %v2019_v22 = vadd.f32 %v2003_v46, %v1938_v4 }
 0x3be   : > { %v1987_v37 = vpop.xlane.xlu2 %1986 }
 0x3bf   : > { %v2100_v45 = vadd.f32 %v2084_v39, %v2019_v22  ;;  %v2004_v13 = vsel %vm1988_vm5, %v1987_v37, 0.0 }
 0x3c0   : > { %v2149_v23 = vpop.xlane.xlu1 %2148 }
 0x3c1   : > { %v2068_v53 = vpop.xlane.xlu0 %2067  ;;  %v2181_v60 = vadd.f32 %v2165_v32, %v2100_v45  ;;  %v2166_v61 = vsel %vm2150_vm7, %v2149_v23, 0.0 }
 0x3c2   : > { %v2085_v41 = vsel %vm2069_vm6, %v2068_v53, 0.0 }
 0x3c3   : > { %v6025_v9 = vadd.f32 %v5749_v35, %v2181_v60 }
 0x3c5   : > { %v2246_v34 = vsel %vm2203_vm8, %v6025_v9, -inf }
 0x3c6   : > { %2247 = vmax.xlane.f32.xlu1 %v2246_v34  ;;  %v2206_v18 = vpop.xlane.xlu2 %2205 }
 0x3c7   : > { %v2252_v42 = vsub.f32 %v5777_v0, %v2206_v18  ;;  %vm2396_vm9 = vcmp.eq.f32.partialorder %v5777_v0, %v2206_v18 }
 0x3c8   : > { %v1906_v3 = vpop.xlane.xlu1 %1905  ;;  %v2412_v62 = vsel %vm2396_vm9, %v5412_v17, 8 }
 0x3c9   : > { %v1923_v6 = vsel %vm1907_vm4, %v1906_v3, 0.0  ;;  %v2268_v16 = vmul.f32 1.442695, %v2252_v42  ;;  %v2209_v51 = vpop.xlane.xlu0 %2208  ;;  %v6035_v33 = vsel %vm2203_vm8, %v2412_v62, 2147483647 }
 0x3ca   : > { %v1939_v63 = vadd.f32 %v1923_v6, %v7112_v44  ;;  %v2253_v55 = vsub.f32 %v5794_v58, %v2209_v51  ;;  %v2430_v0 = vshra.s32 %v6035_v33, 16  ;;  %vm2397_vm10 = vcmp.eq.f32.partialorder %v5794_v58, %v2209_v51 }
 0x3cb   : > { %4154 = vpow2.f32 %v2268_v16  ;;  %v2413_v5 = vsel %vm2397_vm10, %v5412_v17, 8 }
 0x3cc   : > { %v2020_v25 = vadd.f32 %v2004_v13, %v1939_v63  ;;  %v2270_v26 = vmul.f32 1.442695, %v2253_v55  ;;  %v6044_v59 = vcvt.s32.f32 %v2430_v0 }
 0x3ce   : > { %v2101_v48 = vadd.f32 %v2085_v41, %v2020_v25  ;;  %4156 = vpow2.f32 %v2270_v26  ;;  %v2215_v1 = vpop.xlane.xlu2 %2214  ;;  %2433 = vmin.xlane.f32.xlu1 %v6044_v59 }
 0x3cf   : > { %vm2399_vm11 = vcmp.eq.f32.partialorder %v5815_v27, %v2215_v1  ;;  %v2255_v38 = vsub.f32 %v5815_v27, %v2215_v1  ;;  %v6070_v27 = vsel %vm2203_vm8, %v2413_v5, 2147483647 }
 0x3d0   : > { %v2212_v7 = vpop.xlane.xlu1 %2211  ;;  %v2182_v47 = vadd.f32 %v2166_v61, %v2101_v48  ;;  %v2415_v46 = vsel %vm2399_vm11, %v5412_v17, 8  ;;  %v2445_v34 = vshra.s32 %v6070_v27, 16 }
 0x3d1   : > { %v6051_v14 = vpop.eup %4154  ;;  %vm2398_vm12 = vcmp.eq.f32.partialorder %v5821_v40, %v2212_v7  ;;  %v2218_v21 = vpop.xlane.xlu0 %2217  ;;  %v2254_v39 = vsub.f32 %v5821_v40, %v2212_v7  ;;  %v2274_v45 = vmul.f32 1.442695, %v2255_v38  ;;  %v6077_v60 = vsel %vm2203_vm8, %v2415_v46, 2147483647 }
 0x3d2   : > { %v2414_v58 = vsel %vm2398_vm12, %v5412_v17, 8  ;;  %v2300_v50 = vsel %vm2203_vm8, %v6051_v14, 0.0  ;;  %v6067_v37 = vadd.f32 %v5749_v35, %v2182_v47  ;;  %v2256_v32 = vsub.f32 %v5824_v54, %v2218_v21 }
 0x3d3   : > { %v6060_v4 = vsel %vm2203_vm8, %v2414_v58, 2147483647  ;;  %2301 = vadd.xlane.f32.xlu0 %v2300_v50  ;;  %v2272_v35 = vmul.f32 1.442695, %v2254_v39  ;;  %4158 = vpow2.f32 %v2274_v45  ;;  %v2475_v62 = vshra.s32 %v6077_v60, 16 }
 0x3d4   : > { %v6063_v22 = vpop.eup %4156  ;;  %v2460_v53 = vshra.s32 %v6060_v4, 16  ;;  %v2249_v40 = vsel %vm2203_vm8, %v6067_v37, -inf  ;;  %v2276_v18 = vmul.f32 1.442695, %v2256_v32  ;;  %v6087_v6 = vcvt.s32.f32 %v2445_v34 }
 0x3d5   : > { %v2303_v23 = vsel %vm2203_vm8, %v6063_v22, 0.0  ;;  %2250 = vmax.xlane.f32.xlu2 %v2249_v40  ;;  %4160 = vpow2.f32 %v2272_v35  ;;  %v6089_v16 = vcvt.s32.f32 %v2475_v62  ;;  %vm2400_vm14 = vcmp.eq.f32.partialorder %v5824_v54, %v2218_v21 }
 0x3d6   : > { %2304 = vadd.xlane.f32.xlu1 %v2303_v23  ;;  %v6082_v3 = vcvt.s32.f32 %v2460_v53  ;;  %4162 = vpow2.f32 %v2276_v18  ;;  %v2416_v25 = vsel %vm2400_vm14, %v5412_v17, 8 }
 0x3d7   : > { %v6110_v48 = vsel %vm2203_vm8, %v2416_v25, 2147483647 }
 0x3d8   : > { %v2490_v5 = vshra.s32 %v6110_v48, 16 }
 0x3d9   : > { %v2221_v42 = vpop.xlane.xlu1 %2220  ;;  %v6091_v51 = vpop.eup %4158 }
 0x3da   : > { %vm2401_vm13 = vcmp.eq.f32.partialorder %v5853_v31, %v2221_v42  ;;  %v2309_v13 = vsel %vm2203_vm8, %v6091_v51, 0.0  ;;  %v2257_v26 = vsub.f32 %v5853_v31, %v2221_v42  ;;  %v6127_v46 = vcvt.s32.f32 %v2490_v5 }
 0x3db   : > { %2463 = vmin.xlane.f32.xlu0 %v6082_v3  ;;  %v2417_v44 = vsel %vm2401_vm13, %v5412_v17, 8  ;;  %v6097_v63 = vpop.eup %4160 }
 0x3dc   : > { %v6100_v55 = vsel %vm2203_vm8, %v2417_v44, 2147483647  ;;  %v6104_v0 = vpop.eup %4162  ;;  %v2306_v54 = vsel %vm2203_vm8, %v6097_v63, 0.0  ;;  %v2278_v61 = vmul.f32 1.442695, %v2257_v26 }
 0x3dd   : > { %2448 = vmin.xlane.f32.xlu2 %v6087_v6  ;;  %v2505_v41 = vshra.s32 %v6100_v55, 16  ;;  %v2312_v1 = vsel %vm2203_vm8, %v6104_v0, 0.0 }
 0x3de   : > { %2478 = vmin.xlane.f32.xlu1 %v6089_v16  ;;  %4164 = vpow2.f32 %v2278_v61 }
 0x3df   : > { %v6118_v31 = vcvt.s32.f32 %v2505_v41 }
 0x3e3   : > { %2310 = vadd.xlane.f32.xlu0 %v2309_v13 }
 0x3e4   : > { %v6135_v23 = vpop.eup %4164 }
 0x3e5   : > { %2307 = vadd.xlane.f32.xlu2 %v2306_v54  ;;  %v2315_v18 = vsel %vm2203_vm8, %v6135_v23, 0.0 }
 0x3e6   : > { %2313 = vadd.xlane.f32.xlu1 %v2312_v1 }
 0x3e8   : > { %v2224_v7 = vpop.xlane.xlu2 %2223 }
 0x3e9   : > { %v2258_v47 = vsub.f32 %v5888_v43, %v2224_v7  ;;  %vm2402_vm15 = vcmp.eq.f32.partialorder %v5888_v43, %v2224_v7 }
 0x3ea   : > { %v2418_v38 = vsel %vm2402_vm15, %v5412_v17, 8 }
 0x3eb   : > { %v2280_v58 = vmul.f32 1.442695, %v2258_v47  ;;  %v6123_v21 = vsel %vm2203_vm8, %v2418_v38, 2147483647  ;;  %2508 = vmin.xlane.f32.xlu0 %v6118_v31 }
 0x3ec   : > { %v2520_v50 = vshra.s32 %v6123_v21, 16 }
 0x3ed   : > { %4166 = vpow2.f32 %v2280_v58  ;;  %2493 = vmin.xlane.f32.xlu2 %v6127_v46 }
 0x3ee   : > { %v6129_v39 = vcvt.s32.f32 %v2520_v50  ;;  %v2227_v43 = vpop.xlane.xlu0 %2226 }
 0x3ef   : > { %v2259_v45 = vsub.f32 %v5903_v11, %v2227_v43  ;;  %vm2403_vm0 = vcmp.eq.f32.partialorder %v5903_v11, %v2227_v43 }
 0x3f0   : > { %2523 = vmin.xlane.f32.xlu1 %v6129_v39  ;;  %v2419_v40 = vsel %vm2403_vm0, %v5412_v17, 8 }
 0x3f1   : > { %v2282_v32 = vmul.f32 1.442695, %v2259_v45  ;;  %v6143_v34 = vsel %vm2203_vm8, %v2419_v40, 2147483647 }
 0x3f2   : > { %v2535_v62 = vshra.s32 %v6143_v34, 16 }
 0x3f3   : > { %v6137_v53 = vpop.eup %4166  ;;  %4168 = vpow2.f32 %v2282_v32 }
 0x3f4   : > { %v2318_v35 = vsel %vm2203_vm8, %v6137_v53, 0.0  ;;  %v6158_v54 = vcvt.s32.f32 %v2535_v62 }
 0x3f5   : > { %2319 = vadd.xlane.f32.xlu0 %v2318_v35  ;;  %2316 = vadd.xlane.f32.xlu2 %v2315_v18 }
 0x3f9   : > { %v6147_v11 = vpop.eup %4168  ;;  %v2230_v42 = vpop.xlane.xlu1 %2229 }
 0x3fa   : > { %v2260_v44 = vsub.f32 %v5928_v8, %v2230_v42  ;;  %vm2404_vm1 = vcmp.eq.f32.partialorder %v5928_v8, %v2230_v42  ;;  %v2321_v13 = vsel %vm2203_vm8, %v6147_v11, 0.0 }
 0x3fb   : > { %v2420_v25 = vsel %vm2404_vm1, %v5412_v17, 8  ;;  %2322 = vadd.xlane.f32.xlu1 %v2321_v13 }
 0x3fc   : > { %v2284_v26 = vmul.f32 1.442695, %v2260_v44  ;;  %v6156_v41 = vsel %vm2203_vm8, %v2420_v25, 2147483647 }
 0x3fd   : > { %v2550_v1 = vshra.s32 %v6156_v41, 16  ;;  %2538 = vmin.xlane.f32.xlu2 %v6158_v54 }
 0x3fe   : > { %4170 = vpow2.f32 %v2284_v26 }
 0x3ff   : > { %v6162_v61 = vcvt.s32.f32 %v2550_v1 }
 0x401   : > { %2553 = vmin.xlane.f32.xlu0 %v6162_v61 }
 0x404   : > { %v6165_v8 = vpop.eup %4170 }
 0x405   : > { %v2324_v7 = vsel %vm2203_vm8, %v6165_v8, 0.0 }
 0x406   : > { %2325 = vadd.xlane.f32.xlu2 %v2324_v7 }
 0x408   : > { %v2233_v47 = vpop.xlane.xlu2 %2232 }
 0x409   : > { %v2261_v5 = vsub.f32 %v5957_v19, %v2233_v47  ;;  %vm2405_vm2 = vcmp.eq.f32.partialorder %v5957_v19, %v2233_v47 }
 0x40a   : > { %v2421_v38 = vsel %vm2405_vm2, %v5412_v17, 8 }
 0x40b   : > { %v2286_v58 = vmul.f32 1.442695, %v2261_v5  ;;  %v6173_v50 = vsel %vm2203_vm8, %v2421_v38, 2147483647 }
 0x40c   : > { %v2565_v43 = vshra.s32 %v6173_v50, 16 }
 0x40d   : > { %4172 = vpow2.f32 %v2286_v58 }
 0x40e   : > { %v6176_v45 = vcvt.s32.f32 %v2565_v43  ;;  %v2236_v32 = vpop.xlane.xlu0 %2235 }
 0x40f   : > { %v2262_v40 = vsub.f32 %v5969_v10, %v2236_v32  ;;  %vm2406_vm3 = vcmp.eq.f32.partialorder %v5969_v10, %v2236_v32 }
 0x410   : > { %2568 = vmin.xlane.f32.xlu1 %v6176_v45  ;;  %v2422_v19 = vsel %vm2406_vm3, %v5412_v17, 8 }
 0x411   : > { %v2288_v35 = vmul.f32 1.442695, %v2262_v40  ;;  %v6183_v18 = vsel %vm2203_vm8, %v2422_v19, 2147483647 }
 0x412   : > { %v2580_v42 = vshra.s32 %v6183_v18, 16 }
 0x413   : > { %v6186_v62 = vpop.eup %4172  ;;  %4174 = vpow2.f32 %v2288_v35 }
 0x414   : > { %v2327_v44 = vsel %vm2203_vm8, %v6186_v62, 0.0  ;;  %v6190_v13 = vcvt.s32.f32 %v2580_v42 }
 0x415   : > { %2328 = vadd.xlane.f32.xlu0 %v2327_v44 }
 0x416   : > { %2583 = vmin.xlane.f32.xlu2 %v6190_v13 }
 0x419   : > { %v6193_v10 = vpop.eup %4174  ;;  %v2239_v25 = vpop.xlane.xlu1 %2238 }
 0x41a   : > { %v2263_v26 = vsub.f32 %v5983_v12, %v2239_v25  ;;  %vm2407_vm4 = vcmp.eq.f32.partialorder %v5983_v12, %v2239_v25  ;;  %v2330_v1 = vsel %vm2203_vm8, %v6193_v10, 0.0 }
 0x41b   : > { %v2423_v7 = vsel %vm2407_vm4, %v5412_v17, 8  ;;  %2331 = vadd.xlane.f32.xlu1 %v2330_v1 }
 0x41c   : > { %v2290_v47 = vmul.f32 1.442695, %v2263_v26  ;;  %v6201_v5 = vsel %vm2203_vm8, %v2423_v7, 2147483647 }
 0x41d   : > { %v2595_v38 = vshra.s32 %v6201_v5, 16 }
 0x41e   : > { %4176 = vpow2.f32 %v2290_v47 }
 0x41f   : > { %v6204_v58 = vcvt.s32.f32 %v2595_v38 }
 0x421   : > { %2598 = vmin.xlane.f32.xlu0 %v6204_v58 }
 0x424   : > { %v6207_v43 = vpop.eup %4176 }
 0x425   : > { %v2333_v12 = vsel %vm2203_vm8, %v6207_v43, 0.0 }
 0x426   : > { %2334 = vadd.xlane.f32.xlu2 %v2333_v12 }
 0x428   : > { %v2242_v32 = vpop.xlane.xlu2 %2241 }
 0x429   : > { %v2264_v40 = vsub.f32 %v6002_v49, %v2242_v32  ;;  %vm2408_vm5 = vcmp.eq.f32.partialorder %v6002_v49, %v2242_v32 }
 0x42a   : > { %v2424_v19 = vsel %vm2408_vm5, %v5412_v17, 8 }
 0x42b   : > { %v2292_v35 = vmul.f32 1.442695, %v2264_v40  ;;  %v6215_v42 = vsel %vm2203_vm8, %v2424_v19, 2147483647 }
 0x42c   : > { %v2610_v44 = vshra.s32 %v6215_v42, 16 }
 0x42d   : > { %4178 = vpow2.f32 %v2292_v35 }
 0x42e   : > { %v6218_v25 = vcvt.s32.f32 %v2610_v44  ;;  %v6220_v26 = vpop.xlane.xlu0 %2244  ;;  %v2429_v44 = vand.u32 65535, %v6035_v33 }
 0x42f   : > { %vm2409_vm6 = vcmp.eq.f32.partialorder %v6011_v20, %v6220_v26 }
 0x430   : > { %2613 = vmin.xlane.f32.xlu1 %v6218_v25  ;;  %v2425_v49 = vsel %vm2409_vm6, %v5412_v17, 8 }
 0x431   : > { %v6227_v1 = vsel %vm2203_vm8, %v2425_v49, 2147483647 }
 0x432   : > { %v2625_v7 = vshra.s32 %v6227_v1, 16 }
 0x433   : > { %v6230_v47 = vpop.eup %4178 }
 0x434   : > { %v2336_v38 = vsel %vm2203_vm8, %v6230_v47, 0.0  ;;  %v6234_v12 = vcvt.s32.f32 %v2625_v7 }
 0x435   : > { %2337 = vadd.xlane.f32.xlu0 %v2336_v38  ;;  %v2431_v38 = vcvt.s32.f32 %v2429_v44 }
 0x436   : > { %2628 = vmin.xlane.f32.xlu2 %v6234_v12 }
 0x439   : > { %v6237_v32 = vpop.xlane.xlu1 %2247 }
 0x43a   : > { %vm2410_vm7 = vcmp.eq.f32.partialorder %v6025_v9, %v6237_v32 }
 0x43b   : > { %v2426_v40 = vsel %vm2410_vm7, %v5412_v17, 8 }
 0x43c   : > { %v6243_v19 = vsel %vm2203_vm8, %v2426_v40, 2147483647 }
 0x43d   : > { %v2640_v35 = vshra.s32 %v6243_v19, 16 }
 0x43f   : > { %v6247_v49 = vcvt.s32.f32 %v2640_v35 }
 0x441   : > { %2643 = vmin.xlane.f32.xlu0 %v6247_v49  ;;  %v6251_v7 = vpop.xlane.xlu1 %2433 }
 0x442   : > { %vm2435_vm9 = vcmp.eq.f32.partialorder %v6044_v59, %v6251_v7 }
 0x443   : > { %v2436_v36 = vsel %vm2435_vm9, %v2431_v38, inf }
 0x444   : > { %2437 = vmin.xlane.f32.xlu2 %v2436_v36  ;;  %v2444_v36 = vand.u32 65535, %v6070_v27 }
 0x446   : > { %v2302_v40 = vpop.xlane.xlu0 %2301  ;;  %v2446_v27 = vcvt.s32.f32 %v2444_v36 }
 0x447   : > { %4180 = vrcp.f32 %v2302_v40 }
 0x448   : > { %v6255_v30 = vpop.xlane.xlu2 %2250 }
 0x449   : > { %v2305_v33 = vpop.xlane.xlu1 %2304  ;;  %vm2411_vm10 = vcmp.eq.f32.partialorder %v6067_v37, %v6255_v30 }
 0x44a   : > { %4182 = vrcp.f32 %v2305_v33  ;;  %v2427_v35 = vsel %vm2411_vm10, %v5412_v17, 8  ;;  %v2474_v17 = vand.u32 65535, %v6077_v60  ;;  %v2459_v60 = vand.u32 65535, %v6060_v4 }
 0x44b   : > { %v6261_v29 = vsel %vm2203_vm8, %v2427_v35, 2147483647 }
 0x44c   : > { %v2655_v38 = vshra.s32 %v6261_v29, 16 }
 0x44d   : > { %v4181_v44 = vpop.eup %4180 }
 0x44e   : > { %v2364_v59 = vmul.f32 %v4181_v44, %v6051_v14  ;;  %v6271_v40 = vpop.xlane.xlu0 %2463  ;;  %v6276_v33 = vcvt.s32.f32 %v2655_v38  ;;  %v2476_v44 = vcvt.s32.f32 %v2474_v17  ;;  %v2461_v38 = vcvt.s32.f32 %v2459_v60 }
 0x44f   : > { %vm2465_vm13 = vcmp.eq.f32.partialorder %v6082_v3, %v6271_v40  ;;  %v2519_v60 = vand.u32 65535, %v6123_v21 }
 0x450   : > { %2380 = vst.msk [vmem:[%s6266_s22] sm:$0xff] %vm2203_vm8, %v2364_v59  ;;  %v4183_v35 = vpop.eup %4182  ;;  %v6279_v52 = vpop.xlane.xlu2 %2448  ;;  %2658 = vmin.xlane.f32.xlu1 %v6276_v33  ;;  %v2466_v17 = vsel %vm2465_vm13, %v2461_v38, inf }
 0x451   : > { %v2365_v28 = vmul.f32 %v4183_v35, %v6063_v22  ;;  %v6282_v14 = vpop.xlane.xlu1 %2478  ;;  %vm2450_vm11 = vcmp.eq.f32.partialorder %v6087_v6, %v6279_v52  ;;  %v2521_v21 = vcvt.s32.f32 %v2519_v60 }
 0x452   : > { %vm2480_vm12 = vcmp.eq.f32.partialorder %v6089_v16, %v6282_v14  ;;  %v2451_v59 = vsel %vm2450_vm11, %v2446_v27, inf  ;;  %v2504_v16 = vand.u32 65535, %v6100_v55 }
 0x453   : > { %2381 = vst.msk [vmem:[%s6266_s22 + $0x8] sm:$0xff] %vm2203_vm8, %v2365_v28  ;;  %v2481_v22 = vsel %vm2480_vm12, %v2476_v44, inf  ;;  %2452 = vmin.xlane.f32.xlu0 %v2451_v59  ;;  %v2489_v44 = vand.u32 65535, %v6110_v48 }
 0x454   : > { %2482 = vmin.xlane.f32.xlu2 %v2481_v22  ;;  %v2506_v3 = vcvt.s32.f32 %v2504_v16 }
 0x455   : > { %v2491_v38 = vcvt.s32.f32 %v2489_v44 }
 0x456   : > { %v2311_v36 = vpop.xlane.xlu0 %2310 }
 0x457   : > { %4184 = vrcp.f32 %v2311_v36 }
 0x458   : > { %v2308_v6 = vpop.xlane.xlu2 %2307  ;;  %2467 = vmin.xlane.f32.xlu1 %v2466_v17 }
 0x459   : > { %v2314_v35 = vpop.xlane.xlu1 %2313  ;;  %4186 = vrcp.f32 %v2308_v6 }
 0x45a   : > { %4188 = vrcp.f32 %v2314_v35  ;;  %v2534_v35 = vand.u32 65535, %v6143_v34 }
 0x45c   : > { %v2536_v60 = vcvt.s32.f32 %v2534_v35 }
 0x45d   : > { %v4185_v28 = vpop.eup %4184 }
 0x45e   : > { %v2367_v4 = vmul.f32 %v4185_v28, %v6091_v51  ;;  %v6295_v27 = vpop.xlane.xlu0 %2508 }
 0x45f   : > { %vm2510_vm14 = vcmp.eq.f32.partialorder %v6118_v31, %v6295_v27  ;;  %v4187_v59 = vpop.eup %4186 }
 0x460   : > { %2383 = vst.msk [vmem:[%s6266_s22 + $0x18] sm:$0xff] %vm2203_vm8, %v2367_v4  ;;  %v2511_v55 = vsel %vm2510_vm14, %v2506_v3, inf  ;;  %v4189_v22 = vpop.eup %4188  ;;  %v2366_v36 = vmul.f32 %v4187_v59, %v6097_v63  ;;  %v6304_v51 = vpop.xlane.xlu2 %2493 }
 0x461   : > { %2512 = vmin.xlane.f32.xlu1 %v2511_v55  ;;  %v2368_v48 = vmul.f32 %v4189_v22, %v6104_v0  ;;  %vm2495_vm15 = vcmp.eq.f32.partialorder %v6127_v46, %v6304_v51 }
 0x462   : > { %2382 = vst.msk [vmem:[%s6266_s22 + $0x10] sm:$0xff] %vm2203_vm8, %v2366_v36  ;;  %v2496_v17 = vsel %vm2495_vm15, %v2491_v38, inf }
 0x463   : > { %v6309_v31 = vpop.xlane.xlu1 %2523  ;;  %2384 = vst.msk [vmem:[%s6266_s22 + $0x20] sm:$0xff] %vm2203_vm8, %v2368_v48  ;;  %2497 = vmin.xlane.f32.xlu0 %v2496_v17 }
 0x464   : > { %vm2525_vm0 = vcmp.eq.f32.partialorder %v6129_v39, %v6309_v31  ;;  %v2549_v39 = vand.u32 65535, %v6156_v41 }
 0x465   : > { %v2526_v63 = vsel %vm2525_vm0, %v2521_v21, inf }
 0x466   : > { %2527 = vmin.xlane.f32.xlu2 %v2526_v63 }
 0x468   : > { %v2320_v6 = vpop.xlane.xlu0 %2319  ;;  %v2317_v0 = vpop.xlane.xlu2 %2316 }
 0x469   : > { %4190 = vrcp.f32 %v2320_v6 }
 0x46a   : > { %4192 = vrcp.f32 %v2317_v0 }
 0x46e   : > { %v2323_v46 = vpop.xlane.xlu1 %2322 }
 0x46f   : > { %v4191_v16 = vpop.eup %4190  ;;  %4194 = vrcp.f32 %v2323_v46  ;;  %v2594_v46 = vand.u32 65535, %v6201_v5 }
 0x470   : > { %v2370_v28 = vmul.f32 %v4191_v16, %v6137_v53  ;;  %v4193_v4 = vpop.eup %4192  ;;  %v6323_v3 = vpop.xlane.xlu2 %2538  ;;  %v2551_v53 = vcvt.s32.f32 %v2549_v39 }
 0x471   : > { %v2369_v44 = vmul.f32 %v4193_v4, %v6135_v23  ;;  %vm2540_vm1 = vcmp.eq.f32.partialorder %v6158_v54, %v6323_v3  ;;  %v2564_v54 = vand.u32 65535, %v6173_v50  ;;  %v2596_v35 = vcvt.s32.f32 %v2594_v46 }
 0x472   : > { %2386 = vst.msk [vmem:[%s6266_s22 + $0x30] sm:$0xff] %vm2203_vm8, %v2370_v28  ;;  %v2541_v34 = vsel %vm2540_vm1, %v2536_v60, inf }
 0x473   : > { %2385 = vst.msk [vmem:[%s6266_s22 + $0x28] sm:$0xff] %vm2203_vm8, %v2369_v44  ;;  %2542 = vmin.xlane.f32.xlu0 %v2541_v34  ;;  %v2566_v21 = vcvt.s32.f32 %v2564_v54  ;;  %v2265_v44 = vsub.f32 %v6011_v20, %v6220_v26  ;;  %v2624_v34 = vand.u32 65535, %v6227_v1 }
 0x474   : > { %v6329_v55 = vpop.xlane.xlu0 %2553 }
 0x475   : > { %v4195_v41 = vpop.eup %4194  ;;  %vm2555_vm2 = vcmp.eq.f32.partialorder %v6162_v61, %v6329_v55  ;;  %v2579_v61 = vand.u32 65535, %v6183_v18 }
 0x476   : > { %v2371_v23 = vmul.f32 %v4195_v41, %v6147_v11  ;;  %v2556_v59 = vsel %vm2555_vm2, %v2551_v53, inf  ;;  %v2294_v53 = vmul.f32 1.442695, %v2265_v44  ;;  %v2626_v41 = vcvt.s32.f32 %v2624_v34 }
 0x477   : > { %2557 = vmin.xlane.f32.xlu1 %v2556_v59  ;;  %v2581_v50 = vcvt.s32.f32 %v2579_v61  ;;  %v2639_v59 = vand.u32 65535, %v6243_v19 }
 0x478   : > { %2387 = vst.msk [vmem:[%s6266_s22 + $0x38] sm:$0xff] %vm2203_vm8, %v2371_v23 }
 0x479   : > { %v2326_v22 = vpop.xlane.xlu2 %2325 }
 0x47a   : > { %4196 = vrcp.f32 %v2326_v22 }
 0x480   : > { %v4197_v36 = vpop.eup %4196 }
 0x481   : > { %v2372_v38 = vmul.f32 %v4197_v36, %v6165_v8 }
 0x483   : > { %v6338_v48 = vpop.xlane.xlu1 %2568  ;;  %2388 = vst.msk [vmem:[%s6266_s22 + $0x40] sm:$0xff] %vm2203_vm8, %v2372_v38 }
 0x484   : > { %vm2570_vm3 = vcmp.eq.f32.partialorder %v6176_v45, %v6338_v48 }
 0x485   : > { %v2571_v11 = vsel %vm2570_vm3, %v2566_v21, inf }
 0x486   : > { %2572 = vmin.xlane.f32.xlu2 %v2571_v11 }
 0x488   : > { %v2329_v17 = vpop.xlane.xlu0 %2328 }
 0x489   : > { %4198 = vrcp.f32 %v2329_v17  ;;  %v6345_v63 = vpop.xlane.xlu2 %2583 }
 0x48a   : > { %vm2585_vm4 = vcmp.eq.f32.partialorder %v6190_v13, %v6345_v63 }
 0x48b   : > { %v2586_v8 = vsel %vm2585_vm4, %v2581_v50, inf }
 0x48c   : > { %2587 = vmin.xlane.f32.xlu0 %v2586_v8 }
 0x48e   : > { %v2332_v6 = vpop.xlane.xlu1 %2331 }
 0x48f   : > { %v4199_v0 = vpop.eup %4198  ;;  %4200 = vrcp.f32 %v2332_v6 }
 0x490   : > { %v2373_v45 = vmul.f32 %v4199_v0, %v6186_v62  ;;  %v2609_v62 = vand.u32 65535, %v6215_v42  ;;  %v7114_v0 = vld [vmem:[#allocation18_spill] sm:$0xff] }
 0x492   : > { %2389 = vst.msk [vmem:[%s6266_s22 + $0x48] sm:$0xff] %vm2203_vm8, %v2373_v45 }
 0x494   : > { %v6353_v18 = vpop.xlane.xlu0 %2598 }
 0x495   : > { %v4201_v16 = vpop.eup %4200  ;;  %vm2600_vm5 = vcmp.eq.f32.partialorder %v6204_v58, %v6353_v18  ;;  %v2611_v58 = vcvt.s32.f32 %v2609_v62  ;;  %v2470_v62 = vcvt.f32.s32 %v6271_v40  ;;  %v2515_v40 = vcvt.f32.s32 %v6295_v27 }
 0x496   : > { %v2374_v13 = vmul.f32 %v4201_v16, %v6193_v10  ;;  %v2601_v28 = vsel %vm2600_vm5, %v2596_v35, inf  ;;  %v2654_v35 = vand.u32 65535, %v6261_v29  ;;  %v2485_v29 = vcvt.f32.s32 %v6282_v14 }
 0x497   : > { %2602 = vmin.xlane.f32.xlu1 %v2601_v28 }
 0x498   : > { %2390 = vst.msk [vmem:[%s6266_s22 + $0x50] sm:$0xff] %vm2203_vm8, %v2374_v13  ;;  %v7115_v13 = vld [vmem:[#allocation17_spill] sm:$0xff]  ;;  %v2656_v34 = vcvt.s32.f32 %v2654_v35 }
 0x499   : > { %v2335_v39 = vpop.xlane.xlu2 %2334 }
 0x49a   : > { %4202 = vrcp.f32 %v2335_v39 }
 0x4a0   : > { %v4203_v5 = vpop.eup %4202 }
 0x4a1   : > { %v2375_v4 = vmul.f32 %v4203_v5, %v6207_v43 }
 0x4a3   : > { %2391 = vst.msk [vmem:[%s6266_s22 + $0x58] sm:$0xff] %vm2203_vm8, %v2375_v4  ;;  %v6366_v60 = vpop.xlane.xlu1 %2613  ;;  %v7116_v4 = vld [vmem:[#allocation16_spill] sm:$0xff] }
 0x4a4   : > { %vm2615_vm6 = vcmp.eq.f32.partialorder %v6218_v25, %v6366_v60  ;;  %v2266_v25 = vsub.f32 %v6025_v9, %v6237_v32  ;;  %v2440_v9 = vcvt.f32.s32 %v6251_v7  ;;  %v4470_v7 = vmov 0.0  }
 0x4a5   : > { %v2616_v10 = vsel %vm2615_vm6, %v2611_v58, inf  ;;  %v2455_v58 = vcvt.f32.s32 %v6279_v52 }
 0x4a6   : > { %2617 = vmin.xlane.f32.xlu2 %v2616_v10  ;;  %v2296_v22 = vmul.f32 1.442695, %v2266_v25  ;;  %v2441_v38 = vshll.u32 %v2440_v9, 16  ;;  %v2500_v25 = vcvt.f32.s32 %v6304_v51  ;;  %v2545_v9 = vcvt.f32.s32 %v6323_v3 }
 0x4a7   : > { %v2560_v51 = vcvt.f32.s32 %v6329_v55  ;;  %v7120_v55 = vld [vmem:[#allocation81_spill] sm:$0xff] }
 0x4a8   : > { %v2338_v42 = vpop.xlane.xlu0 %2337 }
 0x4a9   : > { %4204 = vrcp.f32 %v2338_v42  ;;  %v6371_v43 = vpop.xlane.xlu2 %2628  ;;  %v7117_v42 = vld [vmem:[#allocation84_spill] sm:$0xff] }
 0x4aa   : > { %4206 = vpow2.f32 %v2294_v53  ;;  %vm2630_vm7 = vcmp.eq.f32.partialorder %v6234_v12, %v6371_v43  ;;  %v2641_v12 = vcvt.s32.f32 %v2639_v59  ;;  %v7118_v59 = vld [vmem:[#allocation80_spill] sm:$0xff] }
 0x4ab   : > { %v2631_v20 = vsel %vm2630_vm7, %v2626_v41, inf  ;;  %4208 = vpow2.f32 %v2296_v22 }
 0x4ac   : > { %2632 = vmin.xlane.f32.xlu0 %v2631_v20 }
 0x4af   : > { %v4205_v26 = vpop.eup %4204 }
 0x4b0   : > { %v6377_v23 = vpop.eup %4206  ;;  %v2376_v1 = vmul.f32 %v4205_v26, %v6230_v47  ;;  %v2267_v47 = vsub.f32 %v6067_v37, %v6255_v30  ;;  %v7113_v37 = vld [vmem:[#allocation19_spill] sm:$0xff] }
 0x4b1   : > { %v2339_v54 = vsel %vm2203_vm8, %v6377_v23, 0.0  ;;  %v6392_v11 = vpop.eup %4208 }
 0x4b2   : > { %2392 = vst.msk [vmem:[%s6266_s22 + $0x60] sm:$0xff] %vm2203_vm8, %v2376_v1  ;;  %v2298_v17 = vmul.f32 1.442695, %v2267_v47  ;;  %v2342_v30 = vsel %vm2203_vm8, %v6392_v11, 0.0  ;;  %v6420_v1 = vshll.u32 %v2470_v62, 16 }
 0x4b4   : > { %v6385_v36 = vpop.xlane.xlu0 %2643  ;;  %2340 = vadd.xlane.f32.xlu0 %v2339_v54  ;;  %4210 = vpow2.f32 %v2298_v17  ;;  %v2486_v17 = vshll.u32 %v2485_v29, 16  ;;  %v7123_v29 = vld [vmem:[#allocation22_spill] sm:$0xff] }
 0x4b5   : > { %vm2645_vm9 = vcmp.eq.f32.partialorder %v6247_v49, %v6385_v36 }
 0x4b6   : > { %v2646_v32 = vsel %vm2645_vm9, %v2641_v12, inf  ;;  %v2530_v12 = vcvt.f32.s32 %v6309_v31 }
 0x4b7   : > { %2647 = vmin.xlane.f32.xlu1 %v2646_v32  ;;  %v2438_v19 = vpop.xlane.xlu2 %2437 }
 0x4b8   : > { %v2439_v21 = vcvt.f32.s32 %v2438_v19 }
 0x4ba   : > { %v2442_v61 = vadd.s32 %v2441_v38, %v2439_v21  ;;  %v6418_v52 = vpop.eup %4210  ;;  %v7119_v38 = vld [vmem:[#allocation82_spill] sm:$0xff] }
 0x4bb   : > { %v2345_v31 = vsel %vm2203_vm8, %v6418_v52, 0.0 }
 0x4bc   : > { %vm2668_vm10 = vcmp.eq.s32.totalorder %v2442_v61, 0  ;;  %vm2748_vm11 = vcmp.eq.s32.totalorder %v2442_v61, 1  ;;  %vm2828_vm12 = vcmp.eq.s32.totalorder %v2442_v61, 2  ;;  %vm2908_vm13 = vcmp.eq.s32.totalorder %v2442_v61, 3 }
 0x4bd   : > { %v3824_v50 = vsel %vm2668_vm10, 1.0, %v4470_v7  ;;  %v3840_v49 = vsel %vm2748_vm11, 1.0, %v4470_v7  ;;  %v3856_v8 = vsel %vm2828_vm12, 1.0, %v4470_v7  ;;  %v3872_v46 = vsel %vm2908_vm13, 1.0, %v4470_v7 }
 0x4be   : > { %v2716_v6 = vmul.f32 %v3824_v50, %v7113_v37  ;;  %v2796_v45 = vmul.f32 %v3840_v49, %v7114_v0  ;;  %vm2988_vm14 = vcmp.eq.s32.totalorder %v2442_v61, 4  ;;  %v2876_v28 = vmul.f32 %v3856_v8, %v7115_v13 }
 0x4bf   : > { %2343 = vadd.xlane.f32.xlu1 %v2342_v30  ;;  %vm3068_vm15 = vcmp.eq.s32.totalorder %v2442_v61, 5  ;;  %v3888_v39 = vsel %vm2988_vm14, 1.0, %v4470_v7  ;;  %v2956_v44 = vmul.f32 %v3872_v46, %v7116_v4  ;;  %vm3148_vm0 = vcmp.eq.s32.totalorder %v2442_v61, 6 }
 0x4c0   : > { %v2812_v16 = vadd.f32 %v2796_v45, %v2716_v6  ;;  %v3904_v10 = vsel %vm3068_vm15, 1.0, %v4470_v7  ;;  %v3036_v41 = vmul.f32 %v3888_v39, %v7117_v42  ;;  %vm3228_vm1 = vcmp.eq.s32.totalorder %v2442_v61, 7  ;;  %v7121_v39 = vld [vmem:[#allocation25_spill] sm:$0xff] }
 0x4c1   : > { %v3920_v26 = vsel %vm3148_vm0, 1.0, %v4470_v7  ;;  %v3116_v22 = vmul.f32 %v3904_v10, %v7118_v59  ;;  %v3936_v27 = vsel %vm3228_vm1, 1.0, %v4470_v7  ;;  %v6428_v50 = vshll.u32 %v2500_v25, 16 }
 0x4c2   : > { %v2892_v5 = vadd.f32 %v2876_v28, %v2812_v16  ;;  %v3196_v21 = vmul.f32 %v3920_v26, %v7119_v38  ;;  %v6430_v49 = vshll.u32 %v2515_v40, 16  ;;  %v3276_v8 = vmul.f32 %v3936_v27, %v7120_v55  ;;  %v7124_v40 = vld [vmem:[#allocation21_spill] sm:$0xff] }
 0x4c3   : > { %v6411_v20 = vpop.xlane.xlu1 %2658  ;;  %v6435_v6 = vshll.u32 %v2530_v12, 16  ;;  %v6437_v0 = vshll.u32 %v2545_v9, 16  ;;  %v6439_v45 = vshll.u32 %v2560_v51, 16  ;;  %v2575_v46 = vcvt.f32.s32 %v6338_v48  ;;  %v7126_v12 = vld [vmem:[#allocation85_spill] sm:$0xff] }
 0x4c4   : > { %v2972_v53 = vadd.f32 %v2956_v44, %v2892_v5  ;;  %vm2660_vm2 = vcmp.eq.f32.partialorder %v6276_v33, %v6411_v20  ;;  %v2456_v33 = vshll.u32 %v2455_v58, 16  ;;  %v7122_v5 = vld [vmem:[#allocation20_spill] sm:$0xff]  ;;  %v2590_v25 = vcvt.f32.s32 %v6345_v63 }
 0x4c5   : > { %v2661_v54 = vsel %vm2660_vm2, %v2656_v34, inf  ;;  %v6453_v10 = vshll.u32 %v2575_v46, 16  ;;  %v7182_v63 = vld [vmem:[#allocation128_spill] sm:$0xff] }
 0x4c6   : > { %v3052_v14 = vadd.f32 %v3036_v41, %v2972_v53  ;;  %2662 = vmin.xlane.f32.xlu2 %v2661_v54  ;;  %v2453_v32 = vpop.xlane.xlu0 %2452 }
 0x4c7   : > { %v2483_v47 = vpop.xlane.xlu2 %2482  ;;  %v2454_v61 = vcvt.f32.s32 %v2453_v32 }
 0x4c8   : > { %v3132_v19 = vadd.f32 %v3116_v22, %v3052_v14  ;;  %v2484_v37 = vcvt.f32.s32 %v2483_v47  ;;  %v7125_v14 = vld [vmem:[#allocation86_spill] sm:$0xff] }
 0x4c9   : > { %v2457_v30 = vadd.s32 %v2456_v33, %v2454_v61  ;;  %v7127_v47 = vld [vmem:[#allocation30_spill] sm:$0xff] }
 0x4ca   : > { %v3212_v3 = vadd.f32 %v3196_v21, %v3132_v19  ;;  %v2487_v44 = vadd.s32 %v2486_v17, %v2484_v37  ;;  %v7128_v19 = vld [vmem:[#allocation33_spill] sm:$0xff]  ;;  %v7130_v37 = vld [vmem:[#allocation87_spill] sm:$0xff] }
 0x4cb   : > { %vm2669_vm3 = vcmp.eq.s32.totalorder %v2457_v30, 0  ;;  %vm2749_vm4 = vcmp.eq.s32.totalorder %v2457_v30, 1  ;;  %vm2829_vm5 = vcmp.eq.s32.totalorder %v2457_v30, 2  ;;  %vm2909_vm6 = vcmp.eq.s32.totalorder %v2457_v30, 3  ;;  %v2468_v58 = vpop.xlane.xlu1 %2467 }
 0x4cc   : > { %v3292_v35 = vadd.f32 %v3276_v8, %v3212_v3  ;;  %v3825_v16 = vsel %vm2669_vm3, 1.0, %v4470_v7  ;;  %v3841_v13 = vsel %vm2749_vm4, 1.0, %v4470_v7  ;;  %v3857_v28 = vsel %vm2829_vm5, 1.0, %v4470_v7  ;;  %v7129_v3 = vld [vmem:[#allocation26_spill] sm:$0xff] }
 0x4cd   : > { %v2717_v62 = vmul.f32 %v3825_v16, %v7121_v39  ;;  %v2797_v48 = vmul.f32 %v3841_v13, %v7122_v5  ;;  %v3873_v4 = vsel %vm2909_vm6, 1.0, %v4470_v7  ;;  %vm2989_vm7 = vcmp.eq.s32.totalorder %v2457_v30, 4 }
 0x4ce   : > { %3308 = vst [vmem:[%s6447_s3] sm:$0xff] %v3292_v35  ;;  %vm3069_vm9 = vcmp.eq.s32.totalorder %v2457_v30, 5  ;;  %vm3149_vm10 = vcmp.eq.s32.totalorder %v2457_v30, 6  ;;  %2346 = vadd.xlane.f32.xlu2 %v2345_v31  ;;  %v2877_v53 = vmul.f32 %v3857_v28, %v7123_v29  ;;  %v3889_v42 = vsel %vm2989_vm7, 1.0, %v4470_v7  ;;  %v7131_v35 = vld [vmem:[#allocation31_spill] sm:$0xff] }
 0x4cf   : > { %v2813_v34 = vadd.f32 %v2797_v48, %v2717_v62  ;;  %v3905_v41 = vsel %vm3069_vm9, 1.0, %v4470_v7  ;;  %v2957_v26 = vmul.f32 %v3873_v4, %v7124_v40  ;;  %v3037_v59 = vmul.f32 %v3889_v42, %v7125_v14  ;;  %v7132_v4 = vld [vmem:[#allocation83_spill] sm:$0xff]  ;;  %v7133_v40 = vld [vmem:[#allocation100_spill] sm:$0xff] }
 0x4d0   : > { %v3921_v22 = vsel %vm3149_vm10, 1.0, %v4470_v7  ;;  %vm3229_vm11 = vcmp.eq.s32.totalorder %v2457_v30, 7  ;;  %vm2671_vm12 = vcmp.eq.s32.totalorder %v2487_v44, 0  ;;  %vm2751_vm13 = vcmp.eq.s32.totalorder %v2487_v44, 1 }
 0x4d1   : > { %v2893_v54 = vadd.f32 %v2877_v53, %v2813_v34  ;;  %v3117_v9 = vmul.f32 %v3905_v41, %v7126_v12  ;;  %v3827_v51 = vsel %vm2671_vm12, 1.0, %v4470_v7  ;;  %v3843_v27 = vsel %vm2751_vm13, 1.0, %v4470_v7 }
 0x4d2   : > { %vm2831_vm14 = vcmp.eq.s32.totalorder %v2487_v44, 2  ;;  %v2719_v33 = vmul.f32 %v3827_v51, %v7127_v47  ;;  %v2799_v38 = vmul.f32 %v3843_v27, %v7128_v19  ;;  %v3937_v61 = vsel %vm3229_vm11, 1.0, %v4470_v7  ;;  %v7136_v47 = vld [vmem:[#allocation95_spill] sm:$0xff] }
 0x4d3   : > { %v2973_v32 = vadd.f32 %v2957_v26, %v2893_v54  ;;  %v3859_v21 = vsel %vm2831_vm14, 1.0, %v4470_v7  ;;  %vm2911_vm15 = vcmp.eq.s32.totalorder %v2487_v44, 3  ;;  %vm2991_vm0 = vcmp.eq.s32.totalorder %v2487_v44, 4  ;;  %v7135_v54 = vld [vmem:[#allocation96_spill] sm:$0xff] }
 0x4d4   : > { %vm3071_vm1 = vcmp.eq.s32.totalorder %v2487_v44, 5  ;;  %v2815_v31 = vadd.f32 %v2799_v38, %v2719_v33  ;;  %v2879_v55 = vmul.f32 %v3859_v21, %v7129_v3  ;;  %v3875_v8 = vsel %vm2911_vm15, 1.0, %v4470_v7  ;;  %v2513_v30 = vpop.xlane.xlu1 %2512 }
 0x4d5   : > { %v3053_v17 = vadd.f32 %v3037_v59, %v2973_v32  ;;  %v3197_v46 = vmul.f32 %v3921_v22, %v7130_v37  ;;  %v2959_v16 = vmul.f32 %v3875_v8, %v7131_v35  ;;  %v3891_v13 = vsel %vm2991_vm0, 1.0, %v4470_v7  ;;  %v7134_v59 = vld [vmem:[#allocation94_spill] sm:$0xff] }
 0x4d6   : > { %vm3151_vm2 = vcmp.eq.s32.totalorder %v2487_v44, 6  ;;  %v2895_v39 = vadd.f32 %v2879_v55, %v2815_v31  ;;  %v3907_v62 = vsel %vm3071_vm1, 1.0, %v4470_v7  ;;  %v2498_v48 = vpop.xlane.xlu0 %2497  ;;  %v3277_v34 = vmul.f32 %v3937_v61, %v7132_v4  ;;  %v7137_v61 = vld [vmem:[#allocation27_spill] sm:$0xff]  ;;  %v7138_v31 = vld [vmem:[#allocation28_spill] sm:$0xff] }
 0x4d7   : > { %v3133_v28 = vadd.f32 %v3117_v9, %v3053_v17  ;;  %v3923_v5 = vsel %vm3151_vm2, 1.0, %v4470_v7  ;;  %vm3231_vm3 = vcmp.eq.s32.totalorder %v2487_v44, 7  ;;  %v2469_v29 = vcvt.f32.s32 %v2468_v58 }
 0x4d8   : > { %v2514_v53 = vcvt.f32.s32 %v2513_v30  ;;  %v2975_v41 = vadd.f32 %v2959_v16, %v2895_v39  ;;  %v3039_v26 = vmul.f32 %v3891_v13, %v7133_v40  ;;  %v3939_v14 = vsel %vm3231_vm3, 1.0, %v4470_v7  ;;  %v7139_v30 = vld [vmem:[#allocation24_spill] sm:$0xff] }
 0x4d9   : > { %v3213_v42 = vadd.f32 %v3197_v46, %v3133_v28  ;;  %v3119_v22 = vmul.f32 %v3907_v62, %v7134_v59  ;;  %v3199_v12 = vmul.f32 %v3923_v5, %v7135_v54  ;;  %v2472_v9 = vadd.s32 %v6420_v1, %v2469_v29  ;;  %v6486_v33 = vpop.xlane.xlu2 %2527  ;;  %v7140_v28 = vld [vmem:[#allocation23_spill] sm:$0xff]  ;;  %v7144_v59 = vld [vmem:[#allocation37_spill] sm:$0xff] }
 0x4da   : > { %v2499_v51 = vcvt.f32.s32 %v2498_v48  ;;  %v3055_v32 = vadd.f32 %v3039_v26, %v2975_v41  ;;  %v3279_v44 = vmul.f32 %v3939_v14, %v7136_v47  ;;  %v6484_v58 = vadd.s32 %v6430_v49, %v2514_v53  ;;  %v7141_v62 = vld [vmem:[#allocation91_spill] sm:$0xff]  ;;  %v7146_v47 = vld [vmem:[#allocation88_spill] sm:$0xff] }
 0x4db   : > { %v3293_v27 = vadd.f32 %v3277_v34, %v3213_v42  ;;  %vm2670_vm4 = vcmp.eq.s32.totalorder %v2472_v9, 0  ;;  %vm2750_vm5 = vcmp.eq.s32.totalorder %v2472_v9, 1  ;;  %vm2830_vm6 = vcmp.eq.s32.totalorder %v2472_v9, 2  ;;  %v7142_v34 = vld [vmem:[#allocation90_spill] sm:$0xff] }
 0x4dc   : > { %vm2910_vm7 = vcmp.eq.s32.totalorder %v2472_v9, 3  ;;  %v3135_v19 = vadd.f32 %v3119_v22, %v3055_v32  ;;  %v3826_v38 = vsel %vm2670_vm4, 1.0, %v4470_v7  ;;  %v3842_v1 = vsel %vm2750_vm5, 1.0, %v4470_v7 }
 0x4dd   : > { %3309 = vst [vmem:[%s6447_s3 + $0x8] sm:$0xff] %v3293_v27  ;;  %v3858_v21 = vsel %vm2830_vm6, 1.0, %v4470_v7  ;;  %v2718_v17 = vmul.f32 %v3826_v38, %v7137_v61  ;;  %v2798_v3 = vmul.f32 %v3842_v1, %v7138_v31  ;;  %v3874_v49 = vsel %vm2910_vm7, 1.0, %v4470_v7  ;;  %v7147_v38 = vld [vmem:[#allocation39_spill] sm:$0xff] }
 0x4de   : > { %v2529_v55 = vcvt.f32.s32 %v6486_v33  ;;  %v3215_v8 = vadd.f32 %v3199_v12, %v3135_v19  ;;  %v2878_v37 = vmul.f32 %v3858_v21, %v7139_v30  ;;  %vm2990_vm9 = vcmp.eq.s32.totalorder %v2472_v9, 4  ;;  %v7148_v31 = vld [vmem:[#allocation35_spill] sm:$0xff]  ;;  %v7150_v30 = vld [vmem:[#allocation112_spill] sm:$0xff] }
 0x4df   : > { %vm3070_vm10 = vcmp.eq.s32.totalorder %v2472_v9, 5  ;;  %v2814_v46 = vadd.f32 %v2798_v3, %v2718_v17  ;;  %v3890_v35 = vsel %vm2990_vm9, 1.0, %v4470_v7  ;;  %vm3150_vm11 = vcmp.eq.s32.totalorder %v2472_v9, 6 }
 0x4e0   : > { %v3906_v16 = vsel %vm3070_vm10, 1.0, %v4470_v7  ;;  %v3295_v13 = vadd.f32 %v3279_v44, %v3215_v8  ;;  %v2958_v39 = vmul.f32 %v3874_v49, %v7140_v28  ;;  %v3038_v5 = vmul.f32 %v3890_v35, %v7141_v62  ;;  %v7149_v49 = vld [vmem:[#allocation113_spill] sm:$0xff] }
 0x4e1   : > { %v6502_v48 = vadd.s32 %v6428_v50, %v2499_v51  ;;  %v2894_v4 = vadd.f32 %v2878_v37, %v2814_v46  ;;  %v3118_v29 = vmul.f32 %v3906_v16, %v7142_v34  ;;  %vm3230_vm12 = vcmp.eq.s32.totalorder %v2472_v9, 7  ;;  %v7143_v50 = vld [vmem:[#allocation38_spill] sm:$0xff]  ;;  %v7145_v9 = vld [vmem:[#allocation89_spill] sm:$0xff] }
 0x4e2   : > { %vm2673_vm13 = vcmp.eq.s32.totalorder %v6484_v58, 0  ;;  %3311 = vst [vmem:[%s6447_s3 + $0x18] sm:$0xff] %v3295_v13  ;;  %v3922_v53 = vsel %vm3150_vm11, 1.0, %v4470_v7  ;;  %vm2753_vm14 = vcmp.eq.s32.totalorder %v6484_v58, 1  ;;  %vm2833_vm15 = vcmp.eq.s32.totalorder %v6484_v58, 2 }
 0x4e3   : > { %v3829_v42 = vsel %vm2673_vm13, 1.0, %v4470_v7  ;;  %v2974_v41 = vadd.f32 %v2958_v39, %v2894_v4  ;;  %v3938_v40 = vsel %vm3230_vm12, 1.0, %v4470_v7  ;;  %v3845_v14 = vsel %vm2753_vm14, 1.0, %v4470_v7  ;;  %v7151_v39 = vld [vmem:[#allocation29_spill] sm:$0xff] }
 0x4e4   : > { %v2721_v26 = vmul.f32 %v3829_v42, %v7143_v50  ;;  %v2801_v22 = vmul.f32 %v3845_v14, %v7144_v59  ;;  %v3861_v54 = vsel %vm2833_vm15, 1.0, %v4470_v7  ;;  %vm2913_vm0 = vcmp.eq.s32.totalorder %v6484_v58, 3  ;;  %v7153_v42 = vld [vmem:[#allocation32_spill] sm:$0xff]  ;;  %v7154_v14 = vld [vmem:[#allocation34_spill] sm:$0xff] }
 0x4e5   : > { %vm2993_vm1 = vcmp.eq.s32.totalorder %v6484_v58, 4  ;;  %v3054_v12 = vadd.f32 %v3038_v5, %v2974_v41  ;;  %v3198_v51 = vmul.f32 %v3922_v53, %v7145_v9  ;;  %v3877_v27 = vsel %vm2913_vm0, 1.0, %v4470_v7 }
 0x4e6   : > { %v3893_v32 = vsel %vm2993_vm1, 1.0, %v4470_v7  ;;  %v3278_v44 = vmul.f32 %v3938_v40, %v7146_v47  ;;  %v2817_v19 = vadd.f32 %v2801_v22, %v2721_v26  ;;  %v2881_v1 = vmul.f32 %v3861_v54, %v7147_v38 }
 0x4e7   : > { %vm3073_vm2 = vcmp.eq.s32.totalorder %v6484_v58, 5  ;;  %v3134_v21 = vadd.f32 %v3118_v29, %v3054_v12  ;;  %vm3153_vm3 = vcmp.eq.s32.totalorder %v6484_v58, 6  ;;  %vm3233_vm4 = vcmp.eq.s32.totalorder %v6484_v58, 7  ;;  %v7152_v29 = vld [vmem:[#allocation111_spill] sm:$0xff] }
 0x4e8   : > { %v3909_v61 = vsel %vm3073_vm2, 1.0, %v4470_v7  ;;  %v2897_v17 = vadd.f32 %v2881_v1, %v2817_v19  ;;  %v2961_v3 = vmul.f32 %v3877_v27, %v7148_v31  ;;  %v3041_v8 = vmul.f32 %v3893_v32, %v7149_v49  ;;  %v7155_v32 = vld [vmem:[#allocation107_spill] sm:$0xff]  ;;  %v7156_v19 = vld [vmem:[#allocation36_spill] sm:$0xff]  ;;  %v7157_v1 = vld [vmem:[#allocation105_spill] sm:$0xff] }
 0x4e9   : > { %v3121_v37 = vmul.f32 %v3909_v61, %v7150_v30  ;;  %v3214_v46 = vadd.f32 %v3198_v51, %v3134_v21  ;;  %v3925_v35 = vsel %vm3153_vm3, 1.0, %v4470_v7  ;;  %v3941_v16 = vsel %vm3233_vm4, 1.0, %v4470_v7  ;;  %v2543_v51 = vpop.xlane.xlu0 %2542  ;;  %v7158_v61 = vld [vmem:[#allocation101_spill] sm:$0xff]  ;;  %v7159_v31 = vld [vmem:[#allocation106_spill] sm:$0xff] }
 0x4ea   : > { %vm2672_vm5 = vcmp.eq.s32.totalorder %v6502_v48, 0  ;;  %v2977_v13 = vadd.f32 %v2961_v3, %v2897_v17  ;;  %vm2752_vm6 = vcmp.eq.s32.totalorder %v6502_v48, 1  ;;  %vm2832_vm7 = vcmp.eq.s32.totalorder %v6502_v48, 2 }
 0x4eb   : > { %v3828_v28 = vsel %vm2672_vm5, 1.0, %v4470_v7  ;;  %v3294_v58 = vadd.f32 %v3278_v44, %v3214_v46  ;;  %v3844_v5 = vsel %vm2752_vm6, 1.0, %v4470_v7  ;;  %v3860_v4 = vsel %vm2832_vm7, 1.0, %v4470_v7  ;;  %v2558_v46 = vpop.xlane.xlu1 %2557 }
 0x4ec   : > { %v2720_v62 = vmul.f32 %v3828_v28, %v7151_v39  ;;  %v3057_v34 = vadd.f32 %v3041_v8, %v2977_v13  ;;  %v3201_v53 = vmul.f32 %v3925_v35, %v7152_v29  ;;  %v2800_v41 = vmul.f32 %v3844_v5, %v7153_v42  ;;  %v7160_v28 = vld [vmem:[#allocation43_spill] sm:$0xff] }
 0x4ed   : > { %vm2912_vm9 = vcmp.eq.s32.totalorder %v6502_v48, 3  ;;  %3310 = vst [vmem:[%s6447_s3 + $0x10] sm:$0xff] %v3294_v58  ;;  %vm2992_vm10 = vcmp.eq.s32.totalorder %v6502_v48, 4  ;;  %vm3072_vm11 = vcmp.eq.s32.totalorder %v6502_v48, 5  ;;  %vm3152_vm12 = vcmp.eq.s32.totalorder %v6502_v48, 6 }
 0x4ee   : > { %v3876_v40 = vsel %vm2912_vm9, 1.0, %v4470_v7  ;;  %v3137_v50 = vadd.f32 %v3121_v37, %v3057_v34  ;;  %v2816_v26 = vadd.f32 %v2800_v41, %v2720_v62  ;;  %v2880_v59 = vmul.f32 %v3860_v4, %v7154_v14  ;;  %v7162_v4 = vld [vmem:[#allocation41_spill] sm:$0xff] }
 0x4ef   : > { %v3892_v22 = vsel %vm2992_vm10, 1.0, %v4470_v7  ;;  %v2605_v54 = vcvt.f32.s32 %v6353_v18  ;;  %v3908_v12 = vsel %vm3072_vm11, 1.0, %v4470_v7  ;;  %v3924_v9 = vsel %vm3152_vm12, 1.0, %v4470_v7 }
 0x4f0   : > { %vm3232_vm13 = vcmp.eq.s32.totalorder %v6502_v48, 7  ;;  %v3217_v27 = vadd.f32 %v3201_v53, %v3137_v50  ;;  %v3281_v47 = vmul.f32 %v3941_v16, %v7155_v32  ;;  %v2896_v44 = vadd.f32 %v2880_v59, %v2816_v26  ;;  %v7164_v26 = vld [vmem:[#allocation40_spill] sm:$0xff] }
 0x4f1   : > { %v2960_v38 = vmul.f32 %v3876_v40, %v7156_v19  ;;  %v3040_v21 = vmul.f32 %v3892_v22, %v7157_v1  ;;  %v3120_v17 = vmul.f32 %v3908_v12, %v7158_v61  ;;  %v3200_v3 = vmul.f32 %v3924_v9, %v7159_v31  ;;  %v7163_v40 = vld [vmem:[#allocation99_spill] sm:$0xff]  ;;  %v7165_v12 = vld [vmem:[#allocation121_spill] sm:$0xff]  ;;  %v7166_v32 = vld [vmem:[#allocation116_spill] sm:$0xff] }
 0x4f2   : > { %v2532_v49 = vadd.s32 %v6435_v6, %v2529_v55  ;;  %v3297_v8 = vadd.f32 %v3281_v47, %v3217_v27  ;;  %v3940_v30 = vsel %vm3232_vm13, 1.0, %v4470_v7  ;;  %v2544_v37 = vcvt.f32.s32 %v2543_v51  ;;  %v7161_v55 = vld [vmem:[#allocation42_spill] sm:$0xff] }
 0x4f3   : > { %v2976_v48 = vadd.f32 %v2960_v38, %v2896_v44  ;;  %v2559_v62 = vcvt.f32.s32 %v2558_v46  ;;  %v3280_v50 = vmul.f32 %v3940_v30, %v7163_v40  ;;  %v7167_v44 = vld [vmem:[#allocation118_spill] sm:$0xff] }
 0x4f4   : > { %vm2674_vm14 = vcmp.eq.s32.totalorder %v2532_v49, 0  ;;  %vm2754_vm15 = vcmp.eq.s32.totalorder %v2532_v49, 1  ;;  %vm2834_vm0 = vcmp.eq.s32.totalorder %v2532_v49, 2  ;;  %vm2914_vm1 = vcmp.eq.s32.totalorder %v2532_v49, 3  ;;  %3313 = vst [vmem:[%s6447_s3 + $0x28] sm:$0xff] %v3297_v8  ;;  %v7169_v8 = vld [vmem:[#allocation44_spill] sm:$0xff] }
 0x4f5   : > { %v3056_v35 = vadd.f32 %v3040_v21, %v2976_v48  ;;  %v3830_v16 = vsel %vm2674_vm14, 1.0, %v4470_v7  ;;  %v3846_v13 = vsel %vm2754_vm15, 1.0, %v4470_v7  ;;  %v3862_v33 = vsel %vm2834_vm0, 1.0, %v4470_v7 }
 0x4f6   : > { %v2722_v6 = vmul.f32 %v3830_v16, %v7160_v28  ;;  %v2802_v58 = vmul.f32 %v3846_v13, %v7161_v55  ;;  %v3878_v39 = vsel %vm2914_vm1, 1.0, %v4470_v7  ;;  %v2882_v34 = vmul.f32 %v3862_v33, %v7162_v4  ;;  %v7170_v16 = vld [vmem:[#allocation46_spill] sm:$0xff]  ;;  %v7171_v28 = vld [vmem:[#allocation117_spill] sm:$0xff]  ;;  %v7173_v4 = vld [vmem:[#allocation123_spill] sm:$0xff] }
 0x4f7   : > { %v3136_v5 = vadd.f32 %v3120_v17, %v3056_v35  ;;  %vm2994_vm2 = vcmp.eq.s32.totalorder %v2532_v49, 4  ;;  %vm3074_vm3 = vcmp.eq.s32.totalorder %v2532_v49, 5  ;;  %vm3154_vm4 = vcmp.eq.s32.totalorder %v2532_v49, 6  ;;  %v7172_v55 = vld [vmem:[#allocation45_spill] sm:$0xff] }
 0x4f8   : > { %v2818_v29 = vadd.f32 %v2802_v58, %v2722_v6  ;;  %v3894_v53 = vsel %vm2994_vm2, 1.0, %v4470_v7  ;;  %v3910_v42 = vsel %vm3074_vm3, 1.0, %v4470_v7  ;;  %v2962_v14 = vmul.f32 %v3878_v39, %v7164_v26 }
 0x4f9   : > { %v3216_v41 = vadd.f32 %v3200_v3, %v3136_v5  ;;  %v3926_v59 = vsel %vm3154_vm4, 1.0, %v4470_v7  ;;  %v3042_v9 = vmul.f32 %v3894_v53, %v7165_v12  ;;  %vm3234_vm5 = vcmp.eq.s32.totalorder %v2532_v49, 7  ;;  %v6583_v61 = vpop.xlane.xlu2 %2572  ;;  %v7168_v3 = vld [vmem:[#allocation48_spill] sm:$0xff]  ;;  %v7174_v53 = vld [vmem:[#allocation122_spill] sm:$0xff] }
 0x4fa   : > { %v2898_v22 = vadd.f32 %v2882_v34, %v2818_v29  ;;  %v2547_v51 = vadd.s32 %v6437_v0, %v2544_v37  ;;  %v3122_v47 = vmul.f32 %v3910_v42, %v7166_v32  ;;  %v3202_v19 = vmul.f32 %v3926_v59, %v7167_v44  ;;  %v7176_v59 = vld [vmem:[#allocation50_spill] sm:$0xff]  ;;  %v7178_v44 = vld [vmem:[#allocation51_spill] sm:$0xff] }
 0x4fb   : > { %v3296_v27 = vadd.f32 %v3280_v50, %v3216_v41  ;;  %v3942_v38 = vsel %vm3234_vm5, 1.0, %v4470_v7  ;;  %v6581_v21 = vadd.s32 %v6439_v45, %v2559_v62  ;;  %v2574_v45 = vcvt.f32.s32 %v6583_v61  ;;  %v7175_v50 = vld [vmem:[#allocation124_spill] sm:$0xff] }
 0x4fc   : > { %v2978_v1 = vadd.f32 %v2962_v14, %v2898_v22  ;;  %vm2675_vm6 = vcmp.eq.s32.totalorder %v2547_v51, 0  ;;  %vm2755_vm7 = vcmp.eq.s32.totalorder %v2547_v51, 1  ;;  %vm2835_vm9 = vcmp.eq.s32.totalorder %v2547_v51, 2 }
 0x4fd   : > { %3312 = vst [vmem:[%s6447_s3 + $0x20] sm:$0xff] %v3296_v27  ;;  %v3831_v17 = vsel %vm2675_vm6, 1.0, %v4470_v7  ;;  %v3847_v0 = vsel %vm2755_vm7, 1.0, %v4470_v7  ;;  %vm2915_vm10 = vcmp.eq.s32.totalorder %v2547_v51, 3  ;;  %v3863_v30 = vsel %vm2835_vm9, 1.0, %v4470_v7  ;;  %v7177_v27 = vld [vmem:[#allocation49_spill] sm:$0xff] }
 0x4fe   : > { %v3058_v31 = vadd.f32 %v3042_v9, %v2978_v1  ;;  %v2723_v49 = vmul.f32 %v3831_v17, %v7168_v3  ;;  %v2803_v48 = vmul.f32 %v3847_v0, %v7169_v8  ;;  %v3879_v37 = vsel %vm2915_vm10, 1.0, %v4470_v7  ;;  %v7179_v3 = vld [vmem:[#allocation119_spill] sm:$0xff] }
 0x4ff   : > { %vm2995_vm11 = vcmp.eq.s32.totalorder %v2547_v51, 4  ;;  %vm3075_vm12 = vcmp.eq.s32.totalorder %v2547_v51, 5  ;;  %v2883_v13 = vmul.f32 %v3863_v30, %v7170_v16  ;;  %v3282_v6 = vmul.f32 %v3942_v38, %v7171_v28  ;;  %v7180_v30 = vld [vmem:[#allocation47_spill] sm:$0xff]  ;;  %v7181_v16 = vld [vmem:[#allocation129_spill] sm:$0xff] }
 0x500   : > { %v3138_v46 = vadd.f32 %v3122_v47, %v3058_v31  ;;  %v2819_v35 = vadd.f32 %v2803_v48, %v2723_v49  ;;  %v3895_v33 = vsel %vm2995_vm11, 1.0, %v4470_v7  ;;  %v2963_v58 = vmul.f32 %v3879_v37, %v7172_v55  ;;  %v7183_v55 = vld [vmem:[#allocation127_spill] sm:$0xff] }
 0x501   : > { %v3911_v39 = vsel %vm3075_vm12, 1.0, %v4470_v7  ;;  %vm3155_vm13 = vcmp.eq.s32.totalorder %v2547_v51, 6  ;;  %v3043_v34 = vmul.f32 %v3895_v33, %v7173_v4  ;;  %vm3235_vm14 = vcmp.eq.s32.totalorder %v2547_v51, 7  ;;  %v7185_v4 = vld [vmem:[#allocation54_spill] sm:$0xff] }
 0x502   : > { %v3218_v62 = vadd.f32 %v3202_v19, %v3138_v46  ;;  %v2899_v5 = vadd.f32 %v2883_v13, %v2819_v35  ;;  %v3927_v29 = vsel %vm3155_vm13, 1.0, %v4470_v7  ;;  %v3123_v42 = vmul.f32 %v3911_v39, %v7174_v53  ;;  %v2588_v39 = vpop.xlane.xlu0 %2587 }
 0x503   : > { %vm2676_vm15 = vcmp.eq.s32.totalorder %v6581_v21, 0  ;;  %vm2756_vm0 = vcmp.eq.s32.totalorder %v6581_v21, 1  ;;  %v3203_v26 = vmul.f32 %v3927_v29, %v7175_v50  ;;  %vm2836_vm1 = vcmp.eq.s32.totalorder %v6581_v21, 2  ;;  %v7186_v29 = vld [vmem:[#allocation53_spill] sm:$0xff] }
 0x504   : > { %v3298_v41 = vadd.f32 %v3282_v6, %v3218_v62  ;;  %v2979_v40 = vadd.f32 %v2963_v58, %v2899_v5  ;;  %v3832_v14 = vsel %vm2676_vm15, 1.0, %v4470_v7  ;;  %v3848_v12 = vsel %vm2756_vm0, 1.0, %v4470_v7 }
 0x505   : > { %v2724_v22 = vmul.f32 %v3832_v14, %v7176_v59  ;;  %vm2916_vm2 = vcmp.eq.s32.totalorder %v6581_v21, 3  ;;  %v3943_v51 = vsel %vm3235_vm14, 1.0, %v4470_v7  ;;  %v2804_v32 = vmul.f32 %v3848_v12, %v7177_v27  ;;  %v7187_v12 = vld [vmem:[#allocation125_spill] sm:$0xff] }
 0x506   : > { %3314 = vst [vmem:[%s6447_s3 + $0x30] sm:$0xff] %v3298_v41  ;;  %v3059_v9 = vadd.f32 %v3043_v34, %v2979_v40  ;;  %v3864_v47 = vsel %vm2836_vm1, 1.0, %v4470_v7  ;;  %v3880_v38 = vsel %vm2916_vm2, 1.0, %v4470_v7  ;;  %vm2996_vm3 = vcmp.eq.s32.totalorder %v6581_v21, 4 }
 0x507   : > { %v2884_v19 = vmul.f32 %v3864_v47, %v7178_v44  ;;  %vm3076_vm4 = vcmp.eq.s32.totalorder %v6581_v21, 5  ;;  %v2820_v61 = vadd.f32 %v2804_v32, %v2724_v22  ;;  %v3896_v17 = vsel %vm2996_vm3, 1.0, %v4470_v7  ;;  %v7188_v47 = vld [vmem:[#allocation52_spill] sm:$0xff] }
 0x508   : > { %v3139_v1 = vadd.f32 %v3123_v42, %v3059_v9  ;;  %v3912_v0 = vsel %vm3076_vm4, 1.0, %v4470_v7  ;;  %v2591_v31 = vshll.u32 %v2590_v25, 16  ;;  %v3283_v49 = vmul.f32 %v3943_v51, %v7179_v3  ;;  %v7191_v3 = vld [vmem:[#allocation132_spill] sm:$0xff] }
 0x509   : > { %vm3156_vm5 = vcmp.eq.s32.totalorder %v6581_v21, 6  ;;  %vm3236_vm6 = vcmp.eq.s32.totalorder %v6581_v21, 7  ;;  %v2900_v48 = vadd.f32 %v2884_v19, %v2820_v61  ;;  %v2964_v37 = vmul.f32 %v3880_v38, %v7180_v30 }
 0x50a   : > { %v3219_v8 = vadd.f32 %v3203_v26, %v3139_v1  ;;  %v3928_v46 = vsel %vm3156_vm5, 1.0, %v4470_v7  ;;  %v2606_v35 = vshll.u32 %v2605_v54, 16  ;;  %v3044_v13 = vmul.f32 %v3896_v17, %v7181_v16  ;;  %v2603_v41 = vpop.xlane.xlu1 %2602  ;;  %v7189_v1 = vld [vmem:[#allocation134_spill] sm:$0xff] }
 0x50b   : > { %v3124_v25 = vmul.f32 %v3912_v0, %v7182_v63  ;;  %v2577_v33 = vadd.s32 %v6453_v10, %v2574_v45  ;;  %v2980_v6 = vadd.f32 %v2964_v37, %v2900_v48  ;;  %v3204_v21 = vmul.f32 %v3928_v46, %v7183_v55  ;;  %v7184_v10 = vld [vmem:[#allocation55_spill] sm:$0xff]  ;;  %v7190_v17 = vld [vmem:[#allocation130_spill] sm:$0xff]  ;;  %v7192_v46 = vld [vmem:[#allocation60_spill] sm:$0xff] }
 0x50c   : > { %v3299_v28 = vadd.f32 %v3283_v49, %v3219_v8  ;;  %v3944_v58 = vsel %vm3236_vm6, 1.0, %v4470_v7  ;;  %v2589_v42 = vcvt.f32.s32 %v2588_v39  ;;  %v2604_v27 = vcvt.f32.s32 %v2603_v41 }
 0x50d   : > { %vm2677_vm7 = vcmp.eq.s32.totalorder %v2577_v33, 0  ;;  %vm2757_vm9 = vcmp.eq.s32.totalorder %v2577_v33, 1  ;;  %vm2837_vm10 = vcmp.eq.s32.totalorder %v2577_v33, 2  ;;  %vm2917_vm11 = vcmp.eq.s32.totalorder %v2577_v33, 3 }
 0x50e   : > { %3315 = vst [vmem:[%s6447_s3 + $0x38] sm:$0xff] %v3299_v28  ;;  %v3060_v18 = vadd.f32 %v3044_v13, %v2980_v6  ;;  %v3833_v54 = vsel %vm2677_vm7, 1.0, %v4470_v7  ;;  %v3849_v62 = vsel %vm2757_vm9, 1.0, %v4470_v7  ;;  %v3865_v5 = vsel %vm2837_vm10, 1.0, %v4470_v7  ;;  %v7193_v13 = vld [vmem:[#allocation56_spill] sm:$0xff] }
 0x50f   : > { %v2725_v45 = vmul.f32 %v3833_v54, %v7184_v10  ;;  %v2805_v34 = vmul.f32 %v3849_v62, %v7185_v4  ;;  %v2885_v53 = vmul.f32 %v3865_v5, %v7186_v29  ;;  %v3881_v50 = vsel %vm2917_vm11, 1.0, %v4470_v7  ;;  %v7195_v54 = vld [vmem:[#allocation131_spill] sm:$0xff] }
 0x510   : > { %v3140_v40 = vadd.f32 %v3124_v25, %v3060_v18  ;;  %vm2997_vm12 = vcmp.eq.s32.totalorder %v2577_v33, 4  ;;  %vm3077_vm13 = vcmp.eq.s32.totalorder %v2577_v33, 5  ;;  %vm3157_vm14 = vcmp.eq.s32.totalorder %v2577_v33, 6 }
 0x511   : > { %v2821_v26 = vadd.f32 %v2805_v34, %v2725_v45  ;;  %v3897_v14 = vsel %vm2997_vm12, 1.0, %v4470_v7  ;;  %v3913_v59 = vsel %vm3077_vm13, 1.0, %v4470_v7  ;;  %v3284_v9 = vmul.f32 %v3944_v58, %v7187_v12  ;;  %v7196_v45 = vld [vmem:[#allocation57_spill] sm:$0xff] }
 0x512   : > { %v3220_v22 = vadd.f32 %v3204_v21, %v3140_v40  ;;  %v3929_v51 = vsel %vm3157_vm14, 1.0, %v4470_v7  ;;  %v2965_v44 = vmul.f32 %v3881_v50, %v7188_v47  ;;  %vm3237_vm15 = vcmp.eq.s32.totalorder %v2577_v33, 7  ;;  %v7194_v33 = vld [vmem:[#allocation58_spill] sm:$0xff]  ;;  %v7197_v34 = vld [vmem:[#allocation137_spill] sm:$0xff] }
 0x513   : > { %v2901_v32 = vadd.f32 %v2885_v53, %v2821_v26  ;;  %v2592_v19 = vadd.s32 %v2591_v31, %v2589_v42  ;;  %v3045_v61 = vmul.f32 %v3897_v14, %v7189_v1  ;;  %v3125_v0 = vmul.f32 %v3913_v59, %v7190_v17  ;;  %v7198_v40 = vld [vmem:[#allocation62_spill] sm:$0xff]  ;;  %v7199_v59 = vld [vmem:[#allocation135_spill] sm:$0xff]  ;;  %v7200_v12 = vld [vmem:[#allocation61_spill] sm:$0xff] }
 0x514   : > { %v3300_v38 = vadd.f32 %v3284_v9, %v3220_v22  ;;  %v3205_v49 = vmul.f32 %v3929_v51, %v7191_v3  ;;  %v3945_v48 = vsel %vm3237_vm15, 1.0, %v4470_v7  ;;  %v2607_v55 = vadd.s32 %v2606_v35, %v2604_v27  ;;  %v7201_v27 = vld [vmem:[#allocation138_spill] sm:$0xff]  ;;  %v7202_v17 = vld [vmem:[#allocation63_spill] sm:$0xff] }
 0x515   : > { %v2981_v8 = vadd.f32 %v2965_v44, %v2901_v32  ;;  %vm2678_vm0 = vcmp.eq.s32.totalorder %v2592_v19, 0  ;;  %vm2758_vm1 = vcmp.eq.s32.totalorder %v2592_v19, 1  ;;  %vm2838_vm2 = vcmp.eq.s32.totalorder %v2592_v19, 2 }
 0x516   : > { %3316 = vst [vmem:[%s6447_s3 + $0x40] sm:$0xff] %v3300_v38  ;;  %v3834_v30 = vsel %vm2678_vm0, 1.0, %v4470_v7  ;;  %v3850_v37 = vsel %vm2758_vm1, 1.0, %v4470_v7  ;;  %vm2918_vm3 = vcmp.eq.s32.totalorder %v2592_v19, 3  ;;  %v3866_v25 = vsel %vm2838_vm2, 1.0, %v4470_v7 }
 0x517   : > { %v3061_v31 = vadd.f32 %v3045_v61, %v2981_v8  ;;  %v2726_v16 = vmul.f32 %v3834_v30, %v7192_v46  ;;  %v2806_v63 = vmul.f32 %v3850_v37, %v7193_v13  ;;  %v2886_v28 = vmul.f32 %v3866_v25, %v7194_v33  ;;  %v7204_v46 = vld [vmem:[#allocation59_spill] sm:$0xff] }
 0x518   : > { %v3882_v6 = vsel %vm2918_vm3, 1.0, %v4470_v7  ;;  %vm2998_vm4 = vcmp.eq.s32.totalorder %v2592_v19, 4  ;;  %vm3078_vm5 = vcmp.eq.s32.totalorder %v2592_v19, 5  ;;  %v2620_v18 = vcvt.f32.s32 %v6366_v60 }
 0x519   : > { %v3141_v21 = vadd.f32 %v3125_v0, %v3061_v31  ;;  %v2822_v58 = vadd.f32 %v2806_v63, %v2726_v16  ;;  %v3898_v39 = vsel %vm2998_vm4, 1.0, %v4470_v7  ;;  %v3285_v62 = vmul.f32 %v3945_v48, %v7195_v54  ;;  %v2618_v3 = vpop.xlane.xlu2 %2617  ;;  %v7206_v54 = vld [vmem:[#allocation142_spill] sm:$0xff] }
 0x51a   : > { %vm3158_vm6 = vcmp.eq.s32.totalorder %v2592_v19, 6  ;;  %v2966_v4 = vmul.f32 %v3882_v6, %v7196_v45  ;;  %v3046_v29 = vmul.f32 %v3898_v39, %v7197_v34  ;;  %v3914_v53 = vsel %vm3078_vm5, 1.0, %v4470_v7  ;;  %v7205_v6 = vld [vmem:[#allocation143_spill] sm:$0xff] }
 0x51b   : > { %v3221_v5 = vadd.f32 %v3205_v49, %v3141_v21  ;;  %v2902_v10 = vadd.f32 %v2886_v28, %v2822_v58  ;;  %vm3238_vm7 = vcmp.eq.s32.totalorder %v2592_v19, 7  ;;  %vm2679_vm9 = vcmp.eq.s32.totalorder %v2607_v55, 0  ;;  %v7203_v19 = vld [vmem:[#allocation133_spill] sm:$0xff] }
 0x51c   : > { %vm2759_vm10 = vcmp.eq.s32.totalorder %v2607_v55, 1  ;;  %v3930_v41 = vsel %vm3158_vm6, 1.0, %v4470_v7  ;;  %v3835_v60 = vsel %vm2679_vm9, 1.0, %v4470_v7  ;;  %vm2839_vm11 = vcmp.eq.s32.totalorder %v2607_v55, 2 }
 0x51d   : > { %v3301_v35 = vadd.f32 %v3285_v62, %v3221_v5  ;;  %v2982_v42 = vadd.f32 %v2966_v4, %v2902_v10  ;;  %v2727_v50 = vmul.f32 %v3835_v60, %v7198_v40  ;;  %v3851_v26 = vsel %vm2759_vm10, 1.0, %v4470_v7  ;;  %v7207_v5 = vld [vmem:[#allocation141_spill] sm:$0xff] }
 0x51e   : > { %vm2919_vm12 = vcmp.eq.s32.totalorder %v2607_v55, 3  ;;  %v3126_v22 = vmul.f32 %v3914_v53, %v7199_v59  ;;  %v2807_v9 = vmul.f32 %v3851_v26, %v7200_v12  ;;  %v3867_v51 = vsel %vm2839_vm11, 1.0, %v4470_v7  ;;  %v7208_v53 = vld [vmem:[#allocation67_spill] sm:$0xff] }
 0x51f   : > { %3317 = vst [vmem:[%s6447_s3 + $0x48] sm:$0xff] %v3301_v35  ;;  %v3062_v14 = vadd.f32 %v3046_v29, %v2982_v42  ;;  %v3206_v32 = vmul.f32 %v3930_v41, %v7201_v27  ;;  %v3946_v47 = vsel %vm3238_vm7, 1.0, %v4470_v7  ;;  %v3883_v44 = vsel %vm2919_vm12, 1.0, %v4470_v7  ;;  %v2633_v38 = vpop.xlane.xlu0 %2632  ;;  %v7209_v42 = vld [vmem:[#allocation66_spill] sm:$0xff] }
 0x520   : > { %vm2999_vm13 = vcmp.eq.s32.totalorder %v2607_v55, 4  ;;  %v2823_v61 = vadd.f32 %v2807_v9, %v2727_v50  ;;  %v2887_v0 = vmul.f32 %v3867_v51, %v7202_v17  ;;  %vm3079_vm14 = vcmp.eq.s32.totalorder %v2607_v55, 5  ;;  %v7211_v9 = vld [vmem:[#allocation65_spill] sm:$0xff] }
 0x521   : > { %v3142_v1 = vadd.f32 %v3126_v22, %v3062_v14  ;;  %v2621_v49 = vshll.u32 %v2620_v18, 16  ;;  %v2635_v8 = vcvt.f32.s32 %v6371_v43  ;;  %v3899_v48 = vsel %vm2999_vm13, 1.0, %v4470_v7  ;;  %v7210_v14 = vld [vmem:[#allocation139_spill] sm:$0xff] }
 0x522   : > { %vm3159_vm15 = vcmp.eq.s32.totalorder %v2607_v55, 6  ;;  %v3286_v37 = vmul.f32 %v3946_v47, %v7203_v19  ;;  %v2903_v31 = vadd.f32 %v2887_v0, %v2823_v61  ;;  %v2967_v16 = vmul.f32 %v3883_v44, %v7204_v46  ;;  %v7212_v44 = vld [vmem:[#allocation64_spill] sm:$0xff] }
 0x523   : > { %v3222_v30 = vadd.f32 %v3206_v32, %v3142_v1  ;;  %v3915_v13 = vsel %vm3079_vm14, 1.0, %v4470_v7  ;;  %v3931_v63 = vsel %vm3159_vm15, 1.0, %v4470_v7  ;;  %vm3239_vm0 = vcmp.eq.s32.totalorder %v2607_v55, 7  ;;  %v7213_v61 = vld [vmem:[#allocation148_spill] sm:$0xff] }
 0x524   : > { %v2619_v25 = vcvt.f32.s32 %v2618_v3  ;;  %v2983_v28 = vadd.f32 %v2967_v16, %v2903_v31  ;;  %v3047_v43 = vmul.f32 %v3899_v48, %v7205_v6  ;;  %v2636_v21 = vshll.u32 %v2635_v8, 16  ;;  %v7214_v8 = vld [vmem:[#allocation72_spill] sm:$0xff]  ;;  %v7217_v6 = vld [vmem:[#allocation70_spill] sm:$0xff] }
 0x525   : > { %v3302_v33 = vadd.f32 %v3286_v37, %v3222_v30  ;;  %v2634_v39 = vcvt.f32.s32 %v2633_v38  ;;  %v3127_v62 = vmul.f32 %v3915_v13, %v7206_v54  ;;  %v3207_v10 = vmul.f32 %v3931_v63, %v7207_v5  ;;  %v7215_v19 = vld [vmem:[#allocation68_spill] sm:$0xff] }
 0x526   : > { %v2622_v58 = vadd.s32 %v2621_v49, %v2619_v25  ;;  %v3063_v18 = vadd.f32 %v3047_v43, %v2983_v28  ;;  %v3947_v45 = vsel %vm3239_vm0, 1.0, %v4470_v7  ;;  %v2650_v22 = vcvt.f32.s32 %v6385_v36  ;;  %v7216_v16 = vld [vmem:[#allocation144_spill] sm:$0xff] }
 0x527   : > { %3318 = vst [vmem:[%s6447_s3 + $0x50] sm:$0xff] %v3302_v33  ;;  %v6694_v40 = vadd.s32 %v2636_v21, %v2634_v39  ;;  %v2341_v50 = vpop.xlane.xlu0 %2340  ;;  %v3287_v59 = vmul.f32 %v3947_v45, %v7210_v14  ;;  %v7218_v39 = vld [vmem:[#allocation146_spill] sm:$0xff]  ;;  %v7220_v45 = vld [vmem:[#allocation69_spill] sm:$0xff] }
 0x528   : > { %vm2680_vm1 = vcmp.eq.s32.totalorder %v2622_v58, 0  ;;  %vm2760_vm2 = vcmp.eq.s32.totalorder %v2622_v58, 1  ;;  %vm2840_vm3 = vcmp.eq.s32.totalorder %v2622_v58, 2  ;;  %vm2920_vm4 = vcmp.eq.s32.totalorder %v2622_v58, 3  ;;  %v7221_v14 = vld [vmem:[#allocation149_spill] sm:$0xff] }
 0x529   : > { %v3143_v55 = vadd.f32 %v3127_v62, %v3063_v18  ;;  %v3836_v4 = vsel %vm2680_vm1, 1.0, %v4470_v7  ;;  %v3852_v34 = vsel %vm2760_vm2, 1.0, %v4470_v7  ;;  %v3868_v29 = vsel %vm2840_vm3, 1.0, %v4470_v7  ;;  %v7219_v62 = vld [vmem:[#allocation145_spill] sm:$0xff] }
 0x52a   : > { %v2728_v35 = vmul.f32 %v3836_v4, %v7208_v53  ;;  %v2808_v41 = vmul.f32 %v3852_v34, %v7209_v42  ;;  %v3884_v60 = vsel %vm2920_vm4, 1.0, %v4470_v7  ;;  %vm3000_vm5 = vcmp.eq.s32.totalorder %v2622_v58, 4  ;;  %v2648_v32 = vpop.xlane.xlu1 %2647 }
 0x52b   : > { %v3223_v26 = vadd.f32 %v3207_v10, %v3143_v55  ;;  %vm3080_vm6 = vcmp.eq.s32.totalorder %v2622_v58, 5  ;;  %v2888_v51 = vmul.f32 %v3868_v29, %v7211_v9  ;;  %v3900_v27 = vsel %vm3000_vm5, 1.0, %v4470_v7 }
 0x52c   : > { %v2824_v12 = vadd.f32 %v2808_v41, %v2728_v35  ;;  %v2968_v38 = vmul.f32 %v3884_v60, %v7212_v44  ;;  %vm3160_vm7 = vcmp.eq.s32.totalorder %v2622_v58, 6  ;;  %4212 = vrcp.f32 %v2341_v50  ;;  %v7222_v44 = vld [vmem:[#allocation147_spill] sm:$0xff] }
 0x52d   : > { %v3303_v47 = vadd.f32 %v3287_v59, %v3223_v26  ;;  %v3048_v17 = vmul.f32 %v3900_v27, %v7213_v61  ;;  %v3916_v0 = vsel %vm3080_vm6, 1.0, %v4470_v7  ;;  %vm2681_vm9 = vcmp.eq.s32.totalorder %v6694_v40, 0 }
 0x52e   : > { %v2904_v1 = vadd.f32 %v2888_v51, %v2824_v12  ;;  %vm3240_vm10 = vcmp.eq.s32.totalorder %v2622_v58, 7  ;;  %v3837_v36 = vsel %vm2681_vm9, 1.0, %v4470_v7  ;;  %vm2761_vm11 = vcmp.eq.s32.totalorder %v6694_v40, 1 }
 0x52f   : > { %3319 = vst [vmem:[%s6447_s3 + $0x58] sm:$0xff] %v3303_v47  ;;  %vm2841_vm12 = vcmp.eq.s32.totalorder %v6694_v40, 2  ;;  %v3932_v49 = vsel %vm3160_vm7, 1.0, %v4470_v7  ;;  %v2729_v48 = vmul.f32 %v3837_v36, %v7214_v8  ;;  %v3853_v30 = vsel %vm2761_vm11, 1.0, %v4470_v7  ;;  %v7225_v8 = vld [vmem:[#allocation75_spill] sm:$0xff] }
 0x530   : > { %v2984_v3 = vadd.f32 %v2968_v38, %v2904_v1  ;;  %v2809_v37 = vmul.f32 %v3853_v30, %v7215_v19  ;;  %v3869_v31 = vsel %vm2841_vm12, 1.0, %v4470_v7  ;;  %vm2921_vm13 = vcmp.eq.s32.totalorder %v6694_v40, 3  ;;  %v7223_v38 = vld [vmem:[#allocation74_spill] sm:$0xff] }
 0x531   : > { %vm3001_vm14 = vcmp.eq.s32.totalorder %v6694_v40, 4  ;;  %v3128_v13 = vmul.f32 %v3916_v0, %v7216_v16  ;;  %v3948_v63 = vsel %vm3240_vm10, 1.0, %v4470_v7  ;;  %v3885_v25 = vsel %vm2921_vm13, 1.0, %v4470_v7 }
 0x532   : > { %v3064_v46 = vadd.f32 %v3048_v17, %v2984_v3  ;;  %v4213_v33 = vpop.eup %4212  ;;  %v2825_v28 = vadd.f32 %v2809_v37, %v2729_v48  ;;  %v2889_v43 = vmul.f32 %v3869_v31, %v7217_v6  ;;  %v3901_v21 = vsel %vm3001_vm14, 1.0, %v4470_v7  ;;  %v2344_v35 = vpop.xlane.xlu1 %2343 }
 0x533   : > { %vm3081_vm15 = vcmp.eq.s32.totalorder %v6694_v40, 5  ;;  %v3208_v18 = vmul.f32 %v3932_v49, %v7218_v39  ;;  %vm3161_vm0 = vcmp.eq.s32.totalorder %v6694_v40, 6  ;;  %v2651_v54 = vshll.u32 %v2650_v22, 16 }
 0x534   : > { %v3144_v58 = vadd.f32 %v3128_v13, %v3064_v46  ;;  %v3288_v5 = vmul.f32 %v3948_v63, %v7219_v62  ;;  %v2905_v10 = vadd.f32 %v2889_v43, %v2825_v28  ;;  %v2969_v55 = vmul.f32 %v3885_v25, %v7220_v45  ;;  %v7226_v46 = vld [vmem:[#allocation71_spill] sm:$0xff] }
 0x535   : > { %v3049_v34 = vmul.f32 %v3901_v21, %v5644_v2  ;;  %v3917_v29 = vsel %vm3081_vm15, 1.0, %v4470_v7  ;;  %v2377_v53 = vmul.f32 %v4213_v33, %v6377_v23  ;;  %v3933_v41 = vsel %vm3161_vm0, 1.0, %v4470_v7 }
 0x536   : > { %v3224_v4 = vadd.f32 %v3208_v18, %v3144_v58  ;;  %v2985_v42 = vadd.f32 %v2969_v55, %v2905_v10  ;;  %vm3241_vm1 = vcmp.eq.s32.totalorder %v6694_v40, 7  ;;  %v2649_v60 = vcvt.f32.s32 %v2648_v32  ;;  %v7227_v18 = vld [vmem:[#allocation79_spill] sm:$0xff] }
 0x537   : > { %2393 = vst.msk [vmem:[%s6266_s22 + $0x68] sm:$0xff] %vm2203_vm8, %v2377_v53  ;;  %v3129_v59 = vmul.f32 %v3917_v29, %v7221_v14  ;;  %4214 = vrcp.f32 %v2344_v35  ;;  %v2665_v12 = vcvt.f32.s32 %v6411_v20  ;;  %v3209_v23 = vmul.f32 %v3933_v41, %v5659_v56  ;;  %v7224_v56 = vld [vmem:[#allocation73_spill] sm:$0xff]  ;;  %v7230_v35 = vld [vmem:[#allocation150_spill] sm:$0xff] }
 0x538   : > { %v3304_v50 = vadd.f32 %v3288_v5, %v3224_v4  ;;  %v3065_v26 = vadd.f32 %v3049_v34, %v2985_v42  ;;  %v2652_v22 = vadd.s32 %v2651_v54, %v2649_v60  ;;  %v3949_v9 = vsel %vm3241_vm1, 1.0, %v4470_v7  ;;  %v7228_v54 = vld [vmem:[#allocation78_spill] sm:$0xff]  ;;  %v7229_v34 = vld [vmem:[#allocation77_spill] sm:$0xff] }
 0x539   : > { %v2663_v2 = vpop.xlane.xlu2 %2662  ;;  %v3289_v20 = vmul.f32 %v3949_v9, %v7222_v44  ;;  %v2666_v19 = vshll.u32 %v2665_v12, 16  ;;  %v7233_v9 = vld [vmem:[#allocation151_spill] sm:$0xff] }
 0x53a   : > { %3320 = vst [vmem:[%s6447_s3 + $0x60] sm:$0xff] %v3304_v50  ;;  %v3145_v51 = vadd.f32 %v3129_v59, %v3065_v26  ;;  %vm2682_vm2 = vcmp.eq.s32.totalorder %v2652_v22, 0  ;;  %vm2762_vm3 = vcmp.eq.s32.totalorder %v2652_v22, 1  ;;  %vm2842_vm4 = vcmp.eq.s32.totalorder %v2652_v22, 2  ;;  %v7231_v50 = vld [vmem:[#allocation76_spill] sm:$0xff] }
 0x53b   : > { %v3838_v40 = vsel %vm2682_vm2, 1.0, %v4470_v7  ;;  %v3854_v27 = vsel %vm2762_vm3, 1.0, %v4470_v7  ;;  %v3870_v32 = vsel %vm2842_vm4, 1.0, %v4470_v7  ;;  %vm2922_vm5 = vcmp.eq.s32.totalorder %v2652_v22, 3 }
 0x53c   : > { %v3225_v47 = vadd.f32 %v3209_v23, %v3145_v51  ;;  %v2730_v1 = vmul.f32 %v3838_v40, %v7223_v38  ;;  %v2810_v61 = vmul.f32 %v3854_v27, %v7224_v56  ;;  %v3886_v17 = vsel %vm2922_vm5, 1.0, %v4470_v7 }
 0x53d   : > { %vm3002_vm6 = vcmp.eq.s32.totalorder %v2652_v22, 4  ;;  %vm3082_vm7 = vcmp.eq.s32.totalorder %v2652_v22, 5  ;;  %v2664_v0 = vcvt.f32.s32 %v2663_v2  ;;  %v4215_v36 = vpop.eup %4214  ;;  %v2890_v48 = vmul.f32 %v3870_v32, %v7225_v8  ;;  %v7232_v2 = vld [vmem:[#allocation154_spill] sm:$0xff]  ;;  %v7234_v32 = vld [vmem:[#allocation153_spill] sm:$0xff] }
 0x53e   : > { %v3305_v3 = vadd.f32 %v3289_v20, %v3225_v47  ;;  %v2826_v49 = vadd.f32 %v2810_v61, %v2730_v1  ;;  %v3902_v30 = vsel %vm3002_vm6, 1.0, %v4470_v7  ;;  %v3918_v37 = vsel %vm3082_vm7, 1.0, %v4470_v7  ;;  %v7235_v20 = vld [vmem:[#allocation152_spill] sm:$0xff] }
 0x53f   : > { %vm3162_vm9 = vcmp.eq.s32.totalorder %v2652_v22, 6  ;;  %v2970_v16 = vmul.f32 %v3886_v17, %v7226_v46  ;;  %v3050_v63 = vmul.f32 %v3902_v30, %v5716_v57  ;;  %v2378_v25 = vmul.f32 %v4215_v36, %v6392_v11 }
 0x540   : > { %3321 = vst [vmem:[%s6447_s3 + $0x68] sm:$0xff] %v3305_v3  ;;  %v2906_v31 = vadd.f32 %v2890_v48, %v2826_v49  ;;  %v2667_v33 = vadd.s32 %v2666_v19, %v2664_v0  ;;  %v3130_v6 = vmul.f32 %v3918_v37, %v5707_v15  ;;  %v3934_v43 = vsel %vm3162_vm9, 1.0, %v4470_v7 }
 0x541   : > { %v2347_v13 = vpop.xlane.xlu2 %2346  ;;  %vm3242_vm10 = vcmp.eq.s32.totalorder %v2652_v22, 7  ;;  %2394 = vst.msk [vmem:[%s6266_s22 + $0x70] sm:$0xff] %vm2203_vm8, %v2378_v25  ;;  %v3210_v10 = vmul.f32 %v3934_v43, %v5693_v24 }
 0x542   : > { %4216 = vrcp.f32 %v2347_v13  ;;  %v2986_v28 = vadd.f32 %v2970_v16, %v2906_v31  ;;  %vm2683_vm11 = vcmp.eq.s32.totalorder %v2667_v33, 0  ;;  %vm2763_vm12 = vcmp.eq.s32.totalorder %v2667_v33, 1 }
 0x543   : > { %vm2843_vm13 = vcmp.eq.s32.totalorder %v2667_v33, 2  ;;  %vm2923_vm14 = vcmp.eq.s32.totalorder %v2667_v33, 3  ;;  %v3839_v58 = vsel %vm2683_vm11, 1.0, %v4470_v7  ;;  %v3855_v57 = vsel %vm2763_vm12, 1.0, %v4470_v7 }
 0x544   : > { %v3066_v21 = vadd.f32 %v3050_v63, %v2986_v28  ;;  %v3871_v11 = vsel %vm2843_vm13, 1.0, %v4470_v7  ;;  %v3950_v39 = vsel %vm3242_vm10, 1.0, %v4470_v7  ;;  %v2731_v15 = vmul.f32 %v3839_v58, %v7227_v18 }
 0x545   : > { %v2811_v62 = vmul.f32 %v3855_v57, %v7228_v54  ;;  %v3887_v45 = vsel %vm2923_vm14, 1.0, %v4470_v7  ;;  %vm3003_vm15 = vcmp.eq.s32.totalorder %v2667_v33, 4  ;;  %v2891_v29 = vmul.f32 %v3871_v11, %v7229_v34 }
 0x546   : > { %v3146_v5 = vadd.f32 %v3130_v6, %v3066_v21  ;;  %vm3083_vm0 = vcmp.eq.s32.totalorder %v2667_v33, 5  ;;  %v3290_v42 = vmul.f32 %v3950_v39, %v7230_v35  ;;  %v3903_v41 = vsel %vm3003_vm15, 1.0, %v4470_v7 }
 0x547   : > { %v2827_v4 = vadd.f32 %v2811_v62, %v2731_v15  ;;  %v2971_v26 = vmul.f32 %v3887_v45, %v7231_v50  ;;  %vm3163_vm1 = vcmp.eq.s32.totalorder %v2667_v33, 6  ;;  %v3919_v59 = vsel %vm3083_vm0, 1.0, %v4470_v7 }
 0x548   : > { %v4217_v55 = vpop.eup %4216  ;;  %v3226_v53 = vadd.f32 %v3210_v10, %v3146_v5  ;;  %v3051_v12 = vmul.f32 %v3903_v41, %v7232_v2  ;;  %vm3243_vm2 = vcmp.eq.s32.totalorder %v2667_v33, 7  ;;  %v3935_v23 = vsel %vm3163_vm1, 1.0, %v4470_v7 }
 0x549   : > { %v2907_v60 = vadd.f32 %v2891_v29, %v2827_v4  ;;  %v2379_v24 = vmul.f32 %v4217_v55, %v6418_v52  ;;  %v3131_v51 = vmul.f32 %v3919_v59, %v7233_v9  ;;  %v3951_v40 = vsel %vm3243_vm2, 1.0, %v4470_v7 }
 0x54a   : > { %v3306_v14 = vadd.f32 %v3290_v42, %v3226_v53  ;;  %v3211_v47 = vmul.f32 %v3935_v23, %v7234_v32  ;;  %v3291_v38 = vmul.f32 %v3951_v40, %v7235_v20 }
 0x54b   : > { %v2987_v22 = vadd.f32 %v2971_v26, %v2907_v60  ;;  %2395 = vst.msk [vmem:[%s6266_s22 + $0x78] sm:$0xff] %vm2203_vm8, %v2379_v24 }
 0x54c   : > { %3322 = vst [vmem:[%s6447_s3 + $0x70] sm:$0xff] %v3306_v14 }
 0x54d   : > { %v3067_v52 = vadd.f32 %v3051_v12, %v2987_v22 }
 0x54f   : > { %v3147_v27 = vadd.f32 %v3131_v51, %v3067_v52 }
 0x551   : > { %v3227_v44 = vadd.f32 %v3211_v47, %v3147_v27 }
 0x553   : > { %v3307_v1 = vadd.f32 %v3291_v38, %v3227_v44 }
 0x555   : > { %3323 = vst [vmem:[%s6447_s3 + $0x78] sm:$0xff] %v3307_v1 }
 0x556   : > { %4411 = shalt.err (!%p4408_p12)
}
 0x557   : > { %s4471_s5 = smov 128   ;;  %s4472_s3 = smov 8  }
 0x558   : > { %4073 = dma.vmem_to_hbm [thread:$0]  (%p4607_p3), %s3347_s13, 2048, %s3349_s29, %s3330_s26, %s4471_s5, %s4471_s5, %s4472_s3  }
 0x559 PF: > { %s3371_s21 = sand.u32 1, %s4446_s30   ;;  %p7236_p13 = scmp.ge.s32.totalorder %s4458_s12, 2 }
 0x55a   : > { %s3372_s23 = scalar_lea.sflag [#allocation4], %s3371_s21 }
 0x55b   : > { %p4093_p0 = pnand %p7236_p13, %p4558_p6 }
 0x55d   : > { %p4094_p5 = pneg %p4093_p0 }
 0x55f   : > { %4441 = dma.done.wait (%p4094_p5), %s3372_s23, 2048  }
 0x560   : > { %4443 = vsyncadd (%p4094_p5), %s3372_s23, 4294965248  ;;  %p25_p7 = scmp.ge.s32.totalorder %s4597_s17, 4   ;;  %s7237_s30 = smov %s4450_s10 }
 0x561   : > { %s7238_s10 = smov %s4454_s11  ;;  %s7239_s11 = smov %s4613_s27 }
 0x562   : > { %s7240_s12 = smov %s4597_s17  ;;  %27 = sbr.rel (!%p25_p7) target bundleno = 11 (0xb), region = 125 }
 0x567   :  { %3378 = vsyncpa [#allocation3], 1 }
 0x568   :  { %3380 = vsyncpa [#allocation3 + $0x1], 1 }
 0x569   :  { %3381 = vsyncpa [#allocation6], 1 }
 0x56a   :  { %3382 = vsyncpa [#allocation9], 1 }
 0x56b   :  { %3383 = vsyncpa [#allocation4], 1 }
 0x56c   :  { %3385 = vsyncpa [#allocation4 + $0x1], 1 }

</bundles_post_ra>
